<compile_context>
chip_gen: v6e
topology: v6e:2x2x1
jax: 0.10.0
libtpu: 0.0.40
codegen_flags: <defaults>
</compile_context>

<pallas_src>
import numpy as np

import jax
import jax.numpy as jnp
from jax.experimental import pallas as pl
from jax.experimental.pallas import tpu as pltpu


# ----------------------------------------------------------------------------
# Static LeNet geometry
# ----------------------------------------------------------------------------
K = 5                         # conv kernel size
C1_OUT, C2_OUT = 6, 16        # conv channel counts
H0 = 28                       # input spatial size
H1 = H0 - K + 1               # 24  conv1 output spatial
P1 = H1 // 2                  # 12  pool1 output spatial
H2 = P1 - K + 1               # 8   conv2 output spatial
P2 = H2 // 2                  # 4   pool2 output spatial
FC1_OUT, FC2_OUT, FC3_OUT = 120, 84, 10
N_PAD = 128                   # lane-dense logits width (sliced to 10 outside)

W1_SLAB = H1 * C1_OUT         # 144  conv1 slab width (col = 6*w + o)
W2_SLAB = H2 * C2_OUT         # 128  conv2 slab width (col = 16*w + o)
HP1_W = W1_SLAB - C1_OUT      # 138  width after conv1 horizontal pool-max
HP2_W = W2_SLAB - C2_OUT      # 112  width after conv2 horizontal pool-max

# Samples per grid step.  A multiple of 16 keeps every sublane slice / concat
# tile-aligned for both f32 (8-row tiles) and bf16 (16-row tiles).
B_TILE = 16


# ----------------------------------------------------------------------------
# The fused kernel (one grid step == B_TILE samples)
# ----------------------------------------------------------------------------
def _lenet_kernel(x_ref, m1_ref, b1_ref, m2_ref, b2_ref,
                  g_ref, bf1_ref, w2_ref, bf2_ref, w3_ref, bf3_ref,
                  o_ref):
    f32, bf16 = jnp.float32, jnp.bfloat16
    bt = o_ref.shape[0]                                      # B_TILE

    # Input rows are ordered h*bt + b (height-major, batch on sublanes),
    # already bf16 from the wrapper.
    x = x_ref[...]                                           # (28*bt, 28)

    # ---- conv1 + bias + ReLU: 5 banded matmuls (one per kernel row) --------
    z1 = jnp.dot(x[:H1 * bt], m1_ref[0], preferred_element_type=f32)
    for kh in range(1, K):
        z1 = z1 + jnp.dot(x[kh * bt:(kh + H1) * bt], m1_ref[kh],
                          preferred_element_type=f32)        # (24*bt, 144)
    a1 = jnp.maximum(z1 + b1_ref[...], 0.0)

    # ---- pool1 (2x2 max) on the (h, 6*w + o) slab ---------------------------
    # horizontal: lane shift by 6; vertical + even-row select: exact f32 max
    # of the two bt-row blocks of each row pair (even-column selection of the
    # pooled slab is folded into m2 at init time).
    hm1 = jnp.maximum(a1[:, :HP1_W], a1[:, C1_OUT:])         # (24*bt, 138)
    p1 = jnp.concatenate(
        [jnp.maximum(hm1[(2 * r) * bt:(2 * r + 1) * bt],
                     hm1[(2 * r + 1) * bt:(2 * r + 2) * bt])
         for r in range(P1)], axis=0).astype(bf16)           # (12*bt, 138)

    # ---- conv2 + bias + ReLU ------------------------------------------------
    z2 = jnp.dot(p1[:H2 * bt], m2_ref[0], preferred_element_type=f32)
    for kh in range(1, K):
        z2 = z2 + jnp.dot(p1[kh * bt:(kh + H2) * bt], m2_ref[kh],
                          preferred_element_type=f32)        # (8*bt, 128)
    a2 = jnp.maximum(z2 + b2_ref[...], 0.0)

    # ---- pool2 (2x2 max) fused with fc1 -------------------------------------
    # Each pooled row block feeds fc1 directly; the PyTorch NCHW flatten and
    # the pool2 even-column selection are folded into g at init time.
    hm2 = jnp.maximum(a2[:, :HP2_W], a2[:, C2_OUT:])         # (8*bt, 112)
    y = jnp.zeros((bt, FC1_OUT), f32)
    for r in range(P2):
        p2_r = jnp.maximum(hm2[(2 * r) * bt:(2 * r + 1) * bt],
                           hm2[(2 * r + 1) * bt:(2 * r + 2) * bt])
        y = y + jnp.dot(p2_r.astype(bf16), g_ref[r],
                        preferred_element_type=f32)          # (bt, 120)
    y = jnp.maximum(y + bf1_ref[...], 0.0)

    # ---- fc2 + ReLU ---------------------------------------------------------
    y = jnp.dot(y.astype(bf16), w2_ref[...],
                preferred_element_type=f32) + bf2_ref[...]
    y = jnp.maximum(y, 0.0)                                  # (bt, 84)

    # ---- fc3 (N padded to 128 for a lane-dense, unmasked store) -------------
    y = jnp.dot(y.astype(bf16), w3_ref[...],
                preferred_element_type=f32) + bf3_ref[...]   # (bt, 128)

    o_ref[...] = y


# ----------------------------------------------------------------------------
# Forward wrapper: one pallas_call over batch tiles
# ----------------------------------------------------------------------------
def lenet_forward(kparams, x_nchw, *, b_tile=B_TILE):
    B = x_nchw.shape[0]
    grid = (B + b_tile - 1) // b_tile
    Bp = grid * b_tile

    # Layout plumbing (outside the kernel, one-time XLA ops): pad the batch,
    # drop the channel dim, reorder rows to height-major (row = h*b_tile + b
    # within each tile) and cast to bf16 to halve the per-step input DMA.
    x = x_nchw[:, 0, :, :]                                   # (B, 28, 28)
    if Bp != B:
        x = jnp.pad(x, ((0, Bp - B), (0, 0), (0, 0)))
    x = x.reshape(grid, b_tile, H0, H0).transpose(0, 2, 1, 3)
    x = x.reshape(grid * H0 * b_tile, H0).astype(jnp.bfloat16)

    weight_keys = ("m1", "b1", "m2", "b2", "g", "bf1", "w2", "bf2", "w3", "bf3")
    weights = [kparams[k] for k in weight_keys]

    in_specs = [pl.BlockSpec((H0 * b_tile, H0), lambda i: (i, 0))]
    in_specs += [pl.BlockSpec(w.shape, lambda i, nd=w.ndim: (0,) * nd)
                 for w in weights]

    out = pl.pallas_call(
        _lenet_kernel,
        grid=(grid,),
        in_specs=in_specs,
        out_specs=pl.BlockSpec((b_tile, N_PAD), lambda i: (i, 0)),
        out_shape=jax.ShapeDtypeStruct((Bp, N_PAD), jnp.float32),
        compiler_params=pltpu.CompilerParams(
            dimension_semantics=("parallel",)),
    )(x, *weights)

    return out[:B, :FC3_OUT]                                 # (B, 10)


# ----------------------------------------------------------------------------
# Parameters: PyTorch-layout init + one-time kernel-layout transform
# ----------------------------------------------------------------------------
def init_params(key):
    ks = jax.random.split(key, 10)

    def p(k, shape, fan_in):
        bound = 1.0 / np.sqrt(np.float32(fan_in))
        return jax.random.uniform(k, shape, jnp.float32, -bound, bound)

    return {
        "conv1_w": p(ks[0], (6, 1, 5, 5), 1 * 5 * 5),
        "conv1_b": p(ks[1], (6,), 1 * 5 * 5),
        "conv2_w": p(ks[2], (16, 6, 5, 5), 6 * 5 * 5),
        "conv2_b": p(ks[3], (16,), 6 * 5 * 5),
        "fc1_w": p(ks[4], (120, 256), 256),   # PyTorch Linear: (out, in)
        "fc1_b": p(ks[5], (120,), 256),
        "fc2_w": p(ks[6], (84, 120), 120),
        "fc2_b": p(ks[7], (84,), 120),
        "fc3_w": p(ks[8], (10, 84), 84),
        "fc3_b": p(ks[9], (10,), 84),
    }


def prepare_kernel_params(raw):
    """One-time (init) transform of PyTorch-layout weights into kernel layout."""
    w1 = np.asarray(raw["conv1_w"], np.float32)    # (6, 1, 5, 5)
    w2 = np.asarray(raw["conv2_w"], np.float32)    # (16, 6, 5, 5)
    wf1 = np.asarray(raw["fc1_w"], np.float32)     # (120, 256)
    wf2 = np.asarray(raw["fc2_w"], np.float32)     # (84, 120)
    wf3 = np.asarray(raw["fc3_w"], np.float32)     # (10, 84)

    # conv1 banded matrices: m1[kh, w+kw, 6*w + o] = w1[o, 0, kh, kw]
    m1 = np.zeros((K, H0, W1_SLAB), np.float32)
    for kh in range(K):
        for kw in range(K):
            for w in range(H1):
                m1[kh, w + kw, C1_OUT * w:C1_OUT * (w + 1)] = w1[:, 0, kh, kw]

    # conv2 banded matrices with pool1's column selection pre-folded:
    # the pool1 slab column for (w', c) is 2*6*w' + c (width 138).
    # m2[kh, 12*(w+kw) + c, 16*w + o] = w2[o, c, kh, kw]
    m2 = np.zeros((K, HP1_W, W2_SLAB), np.float32)
    for kh in range(K):
        for kw in range(K):
            for w in range(H2):
                wi = w + kw
                for c in range(C1_OUT):
                    m2[kh, 2 * C1_OUT * wi + c,
                       C2_OUT * w:C2_OUT * (w + 1)] = w2[:, c, kh, kw]

    # fc1 with PyTorch NCHW flatten + pool2 column selection folded in:
    # pool2 slab column for (w, o) is 2*16*w + o (width 112), row index is r,
    # and PyTorch flat index is o*16 + r*4 + w.
    g = np.zeros((P2, HP2_W, FC1_OUT), np.float32)
    for r in range(P2):
        for w in range(P2):
            for o in range(C2_OUT):
                g[r, 2 * C2_OUT * w + o, :] = wf1[:, 16 * o + 4 * r + w]

    # biases tiled to slab width (col = C*w + o -> bias[o])
    b1t = np.tile(np.asarray(raw["conv1_b"], np.float32), H1).reshape(1, W1_SLAB)
    b2t = np.tile(np.asarray(raw["conv2_b"], np.float32), H2).reshape(1, W2_SLAB)

    # fc3 padded to 128 output lanes
    w3 = np.zeros((FC2_OUT, N_PAD), np.float32)
    w3[:, :FC3_OUT] = wf3.T
    b3 = np.zeros((1, N_PAD), np.float32)
    b3[0, :FC3_OUT] = np.asarray(raw["fc3_b"], np.float32)

    bf16 = jnp.bfloat16
    return {
        "m1": jnp.asarray(m1, bf16),
        "b1": jnp.asarray(b1t, jnp.float32),
        "m2": jnp.asarray(m2, bf16),
        "b2": jnp.asarray(b2t, jnp.float32),
        "g": jnp.asarray(g, bf16),
        "bf1": jnp.asarray(np.asarray(raw["fc1_b"], np.float32).reshape(1, -1)),
        "w2": jnp.asarray(wf2.T, bf16),
        "bf2": jnp.asarray(np.asarray(raw["fc2_b"], np.float32).reshape(1, -1)),
        "w3": jnp.asarray(w3, bf16),
        "bf3": jnp.asarray(b3, jnp.float32),
    }


# ----------------------------------------------------------------------------
# Pure-JAX f32 reference (mirrors the PyTorch module) for a sanity check
# ----------------------------------------------------------------------------
def _pool2x2_nchw(y):
    return jnp.maximum(jnp.maximum(y[:, :, 0::2, 0::2], y[:, :, 0::2, 1::2]),
                       jnp.maximum(y[:, :, 1::2, 0::2], y[:, :, 1::2, 1::2]))


def lenet_reference(raw, x_nchw):
    y = jax.lax.conv(x_nchw, raw["conv1_w"], (1, 1), "VALID")
    y = _pool2x2_nchw(jax.nn.relu(y + raw["conv1_b"].reshape(1, -1, 1, 1)))
    y = jax.lax.conv(y, raw["conv2_w"], (1, 1), "VALID")
    y = _pool2x2_nchw(jax.nn.relu(y + raw["conv2_b"].reshape(1, -1, 1, 1)))
    y = y.reshape(y.shape[0], -1)
    y = jax.nn.relu(y @ raw["fc1_w"].T + raw["fc1_b"])
    y = jax.nn.relu(y @ raw["fc2_w"].T + raw["fc2_b"])
    return y @ raw["fc3_w"].T + raw["fc3_b"]


if __name__ == "__main__":
    key = jax.random.PRNGKey(0)
    pkey, xkey = jax.random.split(key)
    raw = init_params(pkey)
    kparams = prepare_kernel_params(raw)

    # LeNet needs 28x28 single-channel input for the 16*4*4 flatten to hold.
    # B = 32 -> grid of 2 batch tiles (keeps both v7x TensorCores busy).
    B = 32
    x = jax.random.normal(xkey, (B, 1, 28, 28), jnp.float32)

    fwd = jax.jit(lenet_forward)
    out = jax.block_until_ready(fwd(kparams, x))
    assert out.shape == (B, 10) and out.dtype == jnp.float32

    ref = jax.block_until_ready(lenet_reference(raw, x))
    max_err = float(jnp.max(jnp.abs(out - ref)))
    assert jnp.allclose(out, ref, atol=5e-2, rtol=5e-2), max_err

    print("KERNEL_OK")
</pallas_src>

<mosaic_0001>
module attributes {stable_mosaic.version = 11 : i64} {
  func.func @_lenet_kernel(%arg0: i32, %arg1: memref<448x28xbf16, #tpu.memory_space<vmem>>, %arg2: memref<5x28x144xbf16, #tpu.memory_space<vmem>>, %arg3: memref<1x144xf32, #tpu.memory_space<vmem>>, %arg4: memref<5x138x128xbf16, #tpu.memory_space<vmem>>, %arg5: memref<1x128xf32, #tpu.memory_space<vmem>>, %arg6: memref<4x112x120xbf16, #tpu.memory_space<vmem>>, %arg7: memref<1x120xf32, #tpu.memory_space<vmem>>, %arg8: memref<120x84xbf16, #tpu.memory_space<vmem>>, %arg9: memref<1x84xf32, #tpu.memory_space<vmem>>, %arg10: memref<84x128xbf16, #tpu.memory_space<vmem>>, %arg11: memref<1x128xf32, #tpu.memory_space<vmem>>, %arg12: memref<16x128xf32, #tpu.memory_space<vmem>>) attributes {dimension_semantics = [#tpu.dimension_semantics<parallel>], iteration_bounds = array<i64: 2>, scalar_prefetch = 0 : i64, scratch_operands = 0 : i64, tpu.core_type = #tpu.core_type<tc>, window_params = [{transform_indices = @transform_0, window_bounds = array<i64: 448, 28>}, {pipeline_mode = #tpu.pipeline_mode<synchronous>, transform_indices = @transform_1, window_bounds = array<i64: 5, 28, 144>}, {pipeline_mode = #tpu.pipeline_mode<synchronous>, transform_indices = @transform_2, window_bounds = array<i64: 1, 144>}, {pipeline_mode = #tpu.pipeline_mode<synchronous>, transform_indices = @transform_3, window_bounds = array<i64: 5, 138, 128>}, {pipeline_mode = #tpu.pipeline_mode<synchronous>, transform_indices = @transform_4, window_bounds = array<i64: 1, 128>}, {pipeline_mode = #tpu.pipeline_mode<synchronous>, transform_indices = @transform_5, window_bounds = array<i64: 4, 112, 120>}, {pipeline_mode = #tpu.pipeline_mode<synchronous>, transform_indices = @transform_6, window_bounds = array<i64: 1, 120>}, {pipeline_mode = #tpu.pipeline_mode<synchronous>, transform_indices = @transform_7, window_bounds = array<i64: 120, 84>}, {pipeline_mode = #tpu.pipeline_mode<synchronous>, transform_indices = @transform_8, window_bounds = array<i64: 1, 84>}, {pipeline_mode = #tpu.pipeline_mode<synchronous>, transform_indices = @transform_9, window_bounds = array<i64: 84, 128>}, {pipeline_mode = #tpu.pipeline_mode<synchronous>, transform_indices = @transform_10, window_bounds = array<i64: 1, 128>}, {transform_indices = @transform_11, window_bounds = array<i64: 16, 128>}]} {
    %c0 = arith.constant 0 : index
    %c0_0 = arith.constant 0 : index
    %0 = vector.load %arg1[%c0, %c0_0] : memref<448x28xbf16, #tpu.memory_space<vmem>>, vector<448x28xbf16>
    %1 = vector.extract_strided_slice %0 {offsets = [0, 0], sizes = [384, 28], strides = [1, 1]} : vector<448x28xbf16> to vector<384x28xbf16>
    %c0_1 = arith.constant 0 : index
    %c0_2 = arith.constant 0 : index
    %c0_3 = arith.constant 0 : index
    %2 = vector.load %arg2[%c0_1, %c0_2, %c0_3] : memref<5x28x144xbf16, #tpu.memory_space<vmem>>, vector<1x28x144xbf16>
    %3 = vector.shape_cast %2 : vector<1x28x144xbf16> to vector<28x144xbf16>
    %cst = arith.constant dense<0.000000e+00> : vector<384x144xf32>
    %4 = tpu.matmul %1, %3, %cst {dimension_numbers = #tpu.dot_dimension_numbers<[1], [0], [0], [1], [0, 0, 1, 1], [], []>} : vector<384x28xbf16>, vector<28x144xbf16>, vector<384x144xf32> -> vector<384x144xf32>
    %5 = vector.extract_strided_slice %0 {offsets = [16, 0], sizes = [384, 28], strides = [1, 1]} : vector<448x28xbf16> to vector<384x28xbf16>
    %c1 = arith.constant 1 : index
    %c0_4 = arith.constant 0 : index
    %c0_5 = arith.constant 0 : index
    %6 = vector.load %arg2[%c1, %c0_4, %c0_5] : memref<5x28x144xbf16, #tpu.memory_space<vmem>>, vector<1x28x144xbf16>
    %7 = vector.shape_cast %6 : vector<1x28x144xbf16> to vector<28x144xbf16>
    %cst_6 = arith.constant dense<0.000000e+00> : vector<384x144xf32>
    %8 = tpu.matmul %5, %7, %cst_6 {dimension_numbers = #tpu.dot_dimension_numbers<[1], [0], [0], [1], [0, 0, 1, 1], [], []>} : vector<384x28xbf16>, vector<28x144xbf16>, vector<384x144xf32> -> vector<384x144xf32>
    %9 = arith.addf %4, %8 : vector<384x144xf32>
    %10 = vector.extract_strided_slice %0 {offsets = [32, 0], sizes = [384, 28], strides = [1, 1]} : vector<448x28xbf16> to vector<384x28xbf16>
    %c2 = arith.constant 2 : index
    %c0_7 = arith.constant 0 : index
    %c0_8 = arith.constant 0 : index
    %11 = vector.load %arg2[%c2, %c0_7, %c0_8] : memref<5x28x144xbf16, #tpu.memory_space<vmem>>, vector<1x28x144xbf16>
    %12 = vector.shape_cast %11 : vector<1x28x144xbf16> to vector<28x144xbf16>
    %cst_9 = arith.constant dense<0.000000e+00> : vector<384x144xf32>
    %13 = tpu.matmul %10, %12, %cst_9 {dimension_numbers = #tpu.dot_dimension_numbers<[1], [0], [0], [1], [0, 0, 1, 1], [], []>} : vector<384x28xbf16>, vector<28x144xbf16>, vector<384x144xf32> -> vector<384x144xf32>
    %14 = arith.addf %9, %13 : vector<384x144xf32>
    %15 = vector.extract_strided_slice %0 {offsets = [48, 0], sizes = [384, 28], strides = [1, 1]} : vector<448x28xbf16> to vector<384x28xbf16>
    %c3 = arith.constant 3 : index
    %c0_10 = arith.constant 0 : index
    %c0_11 = arith.constant 0 : index
    %16 = vector.load %arg2[%c3, %c0_10, %c0_11] : memref<5x28x144xbf16, #tpu.memory_space<vmem>>, vector<1x28x144xbf16>
    %17 = vector.shape_cast %16 : vector<1x28x144xbf16> to vector<28x144xbf16>
    %cst_12 = arith.constant dense<0.000000e+00> : vector<384x144xf32>
    %18 = tpu.matmul %15, %17, %cst_12 {dimension_numbers = #tpu.dot_dimension_numbers<[1], [0], [0], [1], [0, 0, 1, 1], [], []>} : vector<384x28xbf16>, vector<28x144xbf16>, vector<384x144xf32> -> vector<384x144xf32>
    %19 = arith.addf %14, %18 : vector<384x144xf32>
    %20 = vector.extract_strided_slice %0 {offsets = [64, 0], sizes = [384, 28], strides = [1, 1]} : vector<448x28xbf16> to vector<384x28xbf16>
    %c4 = arith.constant 4 : index
    %c0_13 = arith.constant 0 : index
    %c0_14 = arith.constant 0 : index
    %21 = vector.load %arg2[%c4, %c0_13, %c0_14] : memref<5x28x144xbf16, #tpu.memory_space<vmem>>, vector<1x28x144xbf16>
    %22 = vector.shape_cast %21 : vector<1x28x144xbf16> to vector<28x144xbf16>
    %cst_15 = arith.constant dense<0.000000e+00> : vector<384x144xf32>
    %23 = tpu.matmul %20, %22, %cst_15 {dimension_numbers = #tpu.dot_dimension_numbers<[1], [0], [0], [1], [0, 0, 1, 1], [], []>} : vector<384x28xbf16>, vector<28x144xbf16>, vector<384x144xf32> -> vector<384x144xf32>
    %24 = arith.addf %19, %23 : vector<384x144xf32>
    %c0_16 = arith.constant 0 : index
    %c0_17 = arith.constant 0 : index
    %25 = vector.load %arg3[%c0_16, %c0_17] : memref<1x144xf32, #tpu.memory_space<vmem>>, vector<1x144xf32>
    %26 = vector.broadcast %25 : vector<1x144xf32> to vector<384x144xf32>
    %27 = arith.addf %24, %26 : vector<384x144xf32>
    %cst_18 = arith.constant 0.000000e+00 : f32
    %28 = vector.broadcast %cst_18 : f32 to vector<384x144xf32>
    %29 = arith.maximumf %27, %28 : vector<384x144xf32>
    %30 = vector.extract_strided_slice %29 {offsets = [0, 0], sizes = [384, 138], strides = [1, 1]} : vector<384x144xf32> to vector<384x138xf32>
    %31 = vector.extract_strided_slice %29 {offsets = [0, 6], sizes = [384, 138], strides = [1, 1]} : vector<384x144xf32> to vector<384x138xf32>
    %32 = arith.maximumf %30, %31 : vector<384x138xf32>
    %33 = vector.extract_strided_slice %32 {offsets = [0, 0], sizes = [16, 138], strides = [1, 1]} : vector<384x138xf32> to vector<16x138xf32>
    %34 = vector.extract_strided_slice %32 {offsets = [16, 0], sizes = [16, 138], strides = [1, 1]} : vector<384x138xf32> to vector<16x138xf32>
    %35 = arith.maximumf %33, %34 : vector<16x138xf32>
    %36 = vector.extract_strided_slice %32 {offsets = [32, 0], sizes = [16, 138], strides = [1, 1]} : vector<384x138xf32> to vector<16x138xf32>
    %37 = vector.extract_strided_slice %32 {offsets = [48, 0], sizes = [16, 138], strides = [1, 1]} : vector<384x138xf32> to vector<16x138xf32>
    %38 = arith.maximumf %36, %37 : vector<16x138xf32>
    %39 = vector.extract_strided_slice %32 {offsets = [64, 0], sizes = [16, 138], strides = [1, 1]} : vector<384x138xf32> to vector<16x138xf32>
    %40 = vector.extract_strided_slice %32 {offsets = [80, 0], sizes = [16, 138], strides = [1, 1]} : vector<384x138xf32> to vector<16x138xf32>
    %41 = arith.maximumf %39, %40 : vector<16x138xf32>
    %42 = vector.extract_strided_slice %32 {offsets = [96, 0], sizes = [16, 138], strides = [1, 1]} : vector<384x138xf32> to vector<16x138xf32>
    %43 = vector.extract_strided_slice %32 {offsets = [112, 0], sizes = [16, 138], strides = [1, 1]} : vector<384x138xf32> to vector<16x138xf32>
    %44 = arith.maximumf %42, %43 : vector<16x138xf32>
    %45 = vector.extract_strided_slice %32 {offsets = [128, 0], sizes = [16, 138], strides = [1, 1]} : vector<384x138xf32> to vector<16x138xf32>
    %46 = vector.extract_strided_slice %32 {offsets = [144, 0], sizes = [16, 138], strides = [1, 1]} : vector<384x138xf32> to vector<16x138xf32>
    %47 = arith.maximumf %45, %46 : vector<16x138xf32>
    %48 = vector.extract_strided_slice %32 {offsets = [160, 0], sizes = [16, 138], strides = [1, 1]} : vector<384x138xf32> to vector<16x138xf32>
    %49 = vector.extract_strided_slice %32 {offsets = [176, 0], sizes = [16, 138], strides = [1, 1]} : vector<384x138xf32> to vector<16x138xf32>
    %50 = arith.maximumf %48, %49 : vector<16x138xf32>
    %51 = vector.extract_strided_slice %32 {offsets = [192, 0], sizes = [16, 138], strides = [1, 1]} : vector<384x138xf32> to vector<16x138xf32>
    %52 = vector.extract_strided_slice %32 {offsets = [208, 0], sizes = [16, 138], strides = [1, 1]} : vector<384x138xf32> to vector<16x138xf32>
    %53 = arith.maximumf %51, %52 : vector<16x138xf32>
    %54 = vector.extract_strided_slice %32 {offsets = [224, 0], sizes = [16, 138], strides = [1, 1]} : vector<384x138xf32> to vector<16x138xf32>
    %55 = vector.extract_strided_slice %32 {offsets = [240, 0], sizes = [16, 138], strides = [1, 1]} : vector<384x138xf32> to vector<16x138xf32>
    %56 = arith.maximumf %54, %55 : vector<16x138xf32>
    %57 = vector.extract_strided_slice %32 {offsets = [256, 0], sizes = [16, 138], strides = [1, 1]} : vector<384x138xf32> to vector<16x138xf32>
    %58 = vector.extract_strided_slice %32 {offsets = [272, 0], sizes = [16, 138], strides = [1, 1]} : vector<384x138xf32> to vector<16x138xf32>
    %59 = arith.maximumf %57, %58 : vector<16x138xf32>
    %60 = vector.extract_strided_slice %32 {offsets = [288, 0], sizes = [16, 138], strides = [1, 1]} : vector<384x138xf32> to vector<16x138xf32>
    %61 = vector.extract_strided_slice %32 {offsets = [304, 0], sizes = [16, 138], strides = [1, 1]} : vector<384x138xf32> to vector<16x138xf32>
    %62 = arith.maximumf %60, %61 : vector<16x138xf32>
    %63 = vector.extract_strided_slice %32 {offsets = [320, 0], sizes = [16, 138], strides = [1, 1]} : vector<384x138xf32> to vector<16x138xf32>
    %64 = vector.extract_strided_slice %32 {offsets = [336, 0], sizes = [16, 138], strides = [1, 1]} : vector<384x138xf32> to vector<16x138xf32>
    %65 = arith.maximumf %63, %64 : vector<16x138xf32>
    %66 = vector.extract_strided_slice %32 {offsets = [352, 0], sizes = [16, 138], strides = [1, 1]} : vector<384x138xf32> to vector<16x138xf32>
    %67 = vector.extract_strided_slice %32 {offsets = [368, 0], sizes = [16, 138], strides = [1, 1]} : vector<384x138xf32> to vector<16x138xf32>
    %68 = arith.maximumf %66, %67 : vector<16x138xf32>
    %69 = tpu.concatenate %35, %38, %41, %44, %47, %50, %53, %56, %59, %62, %65, %68 in 0 : vector<16x138xf32>, vector<16x138xf32>, vector<16x138xf32>, vector<16x138xf32>, vector<16x138xf32>, vector<16x138xf32>, vector<16x138xf32>, vector<16x138xf32>, vector<16x138xf32>, vector<16x138xf32>, vector<16x138xf32>, vector<16x138xf32> -> vector<192x138xf32>
    %70 = arith.truncf %69 : vector<192x138xf32> to vector<192x138xbf16>
    %71 = vector.extract_strided_slice %70 {offsets = [0, 0], sizes = [128, 138], strides = [1, 1]} : vector<192x138xbf16> to vector<128x138xbf16>
    %c0_19 = arith.constant 0 : index
    %c0_20 = arith.constant 0 : index
    %c0_21 = arith.constant 0 : index
    %72 = vector.load %arg4[%c0_19, %c0_20, %c0_21] : memref<5x138x128xbf16, #tpu.memory_space<vmem>>, vector<1x138x128xbf16>
    %73 = vector.shape_cast %72 : vector<1x138x128xbf16> to vector<138x128xbf16>
    %cst_22 = arith.constant dense<0.000000e+00> : vector<128x128xf32>
    %74 = tpu.matmul %71, %73, %cst_22 {dimension_numbers = #tpu.dot_dimension_numbers<[1], [0], [0], [1], [0, 0, 1, 1], [], []>} : vector<128x138xbf16>, vector<138x128xbf16>, vector<128x128xf32> -> vector<128x128xf32>
    %75 = vector.extract_strided_slice %70 {offsets = [16, 0], sizes = [128, 138], strides = [1, 1]} : vector<192x138xbf16> to vector<128x138xbf16>
    %c1_23 = arith.constant 1 : index
    %c0_24 = arith.constant 0 : index
    %c0_25 = arith.constant 0 : index
    %76 = vector.load %arg4[%c1_23, %c0_24, %c0_25] : memref<5x138x128xbf16, #tpu.memory_space<vmem>>, vector<1x138x128xbf16>
    %77 = vector.shape_cast %76 : vector<1x138x128xbf16> to vector<138x128xbf16>
    %cst_26 = arith.constant dense<0.000000e+00> : vector<128x128xf32>
    %78 = tpu.matmul %75, %77, %cst_26 {dimension_numbers = #tpu.dot_dimension_numbers<[1], [0], [0], [1], [0, 0, 1, 1], [], []>} : vector<128x138xbf16>, vector<138x128xbf16>, vector<128x128xf32> -> vector<128x128xf32>
    %79 = arith.addf %74, %78 : vector<128x128xf32>
    %80 = vector.extract_strided_slice %70 {offsets = [32, 0], sizes = [128, 138], strides = [1, 1]} : vector<192x138xbf16> to vector<128x138xbf16>
    %c2_27 = arith.constant 2 : index
    %c0_28 = arith.constant 0 : index
    %c0_29 = arith.constant 0 : index
    %81 = vector.load %arg4[%c2_27, %c0_28, %c0_29] : memref<5x138x128xbf16, #tpu.memory_space<vmem>>, vector<1x138x128xbf16>
    %82 = vector.shape_cast %81 : vector<1x138x128xbf16> to vector<138x128xbf16>
    %cst_30 = arith.constant dense<0.000000e+00> : vector<128x128xf32>
    %83 = tpu.matmul %80, %82, %cst_30 {dimension_numbers = #tpu.dot_dimension_numbers<[1], [0], [0], [1], [0, 0, 1, 1], [], []>} : vector<128x138xbf16>, vector<138x128xbf16>, vector<128x128xf32> -> vector<128x128xf32>
    %84 = arith.addf %79, %83 : vector<128x128xf32>
    %85 = vector.extract_strided_slice %70 {offsets = [48, 0], sizes = [128, 138], strides = [1, 1]} : vector<192x138xbf16> to vector<128x138xbf16>
    %c3_31 = arith.constant 3 : index
    %c0_32 = arith.constant 0 : index
    %c0_33 = arith.constant 0 : index
    %86 = vector.load %arg4[%c3_31, %c0_32, %c0_33] : memref<5x138x128xbf16, #tpu.memory_space<vmem>>, vector<1x138x128xbf16>
    %87 = vector.shape_cast %86 : vector<1x138x128xbf16> to vector<138x128xbf16>
    %cst_34 = arith.constant dense<0.000000e+00> : vector<128x128xf32>
    %88 = tpu.matmul %85, %87, %cst_34 {dimension_numbers = #tpu.dot_dimension_numbers<[1], [0], [0], [1], [0, 0, 1, 1], [], []>} : vector<128x138xbf16>, vector<138x128xbf16>, vector<128x128xf32> -> vector<128x128xf32>
    %89 = arith.addf %84, %88 : vector<128x128xf32>
    %90 = vector.extract_strided_slice %70 {offsets = [64, 0], sizes = [128, 138], strides = [1, 1]} : vector<192x138xbf16> to vector<128x138xbf16>
    %c4_35 = arith.constant 4 : index
    %c0_36 = arith.constant 0 : index
    %c0_37 = arith.constant 0 : index
    %91 = vector.load %arg4[%c4_35, %c0_36, %c0_37] : memref<5x138x128xbf16, #tpu.memory_space<vmem>>, vector<1x138x128xbf16>
    %92 = vector.shape_cast %91 : vector<1x138x128xbf16> to vector<138x128xbf16>
    %cst_38 = arith.constant dense<0.000000e+00> : vector<128x128xf32>
    %93 = tpu.matmul %90, %92, %cst_38 {dimension_numbers = #tpu.dot_dimension_numbers<[1], [0], [0], [1], [0, 0, 1, 1], [], []>} : vector<128x138xbf16>, vector<138x128xbf16>, vector<128x128xf32> -> vector<128x128xf32>
    %94 = arith.addf %89, %93 : vector<128x128xf32>
    %c0_39 = arith.constant 0 : index
    %c0_40 = arith.constant 0 : index
    %95 = vector.load %arg5[%c0_39, %c0_40] : memref<1x128xf32, #tpu.memory_space<vmem>>, vector<1x128xf32>
    %96 = vector.broadcast %95 : vector<1x128xf32> to vector<128x128xf32>
    %97 = arith.addf %94, %96 : vector<128x128xf32>
    %cst_41 = arith.constant 0.000000e+00 : f32
    %98 = vector.broadcast %cst_41 : f32 to vector<128x128xf32>
    %99 = arith.maximumf %97, %98 : vector<128x128xf32>
    %100 = vector.extract_strided_slice %99 {offsets = [0, 0], sizes = [128, 112], strides = [1, 1]} : vector<128x128xf32> to vector<128x112xf32>
    %101 = vector.extract_strided_slice %99 {offsets = [0, 16], sizes = [128, 112], strides = [1, 1]} : vector<128x128xf32> to vector<128x112xf32>
    %102 = arith.maximumf %100, %101 : vector<128x112xf32>
    %cst_42 = arith.constant 0.000000e+00 : f32
    %103 = vector.broadcast %cst_42 : f32 to vector<16x120xf32>
    %104 = vector.extract_strided_slice %102 {offsets = [0, 0], sizes = [16, 112], strides = [1, 1]} : vector<128x112xf32> to vector<16x112xf32>
    %105 = vector.extract_strided_slice %102 {offsets = [16, 0], sizes = [16, 112], strides = [1, 1]} : vector<128x112xf32> to vector<16x112xf32>
    %106 = arith.maximumf %104, %105 : vector<16x112xf32>
    %107 = arith.truncf %106 : vector<16x112xf32> to vector<16x112xbf16>
    %c0_43 = arith.constant 0 : index
    %c0_44 = arith.constant 0 : index
    %c0_45 = arith.constant 0 : index
    %108 = vector.load %arg6[%c0_43, %c0_44, %c0_45] : memref<4x112x120xbf16, #tpu.memory_space<vmem>>, vector<1x112x120xbf16>
    %109 = vector.shape_cast %108 : vector<1x112x120xbf16> to vector<112x120xbf16>
    %cst_46 = arith.constant dense<0.000000e+00> : vector<16x120xf32>
    %110 = tpu.matmul %107, %109, %cst_46 {dimension_numbers = #tpu.dot_dimension_numbers<[1], [0], [0], [1], [0, 0, 1, 1], [], []>} : vector<16x112xbf16>, vector<112x120xbf16>, vector<16x120xf32> -> vector<16x120xf32>
    %111 = arith.addf %103, %110 : vector<16x120xf32>
    %112 = vector.extract_strided_slice %102 {offsets = [32, 0], sizes = [16, 112], strides = [1, 1]} : vector<128x112xf32> to vector<16x112xf32>
    %113 = vector.extract_strided_slice %102 {offsets = [48, 0], sizes = [16, 112], strides = [1, 1]} : vector<128x112xf32> to vector<16x112xf32>
    %114 = arith.maximumf %112, %113 : vector<16x112xf32>
    %115 = arith.truncf %114 : vector<16x112xf32> to vector<16x112xbf16>
    %c1_47 = arith.constant 1 : index
    %c0_48 = arith.constant 0 : index
    %c0_49 = arith.constant 0 : index
    %116 = vector.load %arg6[%c1_47, %c0_48, %c0_49] : memref<4x112x120xbf16, #tpu.memory_space<vmem>>, vector<1x112x120xbf16>
    %117 = vector.shape_cast %116 : vector<1x112x120xbf16> to vector<112x120xbf16>
    %cst_50 = arith.constant dense<0.000000e+00> : vector<16x120xf32>
    %118 = tpu.matmul %115, %117, %cst_50 {dimension_numbers = #tpu.dot_dimension_numbers<[1], [0], [0], [1], [0, 0, 1, 1], [], []>} : vector<16x112xbf16>, vector<112x120xbf16>, vector<16x120xf32> -> vector<16x120xf32>
    %119 = arith.addf %111, %118 : vector<16x120xf32>
    %120 = vector.extract_strided_slice %102 {offsets = [64, 0], sizes = [16, 112], strides = [1, 1]} : vector<128x112xf32> to vector<16x112xf32>
    %121 = vector.extract_strided_slice %102 {offsets = [80, 0], sizes = [16, 112], strides = [1, 1]} : vector<128x112xf32> to vector<16x112xf32>
    %122 = arith.maximumf %120, %121 : vector<16x112xf32>
    %123 = arith.truncf %122 : vector<16x112xf32> to vector<16x112xbf16>
    %c2_51 = arith.constant 2 : index
    %c0_52 = arith.constant 0 : index
    %c0_53 = arith.constant 0 : index
    %124 = vector.load %arg6[%c2_51, %c0_52, %c0_53] : memref<4x112x120xbf16, #tpu.memory_space<vmem>>, vector<1x112x120xbf16>
    %125 = vector.shape_cast %124 : vector<1x112x120xbf16> to vector<112x120xbf16>
    %cst_54 = arith.constant dense<0.000000e+00> : vector<16x120xf32>
    %126 = tpu.matmul %123, %125, %cst_54 {dimension_numbers = #tpu.dot_dimension_numbers<[1], [0], [0], [1], [0, 0, 1, 1], [], []>} : vector<16x112xbf16>, vector<112x120xbf16>, vector<16x120xf32> -> vector<16x120xf32>
    %127 = arith.addf %119, %126 : vector<16x120xf32>
    %128 = vector.extract_strided_slice %102 {offsets = [96, 0], sizes = [16, 112], strides = [1, 1]} : vector<128x112xf32> to vector<16x112xf32>
    %129 = vector.extract_strided_slice %102 {offsets = [112, 0], sizes = [16, 112], strides = [1, 1]} : vector<128x112xf32> to vector<16x112xf32>
    %130 = arith.maximumf %128, %129 : vector<16x112xf32>
    %131 = arith.truncf %130 : vector<16x112xf32> to vector<16x112xbf16>
    %c3_55 = arith.constant 3 : index
    %c0_56 = arith.constant 0 : index
    %c0_57 = arith.constant 0 : index
    %132 = vector.load %arg6[%c3_55, %c0_56, %c0_57] : memref<4x112x120xbf16, #tpu.memory_space<vmem>>, vector<1x112x120xbf16>
    %133 = vector.shape_cast %132 : vector<1x112x120xbf16> to vector<112x120xbf16>
    %cst_58 = arith.constant dense<0.000000e+00> : vector<16x120xf32>
    %134 = tpu.matmul %131, %133, %cst_58 {dimension_numbers = #tpu.dot_dimension_numbers<[1], [0], [0], [1], [0, 0, 1, 1], [], []>} : vector<16x112xbf16>, vector<112x120xbf16>, vector<16x120xf32> -> vector<16x120xf32>
    %135 = arith.addf %127, %134 : vector<16x120xf32>
    %c0_59 = arith.constant 0 : index
    %c0_60 = arith.constant 0 : index
    %136 = vector.load %arg7[%c0_59, %c0_60] : memref<1x120xf32, #tpu.memory_space<vmem>>, vector<1x120xf32>
    %137 = vector.broadcast %136 : vector<1x120xf32> to vector<16x120xf32>
    %138 = arith.addf %135, %137 : vector<16x120xf32>
    %cst_61 = arith.constant 0.000000e+00 : f32
    %139 = vector.broadcast %cst_61 : f32 to vector<16x120xf32>
    %140 = arith.maximumf %138, %139 : vector<16x120xf32>
    %141 = arith.truncf %140 : vector<16x120xf32> to vector<16x120xbf16>
    %c0_62 = arith.constant 0 : index
    %c0_63 = arith.constant 0 : index
    %142 = vector.load %arg8[%c0_62, %c0_63] : memref<120x84xbf16, #tpu.memory_space<vmem>>, vector<120x84xbf16>
    %cst_64 = arith.constant dense<0.000000e+00> : vector<16x84xf32>
    %143 = tpu.matmul %141, %142, %cst_64 {dimension_numbers = #tpu.dot_dimension_numbers<[1], [0], [0], [1], [0, 0, 1, 1], [], []>} : vector<16x120xbf16>, vector<120x84xbf16>, vector<16x84xf32> -> vector<16x84xf32>
    %c0_65 = arith.constant 0 : index
    %c0_66 = arith.constant 0 : index
    %144 = vector.load %arg9[%c0_65, %c0_66] : memref<1x84xf32, #tpu.memory_space<vmem>>, vector<1x84xf32>
    %145 = vector.broadcast %144 : vector<1x84xf32> to vector<16x84xf32>
    %146 = arith.addf %143, %145 : vector<16x84xf32>
    %cst_67 = arith.constant 0.000000e+00 : f32
    %147 = vector.broadcast %cst_67 : f32 to vector<16x84xf32>
    %148 = arith.maximumf %146, %147 : vector<16x84xf32>
    %149 = arith.truncf %148 : vector<16x84xf32> to vector<16x84xbf16>
    %c0_68 = arith.constant 0 : index
    %c0_69 = arith.constant 0 : index
    %150 = vector.load %arg10[%c0_68, %c0_69] : memref<84x128xbf16, #tpu.memory_space<vmem>>, vector<84x128xbf16>
    %cst_70 = arith.constant dense<0.000000e+00> : vector<16x128xf32>
    %151 = tpu.matmul %149, %150, %cst_70 {dimension_numbers = #tpu.dot_dimension_numbers<[1], [0], [0], [1], [0, 0, 1, 1], [], []>} : vector<16x84xbf16>, vector<84x128xbf16>, vector<16x128xf32> -> vector<16x128xf32>
    %c0_71 = arith.constant 0 : index
    %c0_72 = arith.constant 0 : index
    %152 = vector.load %arg11[%c0_71, %c0_72] : memref<1x128xf32, #tpu.memory_space<vmem>>, vector<1x128xf32>
    %153 = vector.broadcast %152 : vector<1x128xf32> to vector<16x128xf32>
    %154 = arith.addf %151, %153 : vector<16x128xf32>
    %c0_73 = arith.constant 0 : index
    %c0_74 = arith.constant 0 : index
    %155 = vector.load %arg12[%c0_73, %c0_74] : memref<16x128xf32, #tpu.memory_space<vmem>>, vector<16x128xf32>
    tpu.vector_store %arg12[%c0_73, %c0_74], %154 {strides = array<i32>} : memref<16x128xf32, #tpu.memory_space<vmem>>, vector<16x128xf32>,
    return
  }
  func.func @transform_0(%arg0: i32) -> (i32, i32) {
    %c0_i32 = arith.constant 0 : i32
    %c0_i32_0 = arith.constant 0 : i32
    return %arg0, %c0_i32 : i32, i32
  }
  func.func @transform_1(%arg0: i32) -> (i32, i32, i32) {
    %c0_i32 = arith.constant 0 : i32
    %c0_i32_0 = arith.constant 0 : i32
    %c0_i32_1 = arith.constant 0 : i32
    %c0_i32_2 = arith.constant 0 : i32
    return %c0_i32, %c0_i32_0, %c0_i32_1 : i32, i32, i32
  }
  func.func @transform_2(%arg0: i32) -> (i32, i32) {
    %c0_i32 = arith.constant 0 : i32
    %c0_i32_0 = arith.constant 0 : i32
    %c0_i32_1 = arith.constant 0 : i32
    return %c0_i32, %c0_i32_0 : i32, i32
  }
  func.func @transform_3(%arg0: i32) -> (i32, i32, i32) {
    %c0_i32 = arith.constant 0 : i32
    %c0_i32_0 = arith.constant 0 : i32
    %c0_i32_1 = arith.constant 0 : i32
    %c0_i32_2 = arith.constant 0 : i32
    return %c0_i32, %c0_i32_0, %c0_i32_1 : i32, i32, i32
  }
  func.func @transform_4(%arg0: i32) -> (i32, i32) {
    %c0_i32 = arith.constant 0 : i32
    %c0_i32_0 = arith.constant 0 : i32
    %c0_i32_1 = arith.constant 0 : i32
    return %c0_i32, %c0_i32_0 : i32, i32
  }
  func.func @transform_5(%arg0: i32) -> (i32, i32, i32) {
    %c0_i32 = arith.constant 0 : i32
    %c0_i32_0 = arith.constant 0 : i32
    %c0_i32_1 = arith.constant 0 : i32
    %c0_i32_2 = arith.constant 0 : i32
    return %c0_i32, %c0_i32_0, %c0_i32_1 : i32, i32, i32
  }
  func.func @transform_6(%arg0: i32) -> (i32, i32) {
    %c0_i32 = arith.constant 0 : i32
    %c0_i32_0 = arith.constant 0 : i32
    %c0_i32_1 = arith.constant 0 : i32
    return %c0_i32, %c0_i32_0 : i32, i32
  }
  func.func @transform_7(%arg0: i32) -> (i32, i32) {
    %c0_i32 = arith.constant 0 : i32
    %c0_i32_0 = arith.constant 0 : i32
    %c0_i32_1 = arith.constant 0 : i32
    return %c0_i32, %c0_i32_0 : i32, i32
  }
  func.func @transform_8(%arg0: i32) -> (i32, i32) {
    %c0_i32 = arith.constant 0 : i32
    %c0_i32_0 = arith.constant 0 : i32
    %c0_i32_1 = arith.constant 0 : i32
    return %c0_i32, %c0_i32_0 : i32, i32
  }
  func.func @transform_9(%arg0: i32) -> (i32, i32) {
    %c0_i32 = arith.constant 0 : i32
    %c0_i32_0 = arith.constant 0 : i32
    %c0_i32_1 = arith.constant 0 : i32
    return %c0_i32, %c0_i32_0 : i32, i32
  }
  func.func @transform_10(%arg0: i32) -> (i32, i32) {
    %c0_i32 = arith.constant 0 : i32
    %c0_i32_0 = arith.constant 0 : i32
    %c0_i32_1 = arith.constant 0 : i32
    return %c0_i32, %c0_i32_0 : i32, i32
  }
  func.func @transform_11(%arg0: i32) -> (i32, i32) {
    %c0_i32 = arith.constant 0 : i32
    %c0_i32_0 = arith.constant 0 : i32
    return %arg0, %c0_i32 : i32, i32
  }
}

</mosaic_0001>

<bundles_post_ra>
// kernel: lenet_forward.1
= control target key start
LH: loop header
LB: loop body
LE: loop exit
PB: predicated region body
PF: predicated region fallthrough
CT: control target
= control target key end

     0   :  { %s6186_s17 = smov 0   ;;  %s9339_s0 = inlined_call_operand.vmem [shape: bf16[896,28], index: 0, kind: input, shape index: {}]   ;;  %s9340_s1 = inlined_call_operand.vmem [shape: bf16[5,28,144], index: 1, kind: input, shape index: {}]   ;;  %s9341_s2 = inlined_call_operand.vmem [shape: f32[1,144], index: 2, kind: input, shape index: {}]   ;;  %s9342_s3 = inlined_call_operand.vmem [shape: bf16[5,138,128], index: 3, kind: input, shape index: {}]   ;;  %s9343_s4 = inlined_call_operand.vmem [shape: f32[1,128], index: 4, kind: input, shape index: {}]   ;;  %s9344_s5 = inlined_call_operand.vmem [shape: bf16[4,112,120], index: 5, kind: input, shape index: {}]   ;;  %s9345_s6 = inlined_call_operand.vmem [shape: f32[1,120], index: 6, kind: input, shape index: {}]   ;;  %s9346_s7 = inlined_call_operand.vmem [shape: bf16[120,84], index: 7, kind: input, shape index: {}]   ;;  %s9347_s8 = inlined_call_operand.vmem [shape: f32[1,84], index: 8, kind: input, shape index: {}]   ;;  %s9348_s9 = inlined_call_operand.vmem [shape: bf16[84,128], index: 9, kind: input, shape index: {}]   ;;  %s9349_s10 = inlined_call_operand.vmem [shape: f32[1,128], index: 10, kind: input, shape index: {}]   ;;  %s9350_s11 = inlined_call_operand.vmem [shape: f32[32,128], index: 11, kind: output, shape index: {}]  }
   0x1 LB: > { %s5048_s18 = sadd.s32 4294967295, %s6119_s17   ;;  %p5052_p0 = scmp.ge.s32.totalorder %s6119_s17, 1  ;;  %s6119_s17 = sphi %s6186_s17, %s21_s17  }
   0x2   : > { %p338_p1 = scmp.lt.s32.totalorder %s6119_s17, 3 }
   0x4   : > { %p339_p2 = pnand %p5052_p0, %p338_p1 }
   0x6   : > { %342 = sbr.rel (%p339_p2) target bundleno = 2002 (0x7d2), region = 64 }
   0xb   : > { %v5947_v0 = vld [vmem:[%s9340_s1 + $0x34] ss:$8 sps:$4 sm:$0x3f]   ;;  %vm667_vm0 = vcmask 1045504   ;;  %v9352_v3 = vmov 0   ;;  %s378_s12 = smul.u32 56, %s5048_s18 }
   0xc   : > { %5088 = vmatprep.subr.msk.bf16.mxu0 %vm667_vm0, %v5947_v0  ;;  %v5949_v1 = vld [vmem:[%s9340_s1 + $0x14] ss:$8 sps:$4 sm:$0x3f]   ;;  %v5951_v2 = vld [vmem:[%s9340_s1 + $0x30] ss:$8 sps:$4 sm:$0x3f]   ;;  %706 = vmatprep.mubr.bf16.mxu0 %v9352_v3 }
   0xd   : > { %v5952_v4 = vld [vmem:[%s9340_s1 + $0x10] ss:$8 sps:$4 sm:$0x3f]   ;;  %v5953_v5 = vld [vmem:[%s9340_s1 + $0x24] ss:$8 sps:$4 sm:$0xff]   ;;  %1011 = vmatprep.mubr.bf16.mxu1 %v9352_v3  ;;  %5118 = vmatprep.subr.msk.bf16.mxu1 %vm667_vm0, %v5949_v1  ;;  %v669_v6 = vsel %vm667_vm0, %v5951_v2, 0 }
   0xe   : > { %v5955_v7 = vld [vmem:[%s9340_s1 + $0x4] ss:$8 sps:$4 sm:$0xff]   ;;  %687 = vmatpush1.bf16.msra.mxu0 %v669_v6  ;;  %v974_v8 = vsel %vm667_vm0, %v5952_v4, 0  ;;  %v5957_v9 = vld [vmem:[%s9340_s1 + $0x20] ss:$8 sps:$4 sm:$0xff]   ;;  %p379_p3 = scmp.lt.s32.totalorder %s378_s12, 111 }
   0xf   : > { %v5958_v10 = vld [vmem:[%s9340_s1] ss:$8 sps:$4 sm:$0xff]   ;;  %992 = vmatpush1.bf16.msra.mxu1 %v974_v8  ;;  %688 = vmatprep.subr.bf16.mxu0 %v5953_v5  ;;  %v5961_v11 = vld [vmem:[%s9340_s1 + $0x54] ss:$8 sps:$4 sm:$0x3f]   ;;  %vm594_vm1 = vcmask 228352  }
  0x10   : > { %993 = vmatprep.subr.bf16.mxu1 %v5955_v7  ;;  %s10041_s12 = smov (!%p379_p3, %s378_s12), 111  ;;  %v5963_v12 = vld [vmem:[%s9340_s1 + $0x50] ss:$8 sps:$4 sm:$0x3f]   ;;  %v5978_v13 = vld [vmem:[%s9340_s1 + $0x44] ss:$8 sps:$4 sm:$0xff]  }
  0x11   : > { %s5053_s23 = sshll.u32 %s10041_s12, 2  ;;  %v1284_v15 = vsel %vm667_vm0, %v5963_v12, 0  ;;  %v5976_v17 = vld [vmem:[%s9340_s1 + $0x40] ss:$8 sps:$4 sm:$0xff]   ;;  %v5995_v28 = vld [vmem:[%s9340_s1 + $0x64] ss:$8 sps:$4 sm:$0xff]  }
  0x12   : > { %689 = vmatpush1.bf16.msra.mxu0 %v5957_v9  ;;  %s6236_s26 = scalar_lea.vmem %s9339_s0, %s5053_s23  ;;  %v5990_v25 = vld [vmem:[%s9340_s1 + $0x74] ss:$8 sps:$4 sm:$0x3f]   ;;  %v5992_v26 = vld [vmem:[%s9340_s1 + $0x70] ss:$8 sps:$4 sm:$0x3f]  }
  0x13   : > { %994 = vmatpush1.bf16.msra.mxu1 %v5958_v10  ;;  %5152 = vmatprep.subr.msk.bf16.mxu0 %vm667_vm0, %v5961_v11  ;;  %v5959_v14 = vld [vmem:[%s6236_s26 + $0x8] sm:$0xff]   ;;  %v5960_v16 = vld [vmem:[%s6236_s26] sm:$0xff]   ;;  %v6252_v18 = vld [vmem:[%s6236_s26 + $0x10] sm:$0xff]   ;;  %v1690_v30 = vsel %vm667_vm0, %v5992_v26, 0  ;;  %s6122_s30 = smov 122   ;;  %vm3390_vm2 = vcmask 1044480  }
  0x14   : > { %v6260_v19 = vld [vmem:[%s6236_s26 + $0x18] sm:$0xff]   ;;  %v6269_v20 = vld [vmem:[%s6236_s26 + $0x20] sm:$0xff]   ;;  %v6278_v21 = vld [vmem:[%s6236_s26 + $0x28] sm:$0xff]   ;;  %5186 = vmatprep.subr.msk.bf16.mxu1 %vm667_vm0, %v5990_v25  ;;  %vm2962_vm3 = vcmask 998400   ;;  %vm3365_vm4 = vcmask 80896   ;;  %s6124_s16 = smov 112  }
  0x15   : > { %5089 = vmatmul.mubr.msk.bf16.vlgmr.msra.gmra.mxu0 %vm594_vm1, %v5959_v14  ;;  %v6287_v22 = vld [vmem:[%s6236_s26 + $0x30] sm:$0xff]   ;;  %v6296_v23 = vld [vmem:[%s6236_s26 + $0x38] sm:$0xff]   ;;  %v6305_v24 = vld [vmem:[%s6236_s26 + $0x40] sm:$0xff]   ;;  %vm6125_vm5 = vmmov 0   ;;  %vm4416_vm6 = vcmask 916480   ;;  %vm4842_vm7 = vcmask 1043456  }
  0x16   : > { %5119 = vmatmul.mubr.msk.bf16.vlgmr.msra.gmra.mxu1 %vm594_vm1, %v5960_v16  ;;  %1302 = vmatpush1.bf16.msra.mxu0 %v1284_v15  ;;  %v5993_v27 = vld [vmem:[%s9340_s1 + $0x60] ss:$8 sps:$4 sm:$0xff]   ;;  %v5996_v31 = vld [vmem:[%s9340_s1 + $0x94] ss:$8 sps:$4 sm:$0x3f]   ;;  %vm4945_vm8 = vcmask 1041408  }
  0x17   : > { %716 = vmatprep.mubr.bf16.mxu0 %v9352_v3  ;;  %1021 = vmatprep.mubr.bf16.mxu1 %v9352_v3  ;;  %v6326_v29 = vld [vmem:[%s6236_s26 + $0x48] sm:$0xff]   ;;  %v6341_v32 = vld [vmem:[%s6236_s26 + $0x50] sm:$0xff]   ;;  %v6351_v33 = vld [vmem:[%s6236_s26 + $0x58] sm:$0xff]   ;;  %vm4838_vm9 = vcmask 982016   ;;  %vm4941_vm10 = vcmask 687104   ;;  %s5054_s29 = sshll.u32 %s5048_s18, 1 }
  0x18   : > { %1303 = vmatprep.subr.bf16.mxu0 %v5978_v13  ;;  %1708 = vmatpush1.bf16.msra.mxu1 %v1690_v30  ;;  %v6360_v34 = vld [vmem:[%s6236_s26 + $0x60] sm:$0xff]   ;;  %v6369_v35 = vld [vmem:[%s6236_s26 + $0x68] sm:$0xff]   ;;  %v6378_v36 = vld [vmem:[%s6236_s26 + $0x70] sm:$0xff]   ;;  %p385_p4 = scmp.lt.s32.totalorder %s5054_s29, 3 }
  0x19   : > { %1709 = vmatprep.subr.bf16.mxu1 %v5995_v28  ;;  %v6387_v37 = vld [vmem:[%s6236_s26 + $0x78] sm:$0xff]   ;;  %v6396_v38 = vld [vmem:[%s6236_s26 + $0x80] sm:$0xff]   ;;  %v6405_v39 = vld [vmem:[%s6236_s26 + $0x88] sm:$0xff]  }
  0x1a   : > { %1304 = vmatpush1.bf16.msra.mxu0 %v5976_v17  ;;  %v6414_v40 = vld [vmem:[%s6236_s26 + $0x90] sm:$0xff]   ;;  %v6423_v41 = vld [vmem:[%s6236_s26 + $0x98] sm:$0xff]   ;;  %v6432_v42 = vld [vmem:[%s6236_s26 + $0xa0] sm:$0xff]   ;;  %s10043_s29 = smov (!%p385_p4, %s5054_s29), 3 }
  0x1b   : > { %5220 = vmatprep.subr.msk.bf16.mxu0 %vm667_vm0, %v5996_v31  ;;  %v6441_v43 = vld [vmem:[%s6236_s26 + $0xa8] sm:$0xff]   ;;  %v6450_v44 = vld [vmem:[%s6236_s26 + $0xb0] sm:$0xff]   ;;  %v6459_v45 = vld [vmem:[%s6236_s26 + $0xb8] sm:$0xff]   ;;  %s5055_s12 = sshll.u32 %s10043_s29, 3 }
  0x1c   : > { %1710 = vmatpush1.bf16.msra.mxu1 %v5993_v27  ;;  %v6468_v46 = vld [vmem:[%s6236_s26 + $0xc0] sm:$0xff]   ;;  %v5998_v47 = vld [vmem:[%s9340_s1 + $0x90] ss:$8 sps:$4 sm:$0x3f]   ;;  %s388_s19 = scalar_lea.vmem %s9350_s11, %s5055_s12 }
  0x1d   : > { %5090 = vmatmul.mubr.msk.bf16.gmra.mxu0 %vm594_vm1, %v6252_v18  ;;  %3394 = vmatprep.subr.bf16.mxu1 %v9352_v3  ;;  %v2096_v48 = vsel %vm667_vm0, %v5998_v47, 0  ;;  %v6001_v49 = vld [vmem:[%s9340_s1 + $0x84] ss:$8 sps:$4 sm:$0xff]   ;;  %v5999_v52 = vld [vmem:[%s9340_s1 + $0x80] ss:$8 sps:$4 sm:$0xff]  }
  0x1e   : > { %5120 = vmatmul.mubr.msk.bf16.gmra.mxu1 %vm594_vm1, %v5959_v14  ;;  %726 = vmatprep.mubr.bf16.mxu0 %v9352_v3 }
  0x1f   : > { %1031 = vmatprep.mubr.bf16.mxu1 %v9352_v3 }
  0x25   : > { %5091 = vmatmul.mubr.msk.bf16.gmra.mxu0 %vm594_vm1, %v6260_v19 }
  0x26   : > { %5121 = vmatmul.mubr.msk.bf16.gmra.mxu1 %vm594_vm1, %v6252_v18  ;;  %736 = vmatprep.mubr.bf16.mxu0 %v9352_v3 }
  0x27   : > { %1041 = vmatprep.mubr.bf16.mxu1 %v9352_v3 }
  0x2d   : > { %5092 = vmatmul.mubr.msk.bf16.gmra.mxu0 %vm594_vm1, %v6269_v20 }
  0x2e   : > { %5122 = vmatmul.mubr.msk.bf16.gmra.mxu1 %vm594_vm1, %v6260_v19  ;;  %746 = vmatprep.mubr.bf16.mxu0 %v9352_v3 }
  0x2f   : > { %1051 = vmatprep.mubr.bf16.mxu1 %v9352_v3 }
  0x35   : > { %5093 = vmatmul.mubr.msk.bf16.gmra.mxu0 %vm594_vm1, %v6278_v21 }
  0x36   : > { %5123 = vmatmul.mubr.msk.bf16.gmra.mxu1 %vm594_vm1, %v6269_v20  ;;  %756 = vmatprep.mubr.bf16.mxu0 %v9352_v3 }
  0x37   : > { %1061 = vmatprep.mubr.bf16.mxu1 %v9352_v3 }
  0x3d   : > { %5094 = vmatmul.mubr.msk.bf16.gmra.mxu0 %vm594_vm1, %v6287_v22 }
  0x3e   : > { %5124 = vmatmul.mubr.msk.bf16.gmra.mxu1 %vm594_vm1, %v6278_v21  ;;  %766 = vmatprep.mubr.bf16.mxu0 %v9352_v3 }
  0x3f   : > { %1071 = vmatprep.mubr.bf16.mxu1 %v9352_v3 }
  0x45   : > { %5095 = vmatmul.mubr.msk.bf16.gmra.mxu0 %vm594_vm1, %v6296_v23 }
  0x46   : > { %5125 = vmatmul.mubr.msk.bf16.gmra.mxu1 %vm594_vm1, %v6287_v22  ;;  %776 = vmatprep.mubr.bf16.mxu0 %v9352_v3 }
  0x47   : > { %1081 = vmatprep.mubr.bf16.mxu1 %v9352_v3 }
  0x4d   : > { %5096 = vmatmul.mubr.msk.bf16.gmra.mxu0 %vm594_vm1, %v6305_v24 }
  0x4e   : > { %5126 = vmatmul.mubr.msk.bf16.gmra.mxu1 %vm594_vm1, %v6296_v23  ;;  %786 = vmatprep.mubr.bf16.mxu0 %v9352_v3 }
  0x4f   : > { %1091 = vmatprep.mubr.bf16.mxu1 %v9352_v3 }
  0x55   : > { %5097 = vmatmul.mubr.msk.bf16.gmra.mxu0 %vm594_vm1, %v6326_v29 }
  0x56   : > { %5127 = vmatmul.mubr.msk.bf16.gmra.mxu1 %vm594_vm1, %v6305_v24  ;;  %796 = vmatprep.mubr.bf16.mxu0 %v9352_v3 }
  0x57   : > { %1101 = vmatprep.mubr.bf16.mxu1 %v9352_v3 }
  0x5d   : > { %5098 = vmatmul.mubr.msk.bf16.gmra.mxu0 %vm594_vm1, %v6341_v32 }
  0x5e   : > { %5128 = vmatmul.mubr.msk.bf16.gmra.mxu1 %vm594_vm1, %v6326_v29  ;;  %806 = vmatprep.mubr.bf16.mxu0 %v9352_v3 }
  0x5f   : > { %1111 = vmatprep.mubr.bf16.mxu1 %v9352_v3 }
  0x65   : > { %5099 = vmatmul.mubr.msk.bf16.gmra.mxu0 %vm594_vm1, %v6351_v33 }
  0x66   : > { %5129 = vmatmul.mubr.msk.bf16.gmra.mxu1 %vm594_vm1, %v6341_v32  ;;  %816 = vmatprep.mubr.bf16.mxu0 %v9352_v3 }
  0x67   : > { %1121 = vmatprep.mubr.bf16.mxu1 %v9352_v3 }
  0x6d   : > { %5100 = vmatmul.mubr.msk.bf16.gmra.mxu0 %vm594_vm1, %v6360_v34 }
  0x6e   : > { %5130 = vmatmul.mubr.msk.bf16.gmra.mxu1 %vm594_vm1, %v6351_v33  ;;  %826 = vmatprep.mubr.bf16.mxu0 %v9352_v3 }
  0x6f   : > { %1131 = vmatprep.mubr.bf16.mxu1 %v9352_v3 }
  0x75   : > { %5101 = vmatmul.mubr.msk.bf16.gmra.mxu0 %vm594_vm1, %v6369_v35 }
  0x76   : > { %5131 = vmatmul.mubr.msk.bf16.gmra.mxu1 %vm594_vm1, %v6360_v34  ;;  %836 = vmatprep.mubr.bf16.mxu0 %v9352_v3 }
  0x77   : > { %1141 = vmatprep.mubr.bf16.mxu1 %v9352_v3 }
  0x7d   : > { %5102 = vmatmul.mubr.msk.bf16.gmra.mxu0 %vm594_vm1, %v6378_v36 }
  0x7e   : > { %5132 = vmatmul.mubr.msk.bf16.gmra.mxu1 %vm594_vm1, %v6369_v35  ;;  %846 = vmatprep.mubr.bf16.mxu0 %v9352_v3 }
  0x7f   : > { %1151 = vmatprep.mubr.bf16.mxu1 %v9352_v3 }
  0x85   : > { %5103 = vmatmul.mubr.msk.bf16.gmra.mxu0 %vm594_vm1, %v6387_v37 }
  0x86   : > { %5133 = vmatmul.mubr.msk.bf16.gmra.mxu1 %vm594_vm1, %v6378_v36  ;;  %856 = vmatprep.mubr.bf16.mxu0 %v9352_v3 }
  0x87   : > { %1161 = vmatprep.mubr.bf16.mxu1 %v9352_v3 }
  0x8d   : > { %5104 = vmatmul.mubr.msk.bf16.gmra.mxu0 %vm594_vm1, %v6396_v38 }
  0x8e   : > { %5134 = vmatmul.mubr.msk.bf16.gmra.mxu1 %vm594_vm1, %v6387_v37  ;;  %866 = vmatprep.mubr.bf16.mxu0 %v9352_v3 }
  0x8f   : > { %1171 = vmatprep.mubr.bf16.mxu1 %v9352_v3 }
  0x95   : > { %5105 = vmatmul.mubr.msk.bf16.gmra.mxu0 %vm594_vm1, %v6405_v39 }
  0x96   : > { %5135 = vmatmul.mubr.msk.bf16.gmra.mxu1 %vm594_vm1, %v6396_v38  ;;  %876 = vmatprep.mubr.bf16.mxu0 %v9352_v3 }
  0x97   : > { %1181 = vmatprep.mubr.bf16.mxu1 %v9352_v3 }
  0x9d   : > { %5106 = vmatmul.mubr.msk.bf16.gmra.mxu0 %vm594_vm1, %v6414_v40 }
  0x9e   : > { %5136 = vmatmul.mubr.msk.bf16.gmra.mxu1 %vm594_vm1, %v6405_v39  ;;  %886 = vmatprep.mubr.bf16.mxu0 %v9352_v3 }
  0x9f   : > { %1191 = vmatprep.mubr.bf16.mxu1 %v9352_v3 }
  0xa5   : > { %5107 = vmatmul.mubr.msk.bf16.gmra.mxu0 %vm594_vm1, %v6423_v41 }
  0xa6   : > { %5137 = vmatmul.mubr.msk.bf16.gmra.mxu1 %vm594_vm1, %v6414_v40  ;;  %896 = vmatprep.mubr.bf16.mxu0 %v9352_v3 }
  0xa7   : > { %1201 = vmatprep.mubr.bf16.mxu1 %v9352_v3 }
  0xad   : > { %5108 = vmatmul.mubr.msk.bf16.gmra.mxu0 %vm594_vm1, %v6432_v42 }
  0xae   : > { %5138 = vmatmul.mubr.msk.bf16.gmra.mxu1 %vm594_vm1, %v6423_v41  ;;  %906 = vmatprep.mubr.bf16.mxu0 %v9352_v3 }
  0xaf   : > { %1211 = vmatprep.mubr.bf16.mxu1 %v9352_v3 }
  0xb5   : > { %5109 = vmatmul.mubr.msk.bf16.gmra.mxu0 %vm594_vm1, %v6441_v43 }
  0xb6   : > { %5139 = vmatmul.mubr.msk.bf16.gmra.mxu1 %vm594_vm1, %v6432_v42  ;;  %916 = vmatprep.mubr.bf16.mxu0 %v9352_v3 }
  0xb7   : > { %1221 = vmatprep.mubr.bf16.mxu1 %v9352_v3 }
  0xbd   : > { %5110 = vmatmul.mubr.msk.bf16.gmra.mxu0 %vm594_vm1, %v6450_v44 }
  0xbe   : > { %5140 = vmatmul.mubr.msk.bf16.gmra.mxu1 %vm594_vm1, %v6441_v43  ;;  %926 = vmatprep.mubr.bf16.mxu0 %v9352_v3 }
  0xbf   : > { %1231 = vmatprep.mubr.bf16.mxu1 %v9352_v3 }
  0xc5   : > { %5111 = vmatmul.mubr.msk.bf16.gmra.mxu0 %vm594_vm1, %v6459_v45 }
  0xc6   : > { %5141 = vmatmul.mubr.msk.bf16.gmra.mxu1 %vm594_vm1, %v6450_v44  ;;  %936 = vmatprep.mubr.bf16.mxu0 %v9352_v3 }
  0xc7   : > { %1241 = vmatprep.mubr.bf16.mxu1 %v9352_v3 }
  0xcd   : > { %5112 = vmatmul.mubr.msk.bf16.gmra.mxu0 %vm594_vm1, %v6468_v46 }
  0xce   : > { %5142 = vmatmul.mubr.msk.bf16.gmra.mxu1 %vm594_vm1, %v6459_v45  ;;  %1321 = vmatprep.mubr.bf16.mxu0 %v9352_v3 }
  0xcf   : > { %1727 = vmatprep.mubr.bf16.mxu1 %v9352_v3 }
  0xd5   : > { %v708_v50 = vpop.f32.mrf.mxu0  ;;  %5153 = vmatmul.mubr.msk.bf16.vlgmr.msra.gmra.mxu0 %vm594_vm1, %v6252_v18 }
  0xd6   : > { %v1013_v51 = vpop.f32.mrf.mxu1  ;;  %2114 = vmatpush1.bf16.msra.mxu0 %v2096_v48  ;;  %5187 = vmatmul.mubr.msk.bf16.vlgmr.msra.gmra.mxu1 %vm594_vm1, %v6260_v19 }
  0xd7   : > { %v6490_v53 = vadd.f32 %v1013_v51, %v708_v50  ;;  %v710_v54 = vpop.f32.mrf.mxu0  ;;  %1331 = vmatprep.mubr.bf16.mxu0 %v9352_v3  ;;  %1737 = vmatprep.mubr.bf16.mxu1 %v9352_v3 }
  0xd8   : > { %v1015_v55 = vpop.f32.mrf.mxu1  ;;  %2115 = vmatprep.subr.bf16.mxu0 %v6001_v49 }
  0xd9   : > { %v6494_v56 = vadd.f32 %v1015_v55, %v710_v54  ;;  %v712_v57 = vpop.f32.mrf.mxu0 }
  0xda   : > { %v1017_v58 = vpop.f32.mrf.mxu1  ;;  %2116 = vmatpush1.bf16.msra.mxu0 %v5999_v52 }
  0xdb   : > { %v6496_v59 = vadd.f32 %v1017_v58, %v712_v57  ;;  %v714_v60 = vpop.f32.mrf.mxu0  ;;  %3916 = vmatprep.subr.bf16.mxu0 %v9352_v3 }
  0xdc   : > { %v1019_v61 = vpop.f32.mrf.mxu1 }
  0xdd   : > { %v6499_v62 = vadd.f32 %v1019_v61, %v714_v60  ;;  %v718_v63 = vpop.f32.mrf.mxu0  ;;  %5154 = vmatmul.mubr.msk.bf16.gmra.mxu0 %vm594_vm1, %v6260_v19 }
  0xde   : > { %v1023_v0 = vpop.f32.mrf.mxu1  ;;  %5188 = vmatmul.mubr.msk.bf16.gmra.mxu1 %vm594_vm1, %v6269_v20  ;;  %1341 = vmatprep.mubr.bf16.mxu0 %v9352_v3 }
  0xdf   : > { %v6506_v1 = vadd.f32 %v1023_v0, %v718_v63  ;;  %v720_v2 = vpop.f32.mrf.mxu0  ;;  %1747 = vmatprep.mubr.bf16.mxu1 %v9352_v3 }
  0xe0   : > { %v1025_v4 = vpop.f32.mrf.mxu1 }
  0xe1   : > { %v6509_v5 = vadd.f32 %v1025_v4, %v720_v2  ;;  %v722_v6 = vpop.f32.mrf.mxu0 }
  0xe2   : > { %v1027_v7 = vpop.f32.mrf.mxu1 }
  0xe3   : > { %v6511_v8 = vadd.f32 %v1027_v7, %v722_v6  ;;  %v724_v9 = vpop.f32.mrf.mxu0 }
  0xe4   : > { %v1029_v10 = vpop.f32.mrf.mxu1 }
  0xe5   : > { %v6513_v11 = vadd.f32 %v1029_v10, %v724_v9  ;;  %v728_v12 = vpop.f32.mrf.mxu0  ;;  %5155 = vmatmul.mubr.msk.bf16.gmra.mxu0 %vm594_vm1, %v6269_v20 }
  0xe6   : > { %v1033_v13 = vpop.f32.mrf.mxu1  ;;  %5189 = vmatmul.mubr.msk.bf16.gmra.mxu1 %vm594_vm1, %v6278_v21  ;;  %1351 = vmatprep.mubr.bf16.mxu0 %v9352_v3 }
  0xe7   : > { %v6520_v14 = vadd.f32 %v1033_v13, %v728_v12  ;;  %v730_v15 = vpop.f32.mrf.mxu0  ;;  %1757 = vmatprep.mubr.bf16.mxu1 %v9352_v3 }
  0xe8   : > { %v1035_v16 = vpop.f32.mrf.mxu1 }
  0xe9   : > { %v6523_v17 = vadd.f32 %v1035_v16, %v730_v15  ;;  %v732_v18 = vpop.f32.mrf.mxu0 }
  0xea   : > { %v1037_v19 = vpop.f32.mrf.mxu1 }
  0xeb   : > { %v6525_v25 = vadd.f32 %v1037_v19, %v732_v18  ;;  %v734_v26 = vpop.f32.mrf.mxu0 }
  0xec   : > { %v1039_v20 = vpop.f32.mrf.mxu1 }
  0xed   : > { %v6527_v27 = vadd.f32 %v1039_v20, %v734_v26  ;;  %v738_v28 = vpop.f32.mrf.mxu0  ;;  %5156 = vmatmul.mubr.msk.bf16.gmra.mxu0 %vm594_vm1, %v6278_v21 }
  0xee   : > { %v1043_v30 = vpop.f32.mrf.mxu1  ;;  %5190 = vmatmul.mubr.msk.bf16.gmra.mxu1 %vm594_vm1, %v6287_v22  ;;  %1361 = vmatprep.mubr.bf16.mxu0 %v9352_v3 }
  0xef   : > { %v6534_v31 = vadd.f32 %v1043_v30, %v738_v28  ;;  %v740_v47 = vpop.f32.mrf.mxu0  ;;  %1767 = vmatprep.mubr.bf16.mxu1 %v9352_v3 }
  0xf0   : > { %v1045_v48 = vpop.f32.mrf.mxu1 }
  0xf1   : > { %v6537_v49 = vadd.f32 %v1045_v48, %v740_v47  ;;  %v742_v50 = vpop.f32.mrf.mxu0 }
  0xf2   : > { %v1047_v51 = vpop.f32.mrf.mxu1 }
  0xf3   : > { %v6539_v52 = vadd.f32 %v1047_v51, %v742_v50  ;;  %v744_v54 = vpop.f32.mrf.mxu0 }
  0xf4   : > { %v1049_v21 = vpop.f32.mrf.mxu1 }
  0xf5   : > { %v6541_v55 = vadd.f32 %v1049_v21, %v744_v54  ;;  %v748_v57 = vpop.f32.mrf.mxu0  ;;  %5157 = vmatmul.mubr.msk.bf16.gmra.mxu0 %vm594_vm1, %v6287_v22 }
  0xf6   : > { %v1053_v58 = vpop.f32.mrf.mxu1  ;;  %5191 = vmatmul.mubr.msk.bf16.gmra.mxu1 %vm594_vm1, %v6296_v23  ;;  %1371 = vmatprep.mubr.bf16.mxu0 %v9352_v3 }
  0xf7   : > { %v6548_v60 = vadd.f32 %v1053_v58, %v748_v57  ;;  %v750_v61 = vpop.f32.mrf.mxu0  ;;  %1777 = vmatprep.mubr.bf16.mxu1 %v9352_v3 }
  0xf8   : > { %v1055_v63 = vpop.f32.mrf.mxu1 }
  0xf9   : > { %v6551_v0 = vadd.f32 %v1055_v63, %v750_v61  ;;  %v752_v2 = vpop.f32.mrf.mxu0 }
  0xfa   : > { %v1057_v4 = vpop.f32.mrf.mxu1 }
  0xfb   : > { %v6553_v6 = vadd.f32 %v1057_v4, %v752_v2  ;;  %v754_v7 = vpop.f32.mrf.mxu0 }
  0xfc   : > { %v1059_v22 = vpop.f32.mrf.mxu1 }
  0xfd   : > { %v6555_v9 = vadd.f32 %v1059_v22, %v754_v7  ;;  %v758_v10 = vpop.f32.mrf.mxu0  ;;  %5158 = vmatmul.mubr.msk.bf16.gmra.mxu0 %vm594_vm1, %v6296_v23 }
  0xfe   : > { %v1063_v12 = vpop.f32.mrf.mxu1  ;;  %5192 = vmatmul.mubr.msk.bf16.gmra.mxu1 %vm594_vm1, %v6305_v24  ;;  %1381 = vmatprep.mubr.bf16.mxu0 %v9352_v3 }
  0xff   : > { %v6562_v13 = vadd.f32 %v1063_v12, %v758_v10  ;;  %v760_v15 = vpop.f32.mrf.mxu0  ;;  %1787 = vmatprep.mubr.bf16.mxu1 %v9352_v3 }
 0x100   : > { %v1065_v16 = vpop.f32.mrf.mxu1 }
 0x101   : > { %v6565_v18 = vadd.f32 %v1065_v16, %v760_v15  ;;  %v762_v19 = vpop.f32.mrf.mxu0 }
 0x102   : > { %v1067_v26 = vpop.f32.mrf.mxu1 }
 0x103   : > { %v6567_v20 = vadd.f32 %v1067_v26, %v762_v19  ;;  %v764_v28 = vpop.f32.mrf.mxu0 }
 0x104   : > { %v1069_v23 = vpop.f32.mrf.mxu1 }
 0x105   : > { %v6569_v30 = vadd.f32 %v1069_v23, %v764_v28  ;;  %v768_v47 = vpop.f32.mrf.mxu0  ;;  %5159 = vmatmul.mubr.msk.bf16.gmra.mxu0 %vm594_vm1, %v6305_v24 }
 0x106   : > { %v1073_v48 = vpop.f32.mrf.mxu1  ;;  %5193 = vmatmul.mubr.msk.bf16.gmra.mxu1 %vm594_vm1, %v6326_v29  ;;  %1391 = vmatprep.mubr.bf16.mxu0 %v9352_v3 }
 0x107   : > { %v6576_v50 = vadd.f32 %v1073_v48, %v768_v47  ;;  %v770_v51 = vpop.f32.mrf.mxu0  ;;  %1797 = vmatprep.mubr.bf16.mxu1 %v9352_v3 }
 0x108   : > { %v1075_v54 = vpop.f32.mrf.mxu1 }
 0x109   : > { %v6579_v21 = vadd.f32 %v1075_v54, %v770_v51  ;;  %v772_v57 = vpop.f32.mrf.mxu0 }
 0x10a   : > { %v1077_v58 = vpop.f32.mrf.mxu1 }
 0x10b   : > { %v6581_v61 = vadd.f32 %v1077_v58, %v772_v57  ;;  %v774_v63 = vpop.f32.mrf.mxu0 }
 0x10c   : > { %v1079_v24 = vpop.f32.mrf.mxu1 }
 0x10d   : > { %v6583_v2 = vadd.f32 %v1079_v24, %v774_v63  ;;  %v778_v4 = vpop.f32.mrf.mxu0  ;;  %5160 = vmatmul.mubr.msk.bf16.gmra.mxu0 %vm594_vm1, %v6326_v29 }
 0x10e   : > { %v1083_v7 = vpop.f32.mrf.mxu1  ;;  %5194 = vmatmul.mubr.msk.bf16.gmra.mxu1 %vm594_vm1, %v6341_v32  ;;  %1401 = vmatprep.mubr.bf16.mxu0 %v9352_v3 }
 0x10f   : > { %v6590_v22 = vadd.f32 %v1083_v7, %v778_v4  ;;  %v780_v10 = vpop.f32.mrf.mxu0  ;;  %1807 = vmatprep.mubr.bf16.mxu1 %v9352_v3 }
 0x110   : > { %v1085_v12 = vpop.f32.mrf.mxu1 }
 0x111   : > { %v6593_v15 = vadd.f32 %v1085_v12, %v780_v10  ;;  %v782_v16 = vpop.f32.mrf.mxu0 }
 0x112   : > { %v1087_v19 = vpop.f32.mrf.mxu1 }
 0x113   : > { %v6595_v26 = vadd.f32 %v1087_v19, %v782_v16  ;;  %v784_v28 = vpop.f32.mrf.mxu0 }
 0x114   : > { %v1089_v29 = vpop.f32.mrf.mxu1 }
 0x115   : > { %v6597_v23 = vadd.f32 %v1089_v29, %v784_v28  ;;  %v788_v47 = vpop.f32.mrf.mxu0  ;;  %5161 = vmatmul.mubr.msk.bf16.gmra.mxu0 %vm594_vm1, %v6341_v32 }
 0x116   : > { %v1093_v48 = vpop.f32.mrf.mxu1  ;;  %5195 = vmatmul.mubr.msk.bf16.gmra.mxu1 %vm594_vm1, %v6351_v33  ;;  %1411 = vmatprep.mubr.bf16.mxu0 %v9352_v3 }
 0x117   : > { %v6604_v51 = vadd.f32 %v1093_v48, %v788_v47  ;;  %v790_v54 = vpop.f32.mrf.mxu0  ;;  %1817 = vmatprep.mubr.bf16.mxu1 %v9352_v3 }
 0x118   : > { %v1095_v57 = vpop.f32.mrf.mxu1 }
 0x119   : > { %v6607_v58 = vadd.f32 %v1095_v57, %v790_v54  ;;  %v792_v63 = vpop.f32.mrf.mxu0 }
 0x11a   : > { %v1097_v24 = vpop.f32.mrf.mxu1 }
 0x11b   : > { %v6609_v4 = vadd.f32 %v1097_v24, %v792_v63  ;;  %v794_v7 = vpop.f32.mrf.mxu0 }
 0x11c   : > { %v1099_v32 = vpop.f32.mrf.mxu1 }
 0x11d   : > { %v6611_v10 = vadd.f32 %v1099_v32, %v794_v7  ;;  %v798_v12 = vpop.f32.mrf.mxu0  ;;  %5162 = vmatmul.mubr.msk.bf16.gmra.mxu0 %vm594_vm1, %v6351_v33 }
 0x11e   : > { %v1103_v16 = vpop.f32.mrf.mxu1  ;;  %5196 = vmatmul.mubr.msk.bf16.gmra.mxu1 %vm594_vm1, %v6360_v34  ;;  %1421 = vmatprep.mubr.bf16.mxu0 %v9352_v3 }
 0x11f   : > { %v6618_v19 = vadd.f32 %v1103_v16, %v798_v12  ;;  %v800_v28 = vpop.f32.mrf.mxu0  ;;  %1827 = vmatprep.mubr.bf16.mxu1 %v9352_v3 }
 0x120   : > { %v1105_v29 = vpop.f32.mrf.mxu1 }
 0x121   : > { %v6621_v47 = vadd.f32 %v1105_v29, %v800_v28  ;;  %v802_v48 = vpop.f32.mrf.mxu0 }
 0x122   : > { %v1107_v54 = vpop.f32.mrf.mxu1 }
 0x123   : > { %v6623_v57 = vadd.f32 %v1107_v54, %v802_v48  ;;  %v804_v63 = vpop.f32.mrf.mxu0 }
 0x124   : > { %v1109_v33 = vpop.f32.mrf.mxu1 }
 0x125   : > { %9494 = vst [vmem:[#allocation2_spill] sm:$0xff] %v6623_v57  ;;  %v6625_v24 = vadd.f32 %v1109_v33, %v804_v63  ;;  %v808_v7 = vpop.f32.mrf.mxu0  ;;  %5163 = vmatmul.mubr.msk.bf16.gmra.mxu0 %vm594_vm1, %v6360_v34 }
 0x126   : > { %v1113_v32 = vpop.f32.mrf.mxu1  ;;  %5197 = vmatmul.mubr.msk.bf16.gmra.mxu1 %vm594_vm1, %v6369_v35  ;;  %1431 = vmatprep.mubr.bf16.mxu0 %v9352_v3 }
 0x127   : > { %9495 = vst [vmem:[#allocation3_spill] sm:$0xff] %v6625_v24  ;;  %v6632_v12 = vadd.f32 %v1113_v32, %v808_v7  ;;  %v810_v16 = vpop.f32.mrf.mxu0  ;;  %1837 = vmatprep.mubr.bf16.mxu1 %v9352_v3 }
 0x128   : > { %v1115_v28 = vpop.f32.mrf.mxu1 }
 0x129   : > { %v6635_v29 = vadd.f32 %v1115_v28, %v810_v16  ;;  %v812_v48 = vpop.f32.mrf.mxu0 }
 0x12a   : > { %v1117_v54 = vpop.f32.mrf.mxu1 }
 0x12b   : > { %9496 = vst [vmem:[#allocation4_spill] sm:$0xff] %v6635_v29  ;;  %v6637_v63 = vadd.f32 %v1117_v54, %v812_v48  ;;  %v814_v33 = vpop.f32.mrf.mxu0 }
 0x12c   : > { %v1119_v34 = vpop.f32.mrf.mxu1 }
 0x12d   : > { %9497 = vst [vmem:[#allocation5_spill] sm:$0xff] %v6637_v63  ;;  %v6639_v24 = vadd.f32 %v1119_v34, %v814_v33  ;;  %v818_v57 = vpop.f32.mrf.mxu0  ;;  %5164 = vmatmul.mubr.msk.bf16.gmra.mxu0 %vm594_vm1, %v6369_v35 }
 0x12e   : > { %v1123_v7 = vpop.f32.mrf.mxu1  ;;  %5198 = vmatmul.mubr.msk.bf16.gmra.mxu1 %vm594_vm1, %v6378_v36  ;;  %1441 = vmatprep.mubr.bf16.mxu0 %v9352_v3 }
 0x12f   : > { %9498 = vst [vmem:[#allocation6_spill] sm:$0xff] %v6639_v24  ;;  %v6646_v32 = vadd.f32 %v1123_v7, %v818_v57  ;;  %v820_v16 = vpop.f32.mrf.mxu0  ;;  %1847 = vmatprep.mubr.bf16.mxu1 %v9352_v3 }
 0x130   : > { %v1125_v28 = vpop.f32.mrf.mxu1 }
 0x131   : > { %v6649_v48 = vadd.f32 %v1125_v28, %v820_v16  ;;  %v822_v54 = vpop.f32.mrf.mxu0 }
 0x132   : > { %v1127_v33 = vpop.f32.mrf.mxu1 }
 0x133   : > { %9499 = vst [vmem:[#allocation7_spill] sm:$0xff] %v6649_v48  ;;  %v6651_v34 = vadd.f32 %v1127_v33, %v822_v54  ;;  %v824_v24 = vpop.f32.mrf.mxu0 }
 0x134   : > { %v1129_v35 = vpop.f32.mrf.mxu1 }
 0x135   : > { %9500 = vst [vmem:[#allocation8_spill] sm:$0xff] %v6651_v34  ;;  %v6653_v63 = vadd.f32 %v1129_v35, %v824_v24  ;;  %v828_v29 = vpop.f32.mrf.mxu0  ;;  %5165 = vmatmul.mubr.msk.bf16.gmra.mxu0 %vm594_vm1, %v6378_v36 }
 0x136   : > { %v1133_v57 = vpop.f32.mrf.mxu1  ;;  %5199 = vmatmul.mubr.msk.bf16.gmra.mxu1 %vm594_vm1, %v6387_v37  ;;  %1451 = vmatprep.mubr.bf16.mxu0 %v9352_v3 }
 0x137   : > { %9501 = vst [vmem:[#allocation9_spill] sm:$0xff] %v6653_v63  ;;  %v6660_v7 = vadd.f32 %v1133_v57, %v828_v29  ;;  %v830_v16 = vpop.f32.mrf.mxu0  ;;  %1857 = vmatprep.mubr.bf16.mxu1 %v9352_v3 }
 0x138   : > { %v1135_v28 = vpop.f32.mrf.mxu1 }
 0x139   : > { %v6663_v54 = vadd.f32 %v1135_v28, %v830_v16  ;;  %v832_v24 = vpop.f32.mrf.mxu0 }
 0x13a   : > { %v1137_v33 = vpop.f32.mrf.mxu1 }
 0x13b   : > { %9502 = vst [vmem:[#allocation10_spill] sm:$0xff] %v6663_v54  ;;  %v6665_v35 = vadd.f32 %v1137_v33, %v832_v24  ;;  %v834_v63 = vpop.f32.mrf.mxu0 }
 0x13c   : > { %v1139_v36 = vpop.f32.mrf.mxu1 }
 0x13d   : > { %9503 = vst [vmem:[#allocation11_spill] sm:$0xff] %v6665_v35  ;;  %v6667_v34 = vadd.f32 %v1139_v36, %v834_v63  ;;  %v838_v48 = vpop.f32.mrf.mxu0  ;;  %5166 = vmatmul.mubr.msk.bf16.gmra.mxu0 %vm594_vm1, %v6387_v37 }
 0x13e   : > { %v1143_v29 = vpop.f32.mrf.mxu1  ;;  %5200 = vmatmul.mubr.msk.bf16.gmra.mxu1 %vm594_vm1, %v6396_v38  ;;  %1461 = vmatprep.mubr.bf16.mxu0 %v9352_v3 }
 0x13f   : > { %9504 = vst [vmem:[#allocation12_spill] sm:$0xff] %v6667_v34  ;;  %v6674_v57 = vadd.f32 %v1143_v29, %v838_v48  ;;  %v840_v16 = vpop.f32.mrf.mxu0  ;;  %1867 = vmatprep.mubr.bf16.mxu1 %v9352_v3 }
 0x140   : > { %v1145_v28 = vpop.f32.mrf.mxu1 }
 0x141   : > { %v6677_v24 = vadd.f32 %v1145_v28, %v840_v16  ;;  %v842_v63 = vpop.f32.mrf.mxu0 }
 0x142   : > { %v1147_v33 = vpop.f32.mrf.mxu1 }
 0x143   : > { %9505 = vst [vmem:[#allocation13_spill] sm:$0xff] %v6677_v24  ;;  %v6679_v36 = vadd.f32 %v1147_v33, %v842_v63  ;;  %v844_v34 = vpop.f32.mrf.mxu0 }
 0x144   : > { %v1149_v37 = vpop.f32.mrf.mxu1 }
 0x145   : > { %9506 = vst [vmem:[#allocation14_spill] sm:$0xff] %v6679_v36  ;;  %v6681_v35 = vadd.f32 %v1149_v37, %v844_v34  ;;  %v848_v54 = vpop.f32.mrf.mxu0  ;;  %5167 = vmatmul.mubr.msk.bf16.gmra.mxu0 %vm594_vm1, %v6396_v38 }
 0x146   : > { %v1153_v48 = vpop.f32.mrf.mxu1  ;;  %5201 = vmatmul.mubr.msk.bf16.gmra.mxu1 %vm594_vm1, %v6405_v39  ;;  %1471 = vmatprep.mubr.bf16.mxu0 %v9352_v3 }
 0x147   : > { %9507 = vst [vmem:[#allocation15_spill] sm:$0xff] %v6681_v35  ;;  %v6688_v29 = vadd.f32 %v1153_v48, %v848_v54  ;;  %v850_v16 = vpop.f32.mrf.mxu0  ;;  %1877 = vmatprep.mubr.bf16.mxu1 %v9352_v3 }
 0x148   : > { %v1155_v28 = vpop.f32.mrf.mxu1 }
 0x149   : > { %v6691_v63 = vadd.f32 %v1155_v28, %v850_v16  ;;  %v852_v34 = vpop.f32.mrf.mxu0 }
 0x14a   : > { %v1157_v33 = vpop.f32.mrf.mxu1 }
 0x14b   : > { %9508 = vst [vmem:[#allocation16_spill] sm:$0xff] %v6691_v63  ;;  %v6693_v37 = vadd.f32 %v1157_v33, %v852_v34  ;;  %v854_v35 = vpop.f32.mrf.mxu0 }
 0x14c   : > { %v1159_v38 = vpop.f32.mrf.mxu1 }
 0x14d   : > { %9509 = vst [vmem:[#allocation17_spill] sm:$0xff] %v6693_v37  ;;  %v6695_v36 = vadd.f32 %v1159_v38, %v854_v35  ;;  %v858_v24 = vpop.f32.mrf.mxu0  ;;  %5168 = vmatmul.mubr.msk.bf16.gmra.mxu0 %vm594_vm1, %v6405_v39 }
 0x14e   : > { %v1163_v54 = vpop.f32.mrf.mxu1  ;;  %5202 = vmatmul.mubr.msk.bf16.gmra.mxu1 %vm594_vm1, %v6414_v40  ;;  %1481 = vmatprep.mubr.bf16.mxu0 %v9352_v3 }
 0x14f   : > { %9510 = vst [vmem:[#allocation18_spill] sm:$0xff] %v6695_v36  ;;  %v6702_v48 = vadd.f32 %v1163_v54, %v858_v24  ;;  %v860_v16 = vpop.f32.mrf.mxu0  ;;  %1887 = vmatprep.mubr.bf16.mxu1 %v9352_v3 }
 0x150   : > { %v1165_v28 = vpop.f32.mrf.mxu1 }
 0x151   : > { %v6705_v34 = vadd.f32 %v1165_v28, %v860_v16  ;;  %v862_v35 = vpop.f32.mrf.mxu0 }
 0x152   : > { %v1167_v33 = vpop.f32.mrf.mxu1 }
 0x153   : > { %9511 = vst [vmem:[#allocation19_spill] sm:$0xff] %v6705_v34  ;;  %v6707_v38 = vadd.f32 %v1167_v33, %v862_v35  ;;  %v864_v36 = vpop.f32.mrf.mxu0 }
 0x154   : > { %v1169_v39 = vpop.f32.mrf.mxu1 }
 0x155   : > { %9512 = vst [vmem:[#allocation20_spill] sm:$0xff] %v6707_v38  ;;  %v6709_v37 = vadd.f32 %v1169_v39, %v864_v36  ;;  %v868_v63 = vpop.f32.mrf.mxu0  ;;  %5169 = vmatmul.mubr.msk.bf16.gmra.mxu0 %vm594_vm1, %v6414_v40 }
 0x156   : > { %v1173_v24 = vpop.f32.mrf.mxu1  ;;  %5203 = vmatmul.mubr.msk.bf16.gmra.mxu1 %vm594_vm1, %v6423_v41  ;;  %1491 = vmatprep.mubr.bf16.mxu0 %v9352_v3 }
 0x157   : > { %9513 = vst [vmem:[#allocation21_spill] sm:$0xff] %v6709_v37  ;;  %v6716_v54 = vadd.f32 %v1173_v24, %v868_v63  ;;  %v870_v16 = vpop.f32.mrf.mxu0  ;;  %1897 = vmatprep.mubr.bf16.mxu1 %v9352_v3 }
 0x158   : > { %v1175_v28 = vpop.f32.mrf.mxu1 }
 0x159   : > { %v6719_v35 = vadd.f32 %v1175_v28, %v870_v16  ;;  %v872_v36 = vpop.f32.mrf.mxu0 }
 0x15a   : > { %v1177_v33 = vpop.f32.mrf.mxu1 }
 0x15b   : > { %9514 = vst [vmem:[#allocation22_spill] sm:$0xff] %v6719_v35  ;;  %v6721_v39 = vadd.f32 %v1177_v33, %v872_v36  ;;  %v874_v37 = vpop.f32.mrf.mxu0 }
 0x15c   : > { %v1179_v40 = vpop.f32.mrf.mxu1 }
 0x15d   : > { %9515 = vst [vmem:[#allocation23_spill] sm:$0xff] %v6721_v39  ;;  %v6723_v38 = vadd.f32 %v1179_v40, %v874_v37  ;;  %v878_v34 = vpop.f32.mrf.mxu0  ;;  %5170 = vmatmul.mubr.msk.bf16.gmra.mxu0 %vm594_vm1, %v6423_v41 }
 0x15e   : > { %v1183_v63 = vpop.f32.mrf.mxu1  ;;  %5204 = vmatmul.mubr.msk.bf16.gmra.mxu1 %vm594_vm1, %v6432_v42  ;;  %1501 = vmatprep.mubr.bf16.mxu0 %v9352_v3 }
 0x15f   : > { %9516 = vst [vmem:[#allocation24_spill] sm:$0xff] %v6723_v38  ;;  %v6730_v24 = vadd.f32 %v1183_v63, %v878_v34  ;;  %v880_v16 = vpop.f32.mrf.mxu0  ;;  %1907 = vmatprep.mubr.bf16.mxu1 %v9352_v3 }
 0x160   : > { %v1185_v28 = vpop.f32.mrf.mxu1 }
 0x161   : > { %v6733_v36 = vadd.f32 %v1185_v28, %v880_v16  ;;  %v882_v37 = vpop.f32.mrf.mxu0 }
 0x162   : > { %v1187_v33 = vpop.f32.mrf.mxu1 }
 0x163   : > { %9517 = vst [vmem:[#allocation25_spill] sm:$0xff] %v6733_v36  ;;  %v6735_v40 = vadd.f32 %v1187_v33, %v882_v37  ;;  %v884_v38 = vpop.f32.mrf.mxu0 }
 0x164   : > { %v1189_v41 = vpop.f32.mrf.mxu1 }
 0x165   : > { %9518 = vst [vmem:[#allocation26_spill] sm:$0xff] %v6735_v40  ;;  %v6737_v39 = vadd.f32 %v1189_v41, %v884_v38  ;;  %v888_v35 = vpop.f32.mrf.mxu0  ;;  %5171 = vmatmul.mubr.msk.bf16.gmra.mxu0 %vm594_vm1, %v6432_v42 }
 0x166   : > { %v1193_v34 = vpop.f32.mrf.mxu1  ;;  %5205 = vmatmul.mubr.msk.bf16.gmra.mxu1 %vm594_vm1, %v6441_v43  ;;  %1511 = vmatprep.mubr.bf16.mxu0 %v9352_v3 }
 0x167   : > { %9519 = vst [vmem:[#allocation27_spill] sm:$0xff] %v6737_v39  ;;  %v6744_v63 = vadd.f32 %v1193_v34, %v888_v35  ;;  %v890_v16 = vpop.f32.mrf.mxu0  ;;  %1917 = vmatprep.mubr.bf16.mxu1 %v9352_v3 }
 0x168   : > { %v1195_v28 = vpop.f32.mrf.mxu1 }
 0x169   : > { %v6747_v37 = vadd.f32 %v1195_v28, %v890_v16  ;;  %v892_v38 = vpop.f32.mrf.mxu0 }
 0x16a   : > { %v1197_v33 = vpop.f32.mrf.mxu1 }
 0x16b   : > { %9520 = vst [vmem:[#allocation28_spill] sm:$0xff] %v6747_v37  ;;  %v6749_v41 = vadd.f32 %v1197_v33, %v892_v38  ;;  %v894_v39 = vpop.f32.mrf.mxu0 }
 0x16c   : > { %v1199_v42 = vpop.f32.mrf.mxu1 }
 0x16d   : > { %9521 = vst [vmem:[#allocation29_spill] sm:$0xff] %v6749_v41  ;;  %v6751_v40 = vadd.f32 %v1199_v42, %v894_v39  ;;  %v898_v36 = vpop.f32.mrf.mxu0  ;;  %5172 = vmatmul.mubr.msk.bf16.gmra.mxu0 %vm594_vm1, %v6441_v43 }
 0x16e   : > { %v1203_v35 = vpop.f32.mrf.mxu1  ;;  %5206 = vmatmul.mubr.msk.bf16.gmra.mxu1 %vm594_vm1, %v6450_v44  ;;  %1521 = vmatprep.mubr.bf16.mxu0 %v9352_v3 }
 0x16f   : > { %9522 = vst [vmem:[#allocation30_spill] sm:$0xff] %v6751_v40  ;;  %v6758_v34 = vadd.f32 %v1203_v35, %v898_v36  ;;  %v900_v16 = vpop.f32.mrf.mxu0  ;;  %1927 = vmatprep.mubr.bf16.mxu1 %v9352_v3 }
 0x170   : > { %v1205_v28 = vpop.f32.mrf.mxu1 }
 0x171   : > { %v6761_v38 = vadd.f32 %v1205_v28, %v900_v16  ;;  %v902_v39 = vpop.f32.mrf.mxu0 }
 0x172   : > { %v1207_v33 = vpop.f32.mrf.mxu1 }
 0x173   : > { %9523 = vst [vmem:[#allocation31_spill] sm:$0xff] %v6761_v38  ;;  %v6763_v42 = vadd.f32 %v1207_v33, %v902_v39  ;;  %v904_v40 = vpop.f32.mrf.mxu0  ;;  %v6093_v38 = vld [vmem:[%s6236_s26 + $0x28] sm:$0xff]  }
 0x174   : > { %v1209_v43 = vpop.f32.mrf.mxu1 }
 0x175   : > { %9524 = vst [vmem:[#allocation32_spill] sm:$0xff] %v6763_v42  ;;  %v6765_v41 = vadd.f32 %v1209_v43, %v904_v40  ;;  %v908_v37 = vpop.f32.mrf.mxu0  ;;  %5173 = vmatmul.mubr.msk.bf16.gmra.mxu0 %vm594_vm1, %v6450_v44 }
 0x176   : > { %v1213_v36 = vpop.f32.mrf.mxu1  ;;  %5207 = vmatmul.mubr.msk.bf16.gmra.mxu1 %vm594_vm1, %v6459_v45  ;;  %1531 = vmatprep.mubr.bf16.mxu0 %v9352_v3 }
 0x177   : > { %9525 = vst [vmem:[#allocation33_spill] sm:$0xff] %v6765_v41  ;;  %v6772_v35 = vadd.f32 %v1213_v36, %v908_v37  ;;  %v910_v16 = vpop.f32.mrf.mxu0  ;;  %1937 = vmatprep.mubr.bf16.mxu1 %v9352_v3 }
 0x178   : > { %v1215_v28 = vpop.f32.mrf.mxu1 }
 0x179   : > { %9526 = vst [vmem:[#allocation34_spill] sm:$0xff] %v6772_v35  ;;  %v6775_v39 = vadd.f32 %v1215_v28, %v910_v16  ;;  %v912_v40 = vpop.f32.mrf.mxu0 }
 0x17a   : > { %v1217_v33 = vpop.f32.mrf.mxu1 }
 0x17b   : > { %9527 = vst [vmem:[#allocation35_spill] sm:$0xff] %v6775_v39  ;;  %v6777_v43 = vadd.f32 %v1217_v33, %v912_v40  ;;  %v6779_v44 = vpop.f32.mrf.mxu0 }
 0x17c   : > { %9529 = vst [vmem:[#allocation37_spill] sm:$0xff] %v6779_v44  ;;  %v6781_v41 = vpop.f32.mrf.mxu1  ;;  %v6794_v44 = vld [vmem:[%s6236_s26 + $0xc8] sm:$0xff]  }
 0x17d   : > { %9528 = vst [vmem:[#allocation36_spill] sm:$0xff] %v6777_v43  ;;  %9530 = vst [vmem:[#allocation38_spill] sm:$0xff] %v6781_v41  ;;  %v918_v42 = vpop.f32.mrf.mxu0  ;;  %5174 = vmatmul.mubr.msk.bf16.gmra.mxu0 %vm594_vm1, %v6459_v45 }
 0x17e   : > { %v1223_v37 = vpop.f32.mrf.mxu1  ;;  %5208 = vmatmul.mubr.msk.bf16.gmra.mxu1 %vm594_vm1, %v6468_v46  ;;  %1541 = vmatprep.mubr.bf16.mxu0 %v9352_v3  ;;  %9533 = vst [vmem:[#allocation41_spill] sm:$0xff] %v6794_v44 }
 0x17f   : > { %v6788_v36 = vadd.f32 %v1223_v37, %v918_v42  ;;  %v920_v16 = vpop.f32.mrf.mxu0  ;;  %1947 = vmatprep.mubr.bf16.mxu1 %v9352_v3 }
 0x180   : > { %v1225_v28 = vpop.f32.mrf.mxu1 }
 0x181   : > { %9531 = vst [vmem:[#allocation39_spill] sm:$0xff] %v6788_v36  ;;  %v6791_v40 = vadd.f32 %v1225_v28, %v920_v16  ;;  %v922_v33 = vpop.f32.mrf.mxu0 }
 0x182   : > { %v1227_v41 = vpop.f32.mrf.mxu1 }
 0x183   : > { %9532 = vst [vmem:[#allocation40_spill] sm:$0xff] %v6791_v40  ;;  %v6796_v45 = vadd.f32 %v1227_v41, %v922_v33  ;;  %v6798_v43 = vpop.f32.mrf.mxu0 }
 0x184   : > { %9535 = vst [vmem:[#allocation43_spill] sm:$0xff] %v6798_v43  ;;  %v6800_v39 = vpop.f32.mrf.mxu1  ;;  %v6813_v43 = vld [vmem:[%s6236_s26 + $0xd0] sm:$0xff]  }
 0x185   : > { %9534 = vst [vmem:[#allocation42_spill] sm:$0xff] %v6796_v45  ;;  %9536 = vst [vmem:[#allocation44_spill] sm:$0xff] %v6800_v39  ;;  %v928_v35 = vpop.f32.mrf.mxu0  ;;  %5175 = vmatmul.mubr.msk.bf16.gmra.mxu0 %vm594_vm1, %v6468_v46 }
 0x186   : > { %v1233_v42 = vpop.f32.mrf.mxu1  ;;  %5209 = vmatmul.mubr.msk.bf16.gmra.mxu1 %vm594_vm1, %v6794_v44  ;;  %1551 = vmatprep.mubr.bf16.mxu0 %v9352_v3  ;;  %9539 = vst [vmem:[#allocation47_spill] sm:$0xff] %v6813_v43 }
 0x187   : > { %v6807_v37 = vadd.f32 %v1233_v42, %v928_v35  ;;  %v930_v16 = vpop.f32.mrf.mxu0  ;;  %1957 = vmatprep.mubr.bf16.mxu1 %v9352_v3 }
 0x188   : > { %v1235_v41 = vpop.f32.mrf.mxu1 }
 0x189   : > { %9537 = vst [vmem:[#allocation45_spill] sm:$0xff] %v6807_v37  ;;  %v6810_v28 = vadd.f32 %v1235_v41, %v930_v16  ;;  %v932_v33 = vpop.f32.mrf.mxu0 }
 0x18a   : > { %v1237_v39 = vpop.f32.mrf.mxu1 }
 0x18b   : > { %9538 = vst [vmem:[#allocation46_spill] sm:$0xff] %v6810_v28  ;;  %v6815_v45 = vadd.f32 %v1237_v39, %v932_v33  ;;  %v6817_v46 = vpop.f32.mrf.mxu0 }
 0x18c   : > { %9541 = vst [vmem:[#allocation49_spill] sm:$0xff] %v6817_v46  ;;  %v6819_v40 = vpop.f32.mrf.mxu1 }
 0x18d   : > { %9540 = vst [vmem:[#allocation48_spill] sm:$0xff] %v6815_v45  ;;  %9542 = vst [vmem:[#allocation50_spill] sm:$0xff] %v6819_v40  ;;  %v938_v36 = vpop.f32.mrf.mxu0  ;;  %5176 = vmatmul.mubr.msk.bf16.gmra.mxu0 %vm594_vm1, %v6794_v44  ;;  %v6092_v44 = vld [vmem:[%s6236_s26 + $0x20] sm:$0xff]  }
 0x18e   : > { %v1243_v35 = vpop.f32.mrf.mxu1  ;;  %5210 = vmatmul.mubr.msk.bf16.gmra.mxu1 %vm594_vm1, %v6813_v43  ;;  %2133 = vmatprep.mubr.bf16.mxu0 %v9352_v3 }
 0x18f   : > { %v6826_v42 = vadd.f32 %v1243_v35, %v938_v36  ;;  %v940_v16 = vpop.f32.mrf.mxu0  ;;  %v9548_v35 = vmov 0  }
 0x190   : > { %v1245_v39 = vpop.f32.mrf.mxu1 }
 0x191   : > { %9543 = vst [vmem:[#allocation51_spill] sm:$0xff] %v6826_v42  ;;  %v6828_v41 = vadd.f32 %v1245_v39, %v940_v16  ;;  %v942_v33 = vpop.f32.mrf.mxu0 }
 0x192   : > { %v1247_v46 = vpop.f32.mrf.mxu1 }
 0x193   : > { %9544 = vst [vmem:[#allocation52_spill] sm:$0xff] %v6828_v41  ;;  %v6830_v40 = vadd.f32 %v1247_v46, %v942_v33  ;;  %v6832_v45 = vpop.f32.mrf.mxu0 }
 0x194   : > { %9546 = vst [vmem:[#allocation54_spill] sm:$0xff] %v6832_v45  ;;  %v6834_v28 = vpop.f32.mrf.mxu1 }
 0x195   : > { %9545 = vst [vmem:[#allocation53_spill] sm:$0xff] %v6830_v40  ;;  %9547 = vst [vmem:[#allocation55_spill] sm:$0xff] %v6834_v28  ;;  %v1323_v37 = vpop.f32.mrf.mxu0  ;;  %5221 = vmatmul.mubr.msk.bf16.vlgmr.msra.gmra.mxu0 %vm594_vm1, %v6092_v44 }
 0x196   : > { %v1562_v3 = vadd.f32 %v1323_v37, %v6490_v53  ;;  %v1729_v36 = vpop.f32.mrf.mxu1  ;;  %2143 = vmatprep.mubr.bf16.mxu0 %v9548_v35 }
 0x197   : > { %v1325_v16 = vpop.f32.mrf.mxu0 }
 0x198   : > { %v1563_v39 = vadd.f32 %v1325_v16, %v6494_v56  ;;  %v6841_v41 = vadd.f32 %v1729_v36, %v1562_v3  ;;  %v1731_v46 = vpop.f32.mrf.mxu1 }
 0x199   : > { %v1327_v33 = vpop.f32.mrf.mxu0 }
 0x19a   : > { %v1564_v45 = vadd.f32 %v1327_v33, %v6496_v59  ;;  %v6844_v28 = vadd.f32 %v1731_v46, %v1563_v39  ;;  %v1733_v40 = vpop.f32.mrf.mxu1  ;;  %v6094_v33 = vld [vmem:[%s6236_s26 + $0x30] sm:$0xff]  }
 0x19b   : > { %v1329_v42 = vpop.f32.mrf.mxu0 }
 0x19c   : > { %v6847_v44 = vadd.f32 %v1329_v42, %v6499_v62  ;;  %v6849_v53 = vadd.f32 %v1733_v40, %v1564_v45  ;;  %v6851_v37 = vpop.f32.mrf.mxu1 }
 0x19d   : > { %9550 = vst [vmem:[#allocation57_spill] sm:$0xff] %v6851_v37  ;;  %v1333_v43 = vpop.f32.mrf.mxu0  ;;  %5222 = vmatmul.mubr.msk.bf16.gmra.mxu0 %vm594_vm1, %v6093_v38 }
 0x19e   : > { %9549 = vst [vmem:[#allocation56_spill] sm:$0xff] %v6847_v44  ;;  %v1566_v3 = vadd.f32 %v1333_v43, %v6506_v1  ;;  %v1739_v56 = vpop.f32.mrf.mxu1  ;;  %2153 = vmatprep.mubr.bf16.mxu0 %v9548_v35 }
 0x19f   : > { %v1335_v59 = vpop.f32.mrf.mxu0 }
 0x1a0   : > { %v1567_v36 = vadd.f32 %v1335_v59, %v6509_v5  ;;  %v6858_v16 = vadd.f32 %v1739_v56, %v1566_v3  ;;  %v1741_v62 = vpop.f32.mrf.mxu1 }
 0x1a1   : > { %v1337_v40 = vpop.f32.mrf.mxu0 }
 0x1a2   : > { %v1568_v45 = vadd.f32 %v1337_v40, %v6511_v8  ;;  %v6861_v42 = vadd.f32 %v1741_v62, %v1567_v36  ;;  %v1743_v39 = vpop.f32.mrf.mxu1 }
 0x1a3   : > { %v1339_v46 = vpop.f32.mrf.mxu0 }
 0x1a4   : > { %v6864_v38 = vadd.f32 %v1339_v46, %v6513_v11  ;;  %v6866_v1 = vadd.f32 %v1743_v39, %v1568_v45  ;;  %v6874_v3 = vpop.f32.mrf.mxu1  ;;  %v6095_v45 = vld [vmem:[%s6236_s26 + $0x38] sm:$0xff]  }
 0x1a5   : > { %v1343_v43 = vpop.f32.mrf.mxu0  ;;  %5223 = vmatmul.mubr.msk.bf16.gmra.mxu0 %vm594_vm1, %v6094_v33  ;;  %9552 = vst [vmem:[#allocation59_spill] sm:$0xff] %v6874_v3 }
 0x1a6   : > { %9551 = vst [vmem:[#allocation58_spill] sm:$0xff] %v6864_v38  ;;  %v6871_v5 = vadd.f32 %v1343_v43, %v6520_v14  ;;  %2163 = vmatprep.mubr.bf16.mxu0 %v9548_v35  ;;  %v6882_v62 = vpop.f32.mrf.mxu1 }
 0x1a7   : > { %v1345_v8 = vpop.f32.mrf.mxu0 }
 0x1a8   : > { %v6877_v56 = vadd.f32 %v1345_v8, %v6523_v17  ;;  %v6893_v46 = vpop.f32.mrf.mxu1 }
 0x1a9   : > { %v1347_v11 = vpop.f32.mrf.mxu0 }
 0x1aa   : > { %v6880_v59 = vadd.f32 %v1347_v11, %v6525_v25  ;;  %v6901_v8 = vpop.f32.mrf.mxu1 }
 0x1ab   : > { %v1349_v36 = vpop.f32.mrf.mxu0 }
 0x1ac   : > { %v6885_v40 = vadd.f32 %v1349_v36, %v6527_v27  ;;  %v6096_v36 = vld [vmem:[%s6236_s26 + $0x40] sm:$0xff]  }
 0x1ad   : > { %v1353_v14 = vpop.f32.mrf.mxu0  ;;  %5224 = vmatmul.mubr.msk.bf16.gmra.mxu0 %vm594_vm1, %v6095_v45  ;;  %v6912_v45 = vpop.f32.mrf.mxu1 }
 0x1ae   : > { %v6890_v39 = vadd.f32 %v1353_v14, %v6534_v31  ;;  %2173 = vmatprep.mubr.bf16.mxu0 %v9548_v35 }
 0x1af   : > { %v1355_v17 = vpop.f32.mrf.mxu0 }
 0x1b0   : > { %v6896_v25 = vadd.f32 %v1355_v17, %v6537_v49 }
 0x1b1   : > { %v1357_v43 = vpop.f32.mrf.mxu0 }
 0x1b2   : > { %v6899_v33 = vadd.f32 %v1357_v43, %v6539_v52 }
 0x1b3   : > { %v1359_v27 = vpop.f32.mrf.mxu0 }
 0x1b4   : > { %v6904_v11 = vadd.f32 %v1359_v27, %v6541_v55  ;;  %v6920_v27 = vpop.f32.mrf.mxu1 }
 0x1b5   : > { %v1363_v31 = vpop.f32.mrf.mxu0  ;;  %5225 = vmatmul.mubr.msk.bf16.gmra.mxu0 %vm594_vm1, %v6096_v36 }
 0x1b6   : > { %v6909_v14 = vadd.f32 %v1363_v31, %v6548_v60  ;;  %2183 = vmatprep.mubr.bf16.mxu0 %v9548_v35  ;;  %v6097_v31 = vld [vmem:[%s6236_s26 + $0x48] sm:$0xff]  }
 0x1b7   : > { %v1365_v49 = vpop.f32.mrf.mxu0 }
 0x1b8   : > { %v6915_v52 = vadd.f32 %v1365_v49, %v6551_v0  ;;  %v6931_v49 = vpop.f32.mrf.mxu1 }
 0x1b9   : > { %v1367_v17 = vpop.f32.mrf.mxu0 }
 0x1ba   : > { %v6918_v43 = vadd.f32 %v1367_v17, %v6553_v6 }
 0x1bb   : > { %v1369_v55 = vpop.f32.mrf.mxu0 }
 0x1bc   : > { %v6923_v36 = vadd.f32 %v1369_v55, %v6555_v9  ;;  %v6939_v55 = vpop.f32.mrf.mxu1 }
 0x1bd   : > { %v1373_v60 = vpop.f32.mrf.mxu0  ;;  %5226 = vmatmul.mubr.msk.bf16.gmra.mxu0 %vm594_vm1, %v6097_v31 }
 0x1be   : > { %v6928_v3 = vadd.f32 %v1373_v60, %v6562_v13  ;;  %2193 = vmatprep.mubr.bf16.mxu0 %v9548_v35  ;;  %v6098_v60 = vld [vmem:[%s6236_s26 + $0x50] sm:$0xff]  }
 0x1bf   : > { %v1375_v0 = vpop.f32.mrf.mxu0 }
 0x1c0   : > { %v6934_v6 = vadd.f32 %v1375_v0, %v6565_v18  ;;  %v6950_v0 = vpop.f32.mrf.mxu1 }
 0x1c1   : > { %v1377_v17 = vpop.f32.mrf.mxu0 }
 0x1c2   : > { %v6937_v38 = vadd.f32 %v1377_v17, %v6567_v20 }
 0x1c3   : > { %v1379_v9 = vpop.f32.mrf.mxu0 }
 0x1c4   : > { %v6942_v31 = vadd.f32 %v1379_v9, %v6569_v30  ;;  %v6958_v9 = vpop.f32.mrf.mxu1 }
 0x1c5   : > { %v1383_v13 = vpop.f32.mrf.mxu0  ;;  %5227 = vmatmul.mubr.msk.bf16.gmra.mxu0 %vm594_vm1, %v6098_v60 }
 0x1c6   : > { %v6947_v37 = vadd.f32 %v1383_v13, %v6576_v50  ;;  %2203 = vmatprep.mubr.bf16.mxu0 %v9548_v35  ;;  %v6099_v13 = vld [vmem:[%s6236_s26 + $0x58] sm:$0xff]  }
 0x1c7   : > { %v1385_v18 = vpop.f32.mrf.mxu0 }
 0x1c8   : > { %9553 = vst [vmem:[#allocation60_spill] sm:$0xff] %v6947_v37  ;;  %v6953_v20 = vadd.f32 %v1385_v18, %v6579_v21  ;;  %v6969_v18 = vpop.f32.mrf.mxu1 }
 0x1c9   : > { %v1387_v17 = vpop.f32.mrf.mxu0 }
 0x1ca   : > { %v6956_v44 = vadd.f32 %v1387_v17, %v6581_v61 }
 0x1cb   : > { %v1389_v30 = vpop.f32.mrf.mxu0 }
 0x1cc   : > { %9554 = vst [vmem:[#allocation61_spill] sm:$0xff] %v6956_v44  ;;  %v6961_v60 = vadd.f32 %v1389_v30, %v6583_v2  ;;  %v6977_v30 = vpop.f32.mrf.mxu1 }
 0x1cd   : > { %v1393_v50 = vpop.f32.mrf.mxu0  ;;  %5228 = vmatmul.mubr.msk.bf16.gmra.mxu0 %vm594_vm1, %v6099_v13 }
 0x1ce   : > { %9555 = vst [vmem:[#allocation62_spill] sm:$0xff] %v6961_v60  ;;  %v6966_v37 = vadd.f32 %v1393_v50, %v6590_v22  ;;  %2213 = vmatprep.mubr.bf16.mxu0 %v9548_v35  ;;  %v6100_v50 = vld [vmem:[%s6236_s26 + $0x60] sm:$0xff]   ;;  %v6105_v60 = vld [vmem:[%s6236_s26 + $0x88] sm:$0xff]  }
 0x1cf   : > { %v1395_v21 = vpop.f32.mrf.mxu0 }
 0x1d0   : > { %9556 = vst [vmem:[#allocation63_spill] sm:$0xff] %v6966_v37  ;;  %v6972_v61 = vadd.f32 %v1395_v21, %v6593_v15  ;;  %v6988_v21 = vpop.f32.mrf.mxu1 }
 0x1d1   : > { %v1397_v17 = vpop.f32.mrf.mxu0 }
 0x1d2   : > { %9557 = vst [vmem:[#allocation64_spill] sm:$0xff] %v6972_v61  ;;  %v6975_v44 = vadd.f32 %v1397_v17, %v6595_v26 }
 0x1d3   : > { %v1399_v2 = vpop.f32.mrf.mxu0 }
 0x1d4   : > { %9558 = vst [vmem:[#allocation65_spill] sm:$0xff] %v6975_v44  ;;  %v6980_v13 = vadd.f32 %v1399_v2, %v6597_v23  ;;  %v6996_v2 = vpop.f32.mrf.mxu1 }
 0x1d5   : > { %v1403_v22 = vpop.f32.mrf.mxu0  ;;  %5229 = vmatmul.mubr.msk.bf16.gmra.mxu0 %vm594_vm1, %v6100_v50 }
 0x1d6   : > { %9559 = vst [vmem:[#allocation66_spill] sm:$0xff] %v6980_v13  ;;  %v6985_v37 = vadd.f32 %v1403_v22, %v6604_v51  ;;  %2223 = vmatprep.mubr.bf16.mxu0 %v9548_v35  ;;  %v6101_v22 = vld [vmem:[%s6236_s26 + $0x68] sm:$0xff]  }
 0x1d7   : > { %v1405_v15 = vpop.f32.mrf.mxu0 }
 0x1d8   : > { %9560 = vst [vmem:[#allocation67_spill] sm:$0xff] %v6985_v37  ;;  %v6991_v26 = vadd.f32 %v1405_v15, %v6607_v58  ;;  %v7007_v15 = vpop.f32.mrf.mxu1 }
 0x1d9   : > { %v1407_v17 = vpop.f32.mrf.mxu0 }
 0x1da   : > { %9561 = vst [vmem:[#allocation68_spill] sm:$0xff] %v6991_v26  ;;  %v6994_v44 = vadd.f32 %v1407_v17, %v6609_v4 }
 0x1db   : > { %v1409_v23 = vpop.f32.mrf.mxu0 }
 0x1dc   : > { %9562 = vst [vmem:[#allocation69_spill] sm:$0xff] %v6994_v44  ;;  %v6999_v50 = vadd.f32 %v1409_v23, %v6611_v10  ;;  %v9566_v44 = vld [vmem:[#allocation2_spill] sm:$0xff]  ;;  %v7015_v23 = vpop.f32.mrf.mxu1 }
 0x1dd   : > { %v1413_v51 = vpop.f32.mrf.mxu0  ;;  %5230 = vmatmul.mubr.msk.bf16.gmra.mxu0 %vm594_vm1, %v6101_v22 }
 0x1de   : > { %9563 = vst [vmem:[#allocation70_spill] sm:$0xff] %v6999_v50  ;;  %v7004_v37 = vadd.f32 %v1413_v51, %v6618_v19  ;;  %2233 = vmatprep.mubr.bf16.mxu0 %v9548_v35  ;;  %v9568_v50 = vld [vmem:[#allocation3_spill] sm:$0xff]  ;;  %v6102_v51 = vld [vmem:[%s6236_s26 + $0x70] sm:$0xff]  }
 0x1df   : > { %v1415_v58 = vpop.f32.mrf.mxu0 }
 0x1e0   : > { %9564 = vst [vmem:[#allocation71_spill] sm:$0xff] %v7004_v37  ;;  %v7010_v4 = vadd.f32 %v1415_v58, %v6621_v47  ;;  %v7026_v58 = vpop.f32.mrf.mxu1 }
 0x1e1   : > { %v1417_v17 = vpop.f32.mrf.mxu0 }
 0x1e2   : > { %9565 = vst [vmem:[#allocation72_spill] sm:$0xff] %v7010_v4  ;;  %v7013_v26 = vadd.f32 %v1417_v17, %v9566_v44  ;;  %v9571_v44 = vld [vmem:[#allocation4_spill] sm:$0xff]  ;;  %v9573_v4 = vld [vmem:[#allocation5_spill] sm:$0xff] }
 0x1e3   : > { %v1419_v10 = vpop.f32.mrf.mxu0 }
 0x1e4   : > { %9567 = vst [vmem:[#allocation2_spill] sm:$0xff] %v7013_v26  ;;  %v7018_v22 = vadd.f32 %v1419_v10, %v9568_v50  ;;  %v7034_v10 = vpop.f32.mrf.mxu1 }
 0x1e5   : > { %v1423_v19 = vpop.f32.mrf.mxu0  ;;  %5231 = vmatmul.mubr.msk.bf16.gmra.mxu0 %vm594_vm1, %v6102_v51 }
 0x1e6   : > { %9569 = vst [vmem:[#allocation3_spill] sm:$0xff] %v7018_v22  ;;  %v7023_v37 = vadd.f32 %v1423_v19, %v6632_v12  ;;  %2243 = vmatprep.mubr.bf16.mxu0 %v9548_v35  ;;  %v9575_v22 = vld [vmem:[#allocation6_spill] sm:$0xff]  ;;  %v6103_v19 = vld [vmem:[%s6236_s26 + $0x78] sm:$0xff]  }
 0x1e7   : > { %v1425_v47 = vpop.f32.mrf.mxu0 }
 0x1e8   : > { %9570 = vst [vmem:[#allocation73_spill] sm:$0xff] %v7023_v37  ;;  %v7029_v17 = vadd.f32 %v1425_v47, %v9571_v44  ;;  %v7045_v44 = vpop.f32.mrf.mxu1 }
 0x1e9   : > { %v1427_v26 = vpop.f32.mrf.mxu0 }
 0x1ea   : > { %9572 = vst [vmem:[#allocation4_spill] sm:$0xff] %v7029_v17  ;;  %v7032_v13 = vadd.f32 %v1427_v26, %v9573_v4  ;;  %v9578_v26 = vld [vmem:[#allocation7_spill] sm:$0xff]  ;;  %v9580_v17 = vld [vmem:[#allocation8_spill] sm:$0xff] }
 0x1eb   : > { %v1429_v50 = vpop.f32.mrf.mxu0 }
 0x1ec   : > { %9574 = vst [vmem:[#allocation5_spill] sm:$0xff] %v7032_v13  ;;  %v7037_v51 = vadd.f32 %v1429_v50, %v9575_v22  ;;  %v7053_v50 = vpop.f32.mrf.mxu1 }
 0x1ed   : > { %v1433_v12 = vpop.f32.mrf.mxu0  ;;  %5232 = vmatmul.mubr.msk.bf16.gmra.mxu0 %vm594_vm1, %v6103_v19 }
 0x1ee   : > { %9576 = vst [vmem:[#allocation6_spill] sm:$0xff] %v7037_v51  ;;  %v7042_v37 = vadd.f32 %v1433_v12, %v6646_v32  ;;  %2253 = vmatprep.mubr.bf16.mxu0 %v9548_v35  ;;  %v9582_v51 = vld [vmem:[#allocation9_spill] sm:$0xff]  ;;  %v6104_v12 = vld [vmem:[%s6236_s26 + $0x80] sm:$0xff]  }
 0x1ef   : > { %v1435_v47 = vpop.f32.mrf.mxu0 }
 0x1f0   : > { %9577 = vst [vmem:[#allocation74_spill] sm:$0xff] %v7042_v37  ;;  %v7048_v4 = vadd.f32 %v1435_v47, %v9578_v26  ;;  %v7067_v47 = vpop.f32.mrf.mxu1  ;;  %v9585_v26 = vld [vmem:[#allocation10_spill] sm:$0xff] }
 0x1f1   : > { %v1437_v13 = vpop.f32.mrf.mxu0 }
 0x1f2   : > { %9579 = vst [vmem:[#allocation7_spill] sm:$0xff] %v7048_v4  ;;  %v7051_v61 = vadd.f32 %v1437_v13, %v9580_v17  ;;  %v6005_v13 = vld [vmem:[%s9342_s3 + $0x80] sm:$0xff]  }
 0x1f3   : > { %v1439_v22 = vpop.f32.mrf.mxu0  ;;  %3395 = vmatpush1.bf16.msra.mxu1 %v6005_v13 }
 0x1f4   : > { %9581 = vst [vmem:[#allocation8_spill] sm:$0xff] %v7051_v61  ;;  %v7056_v19 = vadd.f32 %v1439_v22, %v9582_v51  ;;  %3396 = vmatprep.subr.bf16.mxu1 %v9548_v35 }
 0x1f5   : > { %v1443_v32 = vpop.f32.mrf.mxu0  ;;  %5233 = vmatmul.mubr.msk.bf16.gmra.mxu0 %vm594_vm1, %v6104_v12  ;;  %v9587_v12 = vld [vmem:[#allocation11_spill] sm:$0xff] }
 0x1f6   : > { %9583 = vst [vmem:[#allocation9_spill] sm:$0xff] %v7056_v19  ;;  %v7061_v37 = vadd.f32 %v1443_v32, %v6660_v7  ;;  %2263 = vmatprep.mubr.bf16.mxu0 %v9548_v35  ;;  %v7076_v32 = vpop.f32.mrf.mxu1 }
 0x1f7   : > { %v1445_v17 = vpop.f32.mrf.mxu0  ;;  %9589 = vst [vmem:[#allocation76_spill] sm:$0xff] %v7076_v32 }
 0x1f8   : > { %9584 = vst [vmem:[#allocation75_spill] sm:$0xff] %v7061_v37  ;;  %v7070_v51 = vadd.f32 %v1445_v17, %v9585_v26  ;;  %v9590_v37 = vld [vmem:[#allocation12_spill] sm:$0xff]  ;;  %v7087_v26 = vpop.f32.mrf.mxu1 }
 0x1f9   : > { %v1447_v22 = vpop.f32.mrf.mxu0 }
 0x1fa   : > { %9586 = vst [vmem:[#allocation10_spill] sm:$0xff] %v7070_v51  ;;  %v7074_v19 = vadd.f32 %v1447_v22, %v9587_v12  ;;  %v9593_v22 = vld [vmem:[#allocation13_spill] sm:$0xff]  ;;  %v9595_v51 = vld [vmem:[#allocation14_spill] sm:$0xff] }
 0x1fb   : > { %v1449_v7 = vpop.f32.mrf.mxu0 }
 0x1fc   : > { %9588 = vst [vmem:[#allocation11_spill] sm:$0xff] %v7074_v19  ;;  %v7079_v61 = vadd.f32 %v1449_v7, %v9590_v37  ;;  %v7095_v7 = vpop.f32.mrf.mxu1 }
 0x1fd   : > { %v1453_v4 = vpop.f32.mrf.mxu0  ;;  %5234 = vmatmul.mubr.msk.bf16.gmra.mxu0 %vm594_vm1, %v6105_v60  ;;  %9597 = vst [vmem:[#allocation78_spill] sm:$0xff] %v7095_v7  ;;  %v9605_v7 = vld [vmem:[#allocation18_spill] sm:$0xff] }
 0x1fe   : > { %9591 = vst [vmem:[#allocation12_spill] sm:$0xff] %v7079_v61  ;;  %v7084_v17 = vadd.f32 %v1453_v4, %v6674_v57  ;;  %2273 = vmatprep.mubr.bf16.mxu0 %v9548_v35  ;;  %v9598_v61 = vld [vmem:[#allocation15_spill] sm:$0xff]  ;;  %v6106_v4 = vld [vmem:[%s6236_s26 + $0x90] sm:$0xff]  }
 0x1ff   : > { %v1455_v13 = vpop.f32.mrf.mxu0 }
 0x200   : > { %9592 = vst [vmem:[#allocation77_spill] sm:$0xff] %v7084_v17  ;;  %v7090_v12 = vadd.f32 %v1455_v13, %v9593_v22  ;;  %v7106_v22 = vpop.f32.mrf.mxu1 }
 0x201   : > { %v1457_v19 = vpop.f32.mrf.mxu0 }
 0x202   : > { %9594 = vst [vmem:[#allocation13_spill] sm:$0xff] %v7090_v12  ;;  %v7093_v32 = vadd.f32 %v1457_v19, %v9595_v51  ;;  %v9601_v19 = vld [vmem:[#allocation16_spill] sm:$0xff]  ;;  %v9603_v12 = vld [vmem:[#allocation17_spill] sm:$0xff] }
 0x203   : > { %v1459_v37 = vpop.f32.mrf.mxu0 }
 0x204   : > { %9596 = vst [vmem:[#allocation14_spill] sm:$0xff] %v7093_v32  ;;  %v7098_v60 = vadd.f32 %v1459_v37, %v9598_v61 }
 0x205   : > { %v1463_v57 = vpop.f32.mrf.mxu0  ;;  %5235 = vmatmul.mubr.msk.bf16.gmra.mxu0 %vm594_vm1, %v6106_v4 }
 0x206   : > { %9599 = vst [vmem:[#allocation15_spill] sm:$0xff] %v7098_v60  ;;  %v7103_v17 = vadd.f32 %v1463_v57, %v6688_v29  ;;  %2283 = vmatprep.mubr.bf16.mxu0 %v9548_v35  ;;  %v7114_v60 = vpop.f32.mrf.mxu1  ;;  %v6006_v29 = vld [vmem:[%s9342_s3 + $0x78] sm:$0xff]  }
 0x207   : > { %v1465_v13 = vpop.f32.mrf.mxu0  ;;  %3397 = vmatpush1.bf16.msra.mxu1 %v6006_v29 }
 0x208   : > { %9600 = vst [vmem:[#allocation79_spill] sm:$0xff] %v7103_v17  ;;  %v7109_v51 = vadd.f32 %v1465_v13, %v9601_v19  ;;  %v6107_v17 = vld [vmem:[%s6236_s26 + $0x98] sm:$0xff]   ;;  %3398 = vmatprep.subr.bf16.mxu1 %v9548_v35 }
 0x209   : > { %v1467_v32 = vpop.f32.mrf.mxu0 }
 0x20a   : > { %9602 = vst [vmem:[#allocation16_spill] sm:$0xff] %v7109_v51  ;;  %v7112_v61 = vadd.f32 %v1467_v32, %v9603_v12  ;;  %v7129_v12 = vpop.f32.mrf.mxu1 }
 0x20b   : > { %v1469_v37 = vpop.f32.mrf.mxu0  ;;  %9608 = vst [vmem:[#allocation81_spill] sm:$0xff] %v7129_v12 }
 0x20c   : > { %9604 = vst [vmem:[#allocation17_spill] sm:$0xff] %v7112_v61  ;;  %v7117_v4 = vadd.f32 %v1469_v37, %v9605_v7  ;;  %v9609_v7 = vld [vmem:[#allocation19_spill] sm:$0xff] }
 0x20d   : > { %v1473_v57 = vpop.f32.mrf.mxu0  ;;  %5236 = vmatmul.mubr.msk.bf16.gmra.mxu0 %vm594_vm1, %v6107_v17  ;;  %v7137_v17 = vpop.f32.mrf.mxu1 }
 0x20e   : > { %9606 = vst [vmem:[#allocation18_spill] sm:$0xff] %v7117_v4  ;;  %v7125_v13 = vadd.f32 %v1473_v57, %v6702_v48  ;;  %2293 = vmatprep.mubr.bf16.mxu0 %v9548_v35  ;;  %v9611_v4 = vld [vmem:[#allocation20_spill] sm:$0xff]  ;;  %9613 = vst [vmem:[#allocation82_spill] sm:$0xff] %v7137_v17  ;;  %v9614_v48 = vld [vmem:[#allocation21_spill] sm:$0xff] }
 0x20f   : > { %v1475_v32 = vpop.f32.mrf.mxu0 }
 0x210   : > { %9607 = vst [vmem:[#allocation80_spill] sm:$0xff] %v7125_v13  ;;  %v7132_v19 = vadd.f32 %v1475_v32, %v9609_v7  ;;  %v6108_v13 = vld [vmem:[%s6236_s26 + $0xa0] sm:$0xff]   ;;  %v7148_v7 = vpop.f32.mrf.mxu1 }
 0x211   : > { %v1477_v37 = vpop.f32.mrf.mxu0 }
 0x212   : > { %9610 = vst [vmem:[#allocation19_spill] sm:$0xff] %v7132_v19  ;;  %v7135_v61 = vadd.f32 %v1477_v37, %v9611_v4  ;;  %v9617_v4 = vld [vmem:[#allocation22_spill] sm:$0xff]  ;;  %v9619_v19 = vld [vmem:[#allocation23_spill] sm:$0xff] }
 0x213   : > { %v1479_v51 = vpop.f32.mrf.mxu0 }
 0x214   : > { %9612 = vst [vmem:[#allocation20_spill] sm:$0xff] %v7135_v61  ;;  %v7140_v57 = vadd.f32 %v1479_v51, %v9614_v48  ;;  %v7156_v48 = vpop.f32.mrf.mxu1 }
 0x215   : > { %v1483_v29 = vpop.f32.mrf.mxu0  ;;  %5237 = vmatmul.mubr.msk.bf16.gmra.mxu0 %vm594_vm1, %v6108_v13 }
 0x216   : > { %9615 = vst [vmem:[#allocation21_spill] sm:$0xff] %v7140_v57  ;;  %v7145_v12 = vadd.f32 %v1483_v29, %v6716_v54  ;;  %2303 = vmatprep.mubr.bf16.mxu0 %v9548_v35  ;;  %v9621_v57 = vld [vmem:[#allocation24_spill] sm:$0xff]  ;;  %v6109_v29 = vld [vmem:[%s6236_s26 + $0xa8] sm:$0xff]  }
 0x217   : > { %v1485_v32 = vpop.f32.mrf.mxu0 }
 0x218   : > { %9616 = vst [vmem:[#allocation83_spill] sm:$0xff] %v7145_v12  ;;  %v7151_v37 = vadd.f32 %v1485_v32, %v9617_v4  ;;  %v7167_v4 = vpop.f32.mrf.mxu1 }
 0x219   : > { %v1487_v61 = vpop.f32.mrf.mxu0  ;;  %9624 = vst [vmem:[#allocation85_spill] sm:$0xff] %v7167_v4 }
 0x21a   : > { %9618 = vst [vmem:[#allocation22_spill] sm:$0xff] %v7151_v37  ;;  %v7154_v17 = vadd.f32 %v1487_v61, %v9619_v19  ;;  %v9625_v61 = vld [vmem:[#allocation25_spill] sm:$0xff] }
 0x21b   : > { %v1489_v51 = vpop.f32.mrf.mxu0 }
 0x21c   : > { %9620 = vst [vmem:[#allocation23_spill] sm:$0xff] %v7154_v17  ;;  %v7159_v13 = vadd.f32 %v1489_v51, %v9621_v57  ;;  %v6007_v57 = vld [vmem:[%s9342_s3 + $0x70] sm:$0xff]  }
 0x21d   : > { %v1493_v54 = vpop.f32.mrf.mxu0  ;;  %5238 = vmatmul.mubr.msk.bf16.gmra.mxu0 %vm594_vm1, %v6109_v29  ;;  %3399 = vmatpush1.bf16.msra.mxu1 %v6007_v57 }
 0x21e   : > { %9622 = vst [vmem:[#allocation24_spill] sm:$0xff] %v7159_v13  ;;  %v7164_v12 = vadd.f32 %v1493_v54, %v6730_v24  ;;  %2313 = vmatprep.mubr.bf16.mxu0 %v9548_v35  ;;  %v9627_v13 = vld [vmem:[#allocation26_spill] sm:$0xff]  ;;  %3400 = vmatprep.subr.bf16.mxu1 %v9548_v35  ;;  %v7179_v24 = vpop.f32.mrf.mxu1  ;;  %v9630_v54 = vld [vmem:[#allocation27_spill] sm:$0xff] }
 0x21f   : > { %v1495_v32 = vpop.f32.mrf.mxu0  ;;  %9629 = vst [vmem:[#allocation86_spill] sm:$0xff] %v7179_v24  ;;  %v9636_v24 = vld [vmem:[#allocation29_spill] sm:$0xff] }
 0x220   : > { %9623 = vst [vmem:[#allocation84_spill] sm:$0xff] %v7164_v12  ;;  %v7170_v19 = vadd.f32 %v1495_v32, %v9625_v61  ;;  %v6110_v61 = vld [vmem:[%s6236_s26 + $0xb0] sm:$0xff]   ;;  %v7190_v57 = vpop.f32.mrf.mxu1 }
 0x221   : > { %v1497_v51 = vpop.f32.mrf.mxu0  ;;  %9633 = vst [vmem:[#allocation88_spill] sm:$0xff] %v7190_v57 }
 0x222   : > { %9626 = vst [vmem:[#allocation25_spill] sm:$0xff] %v7170_v19  ;;  %v7176_v17 = vadd.f32 %v1497_v51, %v9627_v13  ;;  %v9634_v51 = vld [vmem:[#allocation28_spill] sm:$0xff] }
 0x223   : > { %v1499_v29 = vpop.f32.mrf.mxu0 }
 0x224   : > { %9628 = vst [vmem:[#allocation26_spill] sm:$0xff] %v7176_v17  ;;  %v7182_v12 = vadd.f32 %v1499_v29, %v9630_v54  ;;  %v7198_v54 = vpop.f32.mrf.mxu1 }
 0x225   : > { %v1503_v32 = vpop.f32.mrf.mxu0  ;;  %5239 = vmatmul.mubr.msk.bf16.gmra.mxu0 %vm594_vm1, %v6110_v61  ;;  %9638 = vst [vmem:[#allocation89_spill] sm:$0xff] %v7198_v54 }
 0x226   : > { %9631 = vst [vmem:[#allocation27_spill] sm:$0xff] %v7182_v12  ;;  %v7187_v19 = vadd.f32 %v1503_v32, %v6744_v63  ;;  %2323 = vmatprep.mubr.bf16.mxu0 %v9548_v35  ;;  %v9639_v12 = vld [vmem:[#allocation30_spill] sm:$0xff]  ;;  %v6111_v32 = vld [vmem:[%s6236_s26 + $0xb8] sm:$0xff]  }
 0x227   : > { %v1505_v13 = vpop.f32.mrf.mxu0 }
 0x228   : > { %9632 = vst [vmem:[#allocation87_spill] sm:$0xff] %v7187_v19  ;;  %v7193_v17 = vadd.f32 %v1505_v13, %v9634_v51  ;;  %v7209_v51 = vpop.f32.mrf.mxu1 }
 0x229   : > { %v1507_v37 = vpop.f32.mrf.mxu0 }
 0x22a   : > { %9635 = vst [vmem:[#allocation28_spill] sm:$0xff] %v7193_v17  ;;  %v7196_v4 = vadd.f32 %v1507_v37, %v9636_v24  ;;  %v9642_v37 = vld [vmem:[#allocation31_spill] sm:$0xff]  ;;  %v9644_v17 = vld [vmem:[#allocation32_spill] sm:$0xff] }
 0x22b   : > { %v1509_v29 = vpop.f32.mrf.mxu0 }
 0x22c   : > { %9637 = vst [vmem:[#allocation29_spill] sm:$0xff] %v7196_v4  ;;  %v7201_v61 = vadd.f32 %v1509_v29, %v9639_v12  ;;  %v7217_v29 = vpop.f32.mrf.mxu1 }
 0x22d   : > { %v1513_v63 = vpop.f32.mrf.mxu0  ;;  %5240 = vmatmul.mubr.msk.bf16.gmra.mxu0 %vm594_vm1, %v6111_v32  ;;  %9646 = vst [vmem:[#allocation91_spill] sm:$0xff] %v7217_v29 }
 0x22e   : > { %9640 = vst [vmem:[#allocation30_spill] sm:$0xff] %v7201_v61  ;;  %v7206_v19 = vadd.f32 %v1513_v63, %v6758_v34  ;;  %2333 = vmatprep.mubr.bf16.mxu0 %v9548_v35  ;;  %v9647_v61 = vld [vmem:[#allocation33_spill] sm:$0xff]  ;;  %v6112_v63 = vld [vmem:[%s6236_s26 + $0xc0] sm:$0xff]  }
 0x22f   : > { %v1515_v13 = vpop.f32.mrf.mxu0 }
 0x230   : > { %9641 = vst [vmem:[#allocation90_spill] sm:$0xff] %v7206_v19  ;;  %v7212_v24 = vadd.f32 %v1515_v13, %v9642_v37  ;;  %v9649_v19 = vld [vmem:[#allocation34_spill] sm:$0xff]  ;;  %v7231_v13 = vpop.f32.mrf.mxu1  ;;  %v9652_v37 = vld [vmem:[#allocation35_spill] sm:$0xff] }
 0x231   : > { %v1517_v4 = vpop.f32.mrf.mxu0  ;;  %9651 = vst [vmem:[#allocation92_spill] sm:$0xff] %v7231_v13 }
 0x232   : > { %9643 = vst [vmem:[#allocation31_spill] sm:$0xff] %v7212_v24  ;;  %v7215_v54 = vadd.f32 %v1517_v4, %v9644_v17  ;;  %v6008_v17 = vld [vmem:[%s9342_s3 + $0x68] sm:$0xff]  }
 0x233   : > { %v1519_v12 = vpop.f32.mrf.mxu0  ;;  %3401 = vmatpush1.bf16.msra.mxu1 %v6008_v17  ;;  %v9659_v24 = vld [vmem:[#allocation39_spill] sm:$0xff] }
 0x234   : > { %9645 = vst [vmem:[#allocation32_spill] sm:$0xff] %v7215_v54  ;;  %v7220_v32 = vadd.f32 %v1519_v12, %v9647_v61  ;;  %3402 = vmatprep.subr.bf16.mxu1 %v9548_v35  ;;  %v9654_v12 = vld [vmem:[#allocation36_spill] sm:$0xff] }
 0x235   : > { %v1523_v34 = vpop.f32.mrf.mxu0  ;;  %5241 = vmatmul.mubr.msk.bf16.gmra.mxu0 %vm594_vm1, %v6112_v63 }
 0x236   : > { %9648 = vst [vmem:[#allocation33_spill] sm:$0xff] %v7220_v32  ;;  %v7225_v57 = vadd.f32 %v1523_v34, %v9649_v19  ;;  %2343 = vmatprep.mubr.bf16.mxu0 %v9548_v35  ;;  %v7242_v34 = vpop.f32.mrf.mxu1  ;;  %v9658_v32 = vld [vmem:[#allocation41_spill] sm:$0xff] }
 0x237   : > { %v1525_v4 = vpop.f32.mrf.mxu0  ;;  %9657 = vst [vmem:[#allocation94_spill] sm:$0xff] %v7242_v34 }
 0x238   : > { %9650 = vst [vmem:[#allocation34_spill] sm:$0xff] %v7225_v57  ;;  %v7234_v54 = vadd.f32 %v1525_v4, %v9652_v37  ;;  %v7250_v4 = vpop.f32.mrf.mxu1  ;;  %v9662_v37 = vld [vmem:[#allocation40_spill] sm:$0xff] }
 0x239   : > { %v1527_v61 = vpop.f32.mrf.mxu0  ;;  %9661 = vst [vmem:[#allocation39_spill] sm:$0xff] %v7250_v4 }
 0x23a   : > { %9653 = vst [vmem:[#allocation35_spill] sm:$0xff] %v7234_v54  ;;  %v7238_v63 = vadd.f32 %v1527_v61, %v9654_v12  ;;  %v7260_v34 = vpop.f32.mrf.mxu1 }
 0x23b   : > { %v7240_v19 = vpop.f32.mrf.mxu0  ;;  %9667 = vst [vmem:[#allocation96_spill] sm:$0xff] %v7260_v34 }
 0x23c   : > { %9655 = vst [vmem:[#allocation36_spill] sm:$0xff] %v7238_v63  ;;  %9656 = vst [vmem:[#allocation93_spill] sm:$0xff] %v7240_v19  ;;  %v9664_v63 = vld [vmem:[#allocation42_spill] sm:$0xff] }
 0x23d   : > { %v1533_v57 = vpop.f32.mrf.mxu0  ;;  %5242 = vmatmul.mubr.msk.bf16.gmra.mxu0 %vm594_vm1, %v9658_v32 }
 0x23e   : > { %v7247_v13 = vadd.f32 %v1533_v57, %v9659_v24  ;;  %2353 = vmatprep.mubr.bf16.mxu0 %v9548_v35  ;;  %v9668_v57 = vld [vmem:[#allocation47_spill] sm:$0xff]  ;;  %v9669_v24 = vld [vmem:[#allocation45_spill] sm:$0xff] }
 0x23f   : > { %v1535_v17 = vpop.f32.mrf.mxu0 }
 0x240   : > { %9660 = vst [vmem:[#allocation41_spill] sm:$0xff] %v7247_v13  ;;  %v7253_v61 = vadd.f32 %v1535_v17, %v9662_v37  ;;  %v7268_v17 = vpop.f32.mrf.mxu1  ;;  %v9672_v37 = vld [vmem:[#allocation46_spill] sm:$0xff] }
 0x241   : > { %v1537_v12 = vpop.f32.mrf.mxu0  ;;  %9671 = vst [vmem:[#allocation45_spill] sm:$0xff] %v7268_v17 }
 0x242   : > { %9663 = vst [vmem:[#allocation40_spill] sm:$0xff] %v7253_v61  ;;  %v7256_v19 = vadd.f32 %v1537_v12, %v9664_v63  ;;  %v6004_v12 = vld [vmem:[%s6236_s26 + $0xd8] sm:$0xff]   ;;  %v7279_v29 = vpop.f32.mrf.mxu1 }
 0x243   : > { %v7258_v54 = vpop.f32.mrf.mxu0  ;;  %9677 = vst [vmem:[#allocation98_spill] sm:$0xff] %v7279_v29 }
 0x244   : > { %9665 = vst [vmem:[#allocation42_spill] sm:$0xff] %v7256_v19  ;;  %9666 = vst [vmem:[#allocation95_spill] sm:$0xff] %v7258_v54  ;;  %v9674_v19 = vld [vmem:[#allocation48_spill] sm:$0xff] }
 0x245   : > { %v1543_v32 = vpop.f32.mrf.mxu0  ;;  %5243 = vmatmul.mubr.msk.bf16.gmra.mxu0 %vm594_vm1, %v9668_v57 }
 0x246   : > { %v7265_v13 = vadd.f32 %v1543_v32, %v9669_v24  ;;  %2363 = vmatprep.mubr.bf16.mxu0 %v9548_v35  ;;  %v6009_v32 = vld [vmem:[%s9342_s3 + $0x60] sm:$0xff]   ;;  %v9678_v24 = vld [vmem:[#allocation51_spill] sm:$0xff] }
 0x247   : > { %v1545_v4 = vpop.f32.mrf.mxu0  ;;  %3403 = vmatpush1.bf16.msra.mxu1 %v6009_v32 }
 0x248   : > { %9670 = vst [vmem:[#allocation47_spill] sm:$0xff] %v7265_v13  ;;  %v7271_v61 = vadd.f32 %v1545_v4, %v9672_v37  ;;  %3404 = vmatprep.subr.bf16.mxu1 %v9548_v35  ;;  %v9680_v37 = vld [vmem:[#allocation52_spill] sm:$0xff] }
 0x249   : > { %v1547_v63 = vpop.f32.mrf.mxu0 }
 0x24a   : > { %9673 = vst [vmem:[#allocation46_spill] sm:$0xff] %v7271_v61  ;;  %v7275_v54 = vadd.f32 %v1547_v63, %v9674_v19  ;;  %v7289_v19 = vpop.f32.mrf.mxu1  ;;  %v9682_v61 = vld [vmem:[#allocation53_spill] sm:$0xff] }
 0x24b   : > { %v7277_v34 = vpop.f32.mrf.mxu0 }
 0x24c   : > { %9675 = vst [vmem:[#allocation48_spill] sm:$0xff] %v7275_v54  ;;  %9676 = vst [vmem:[#allocation97_spill] sm:$0xff] %v7277_v34  ;;  %v7299_v17 = vpop.f32.mrf.mxu1 }
 0x24d   : > { %v1553_v57 = vpop.f32.mrf.mxu0  ;;  %5244 = vmatmul.mubr.msk.bf16.gmra.mxu0 %vm594_vm1, %v6004_v12 }
 0x24e   : > { %v7286_v13 = vadd.f32 %v1553_v57, %v9678_v24  ;;  %v7304_v24 = vpop.f32.mrf.mxu1 }
 0x24f   : > { %v1555_v4 = vpop.f32.mrf.mxu0 }
 0x250   : > { %9679 = vst [vmem:[#allocation51_spill] sm:$0xff] %v7286_v13  ;;  %v7292_v63 = vadd.f32 %v1555_v4, %v9680_v37  ;;  %v2472_v37 = vlaneseq }
 0x251   : > { %v1557_v54 = vpop.f32.mrf.mxu0 }
 0x252   : > { %9681 = vst [vmem:[#allocation52_spill] sm:$0xff] %v7292_v63  ;;  %v7295_v34 = vadd.f32 %v1557_v54, %v9682_v61  ;;  %v7314_v61 = vpop.f32.mrf.mxu1 }
 0x253   : > { %v7297_v29 = vpop.f32.mrf.mxu0 }
 0x254   : > { %9683 = vst [vmem:[#allocation53_spill] sm:$0xff] %v7295_v34  ;;  %9684 = vst [vmem:[#allocation99_spill] sm:$0xff] %v7297_v29  ;;  %v2473_v29 = vshrl.u32 %v2472_v37, 7 }
 0x255   : > { %v2135_v12 = vpop.f32.mrf.mxu0 }
 0x256   : > { %v7302_v57 = vadd.f32 %v2135_v12, %v6841_v41 }
 0x257   : > { %v2137_v32 = vpop.f32.mrf.mxu0 }
 0x258   : > { %9685 = vst [vmem:[#allocation100_spill] sm:$0xff] %v7302_v57  ;;  %v7307_v13 = vadd.f32 %v2137_v32, %v6844_v28  ;;  %v7319_v57 = vpop.f32.mrf.mxu1 }
 0x259   : > { %v2139_v4 = vpop.f32.mrf.mxu0 }
 0x25a   : > { %9686 = vst [vmem:[#allocation101_spill] sm:$0xff] %v7307_v13  ;;  %v7310_v63 = vadd.f32 %v2139_v4, %v6849_v53  ;;  %v6010_v53 = vld [vmem:[%s9342_s3 + $0x58] sm:$0xff]   ;;  %v2474_v4 = vsub.s32 0, %v2473_v29  ;;  %v7338_v37 = vpop.f32.mrf.mxu1  ;;  %v1979_v13 = vadd.f32 %v6912_v45, %v6885_v40  ;;  %v6011_v40 = vld [vmem:[%s9342_s3 + $0x50] sm:$0xff]  }
 0x25b   : > { %v7312_v54 = vpop.f32.mrf.mxu0  ;;  %3405 = vmatpush1.bf16.msra.mxu1 %v6010_v53 }
 0x25c   : > { %9687 = vst [vmem:[#allocation102_spill] sm:$0xff] %v7310_v63  ;;  %9688 = vst [vmem:[#allocation103_spill] sm:$0xff] %v7312_v54  ;;  %3406 = vmatprep.subr.bf16.mxu1 %v9548_v35 }
 0x25d   : > { %v2145_v34 = vpop.f32.mrf.mxu0 }
 0x25e   : > { %v7317_v41 = vadd.f32 %v2145_v34, %v6858_v16  ;;  %v2470_v16 = vld [vmem:[%s9341_s2] sm:$0x3] }
 0x25f   : > { %v2147_v12 = vpop.f32.mrf.mxu0  ;;  %3407 = vmatpush1.bf16.msra.mxu1 %v6011_v40  ;;  %v1984_v40 = vadd.f32 %v6958_v9, %v6909_v14  ;;  %v6014_v14 = vld [vmem:[%s9342_s3 + $0x110] sm:$0xff]   ;;  %v1985_v9 = vadd.f32 %v6969_v18, %v6915_v52 }
 0x260   : > { %9689 = vst [vmem:[#allocation104_spill] sm:$0xff] %v7317_v41  ;;  %v7322_v28 = vadd.f32 %v2147_v12, %v6861_v42  ;;  %v1976_v42 = vadd.f32 %v6882_v62, %v6871_v5  ;;  %v2478_v12 = vsub.s32 1, %v2473_v29  ;;  %3408 = vmatprep.subr.bf16.mxu1 %v9548_v35  ;;  %3917 = vmatpush1.bf16.msra.mxu0 %v6014_v14 }
 0x261   : > { %v2149_v32 = vpop.f32.mrf.mxu0  ;;  %3918 = vmatprep.subr.bf16.mxu0 %v9548_v35 }
 0x262   : > { %9690 = vst [vmem:[#allocation105_spill] sm:$0xff] %v7322_v28  ;;  %v7328_v63 = vadd.f32 %v2149_v32, %v6866_v1  ;;  %v1977_v1 = vadd.f32 %v6893_v46, %v6877_v56  ;;  %v7342_v32 = vrot.slane %v2470_v16, %v2474_v4  ;;  %v1978_v28 = vadd.f32 %v6901_v8, %v6880_v59 }
 0x263   : > { %v7333_v34 = vpop.f32.mrf.mxu0  ;;  %v7348_v54 = vrot.slane %v2470_v16, %v2478_v12 }
 0x264   : > { %9691 = vst [vmem:[#allocation106_spill] sm:$0xff] %v7328_v63  ;;  %9692 = vst [vmem:[#allocation107_spill] sm:$0xff] %v7333_v34  ;;  %v7346_v34 = vpop.f32.mrf.mxu1 }
 0x265   : > { %v2155_v41 = vpop.f32.mrf.mxu0 }
 0x266   : > { %v2382_v53 = vadd.f32 %v2155_v41, %v1976_v42  ;;  %v1980_v41 = vadd.f32 %v6920_v27, %v6890_v39  ;;  %v7360_v8 = vpop.f32.mrf.mxu1 }
 0x267   : > { %v2157_v63 = vpop.f32.mrf.mxu0 }
 0x268   : > { %v7351_v5 = vadd.f32 %v7342_v32, %v2382_v53  ;;  %v2383_v62 = vadd.f32 %v2157_v63, %v1977_v1  ;;  %v7382_v53 = vpop.f32.mrf.mxu1 }
 0x269   : > { %v2159_v29 = vpop.f32.mrf.mxu0 }
 0x26a   : > { %v7356_v56 = vadd.f32 %v7348_v54, %v2383_v62  ;;  %v2384_v46 = vadd.f32 %v2159_v29, %v1978_v28  ;;  %v9373_v4 = vmax.f32 %v7351_v5, 0.0  ;;  %v1981_v28 = vadd.f32 %v6931_v49, %v6896_v25 }
 0x26b   : > { %v2161_v59 = vpop.f32.mrf.mxu0 }
 0x26c   : > { %v9374_v16 = vmax.f32 %v7356_v56, 0.0  ;;  %v7365_v63 = vadd.f32 %v7342_v32, %v2384_v46  ;;  %v2385_v42 = vadd.f32 %v2161_v59, %v1979_v13  ;;  %v1982_v13 = vadd.f32 %v6939_v55, %v6899_v33  ;;  %v6012_v33 = vld [vmem:[%s9342_s3 + $0x48] sm:$0xff]  }
 0x26d   : > { %v2165_v45 = vpop.f32.mrf.mxu0  ;;  %v1983_v46 = vadd.f32 %v6950_v0, %v6904_v11  ;;  %3409 = vmatpush1.bf16.msra.mxu1 %v6012_v33  ;;  %v6013_v11 = vld [vmem:[%s9342_s3 + $0x88] sm:$0x1f]   ;;  %v7409_v0 = vpop.f32.mrf.mxu1 }
 0x26e   : > { %v7373_v39 = vadd.f32 %v7348_v54, %v2385_v42  ;;  %v2386_v27 = vadd.f32 %v2165_v45, %v1980_v41  ;;  %v5667_v12 = vpack.i.bf16 %v9374_v16, %v9373_v4  ;;  %v9365_v25 = vmax.f32 %v7365_v63, 0.0  ;;  %3424 = vmatprep.subr.bf16.mxu1 %v9548_v35 }
 0x26f   : > { %v2167_v1 = vpop.f32.mrf.mxu0  ;;  %v7433_v52 = vpop.f32.mrf.mxu1 }
 0x270   : > { %v9366_v49 = vmax.f32 %v7373_v39, 0.0  ;;  %v7387_v62 = vadd.f32 %v7342_v32, %v2386_v27  ;;  %v2387_v29 = vadd.f32 %v2167_v1, %v1981_v28  ;;  %5668 = vrot.lane.b32.xlu0 %v5667_v12, %s6122_s30 }
 0x271   : > { %v2169_v55 = vpop.f32.mrf.mxu0 }
 0x272   : > { %v7396_v41 = vadd.f32 %v7348_v54, %v2387_v29  ;;  %v2388_v59 = vadd.f32 %v2169_v55, %v1982_v13  ;;  %v5672_v42 = vpack.i.bf16 %v9366_v49, %v9365_v25  ;;  %v9371_v45 = vmax.f32 %v7387_v62, 0.0 }
 0x273   : > { %v2171_v28 = vpop.f32.mrf.mxu0  ;;  %v3392_v29 = vsel %vm3390_vm2, %v6013_v11, 0 }
 0x274   : > { %v9372_v27 = vmax.f32 %v7396_v41, 0.0  ;;  %v7413_v12 = vadd.f32 %v7342_v32, %v2388_v59  ;;  %v2389_v13 = vadd.f32 %v2171_v28, %v1983_v46  ;;  %5673 = vrot.lane.b32.xlu0 %v5672_v42, %s6122_s30  ;;  %3425 = vmatpush2.bf16.msra.mxu1 %v3392_v29  ;;  %v1986_v59 = vadd.f32 %v6977_v30, %v6918_v43  ;;  %v6015_v43 = vld [vmem:[%s9342_s3 + $0x108] sm:$0xff]  }
 0x275   : > { %v2175_v1 = vpop.f32.mrf.mxu0  ;;  %3550 = vmatprep.subr.bf16.mxu1 %v9548_v35  ;;  %3919 = vmatpush1.bf16.msra.mxu0 %v6015_v43 }
 0x276   : > { %v7423_v33 = vadd.f32 %v7348_v54, %v2389_v13  ;;  %v2390_v55 = vadd.f32 %v2175_v1, %v1984_v40  ;;  %v5677_v46 = vpack.i.bf16 %v9372_v27, %v9371_v45  ;;  %v9361_v18 = vmax.f32 %v7413_v12, 0.0  ;;  %3920 = vmatprep.subr.bf16.mxu0 %v9548_v35 }
 0x277   : > { %v2177_v42 = vpop.f32.mrf.mxu0  ;;  %v1987_v13 = vadd.f32 %v6988_v21, %v6923_v36 }
 0x278   : > { %v9362_v40 = vmax.f32 %v7423_v33, 0.0  ;;  %v7438_v28 = vadd.f32 %v7342_v32, %v2390_v55  ;;  %v2391_v11 = vadd.f32 %v2177_v42, %v1985_v9  ;;  %5678 = vrot.lane.b32.xlu1 %v5677_v46, %s6122_s30  ;;  %v1988_v9 = vadd.f32 %v6996_v2, %v6928_v3  ;;  %v7456_v46 = vpop.f32.mrf.mxu1 }
 0x279   : > { %v2179_v30 = vpop.f32.mrf.mxu0  ;;  %v1989_v2 = vadd.f32 %v7007_v15, %v6934_v6 }
 0x27a   : > { %9693 = vst [vmem:[#allocation108_spill] sm:$0xff] %v7438_v28  ;;  %v7447_v14 = vadd.f32 %v7348_v54, %v2391_v11  ;;  %v2392_v1 = vadd.f32 %v2179_v30, %v1986_v59  ;;  %v5682_v29 = vpack.i.bf16 %v9362_v40, %v9361_v18  ;;  %v9355_v36 = vmax.f32 %v7438_v28, 0.0  ;;  %v6016_v11 = vld [vmem:[%s9342_s3 + $0x100] sm:$0xff]  }
 0x27b   : > { %v2181_v55 = vpop.f32.mrf.mxu0  ;;  %3921 = vmatpush1.bf16.msra.mxu0 %v6016_v11  ;;  %v6017_v11 = vld [vmem:[%s9342_s3 + $0xf8] sm:$0xff]  }
 0x27c   : > { %v9356_v21 = vmax.f32 %v7447_v14, 0.0  ;;  %v7461_v59 = vadd.f32 %v7342_v32, %v2392_v1  ;;  %v2393_v42 = vadd.f32 %v2181_v55, %v1987_v13  ;;  %5683 = vrot.lane.b32.xlu1 %v5682_v29, %s6122_s30  ;;  %v1990_v13 = vadd.f32 %v7015_v23, %v6937_v38  ;;  %3922 = vmatprep.subr.bf16.mxu0 %v9548_v35  ;;  %v7479_v55 = vpop.f32.mrf.mxu1 }
 0x27d   : > { %v2185_v3 = vpop.f32.mrf.mxu0  ;;  %v1991_v23 = vadd.f32 %v7026_v58, %v6942_v31 }
 0x27e   : > { %9694 = vst [vmem:[#allocation109_spill] sm:$0xff] %v7461_v59  ;;  %v7470_v43 = vadd.f32 %v7348_v54, %v2393_v42  ;;  %v2394_v30 = vadd.f32 %v2185_v3, %v1988_v9  ;;  %v5687_v1 = vpack.i.bf16 %v9356_v21, %v9355_v36  ;;  %v9357_v6 = vmax.f32 %v7461_v59, 0.0  ;;  %v7502_v21 = vpop.f32.mrf.mxu1 }
 0x27f   : > { %v2187_v29 = vpop.f32.mrf.mxu0  ;;  %3923 = vmatpush1.bf16.msra.mxu0 %v6017_v11  ;;  %v6018_v11 = vld [vmem:[%s9342_s3 + $0xf0] sm:$0xff]  }
 0x280   : > { %v9358_v15 = vmax.f32 %v7470_v43, 0.0  ;;  %v7484_v9 = vadd.f32 %v7342_v32, %v2394_v30  ;;  %v2395_v42 = vadd.f32 %v2187_v29, %v1989_v2  ;;  %5688 = vrot.lane.b32.xlu0 %v5687_v1, %s6122_s30  ;;  %v9695_v2 = vld [vmem:[#allocation60_spill] sm:$0xff]  ;;  %3924 = vmatprep.subr.bf16.mxu0 %v9548_v35 }
 0x281   : > { %v2189_v38 = vpop.f32.mrf.mxu0  ;;  %v1992_v1 = vadd.f32 %v7034_v10, %v9695_v2 }
 0x282   : > { %v7493_v3 = vadd.f32 %v7348_v54, %v2395_v42  ;;  %v2396_v36 = vadd.f32 %v2189_v38, %v1990_v13  ;;  %v5692_v30 = vpack.i.bf16 %v9358_v15, %v9357_v6  ;;  %v9359_v31 = vmax.f32 %v7484_v9, 0.0  ;;  %v7525_v15 = vpop.f32.mrf.mxu1 }
 0x283   : > { %v2191_v29 = vpop.f32.mrf.mxu0  ;;  %v1993_v38 = vadd.f32 %v7045_v44, %v6953_v20  ;;  %3925 = vmatpush1.bf16.msra.mxu0 %v6018_v11  ;;  %v6019_v11 = vld [vmem:[%s9342_s3 + $0xe8] sm:$0xff]  }
 0x284   : > { %v9360_v58 = vmax.f32 %v7493_v3, 0.0  ;;  %v7507_v13 = vadd.f32 %v7342_v32, %v2396_v36  ;;  %v2397_v42 = vadd.f32 %v2191_v29, %v1991_v23  ;;  %5693 = vrot.lane.b32.xlu1 %v5692_v30, %s6122_s30  ;;  %v9697_v23 = vld [vmem:[#allocation61_spill] sm:$0xff]  ;;  %3926 = vmatprep.subr.bf16.mxu0 %v9548_v35  ;;  %v7548_v40 = vpop.f32.mrf.mxu1 }
 0x285   : > { %v2195_v10 = vpop.f32.mrf.mxu0  ;;  %v1994_v30 = vadd.f32 %v7053_v50, %v9697_v23 }
 0x286   : > { %9696 = vst [vmem:[#allocation60_spill] sm:$0xff] %v7507_v13  ;;  %v7516_v2 = vadd.f32 %v7348_v54, %v2397_v42  ;;  %v2398_v6 = vadd.f32 %v2195_v10, %v1992_v1  ;;  %v5697_v36 = vpack.i.bf16 %v9360_v58, %v9359_v31  ;;  %v9363_v20 = vmax.f32 %v7507_v13, 0.0  ;;  %v9699_v10 = vld [vmem:[#allocation62_spill] sm:$0xff]  ;;  %v7571_v49 = vpop.f32.mrf.mxu1 }
 0x287   : > { %v2197_v29 = vpop.f32.mrf.mxu0  ;;  %v1995_v23 = vadd.f32 %v7067_v47, %v9699_v10  ;;  %3927 = vmatpush1.bf16.msra.mxu0 %v6019_v11  ;;  %v6020_v11 = vld [vmem:[%s9342_s3 + $0xe0] sm:$0xff]  }
 0x288   : > { %v9364_v44 = vmax.f32 %v7516_v2, 0.0  ;;  %v7530_v1 = vadd.f32 %v7342_v32, %v2398_v6  ;;  %v2399_v42 = vadd.f32 %v2197_v29, %v1993_v38  ;;  %5698 = vrot.lane.b32.xlu0 %v5697_v36, %s6122_s30  ;;  %v9701_v38 = vld [vmem:[#allocation63_spill] sm:$0xff]  ;;  %v9702_v36 = vld [vmem:[#allocation76_spill] sm:$0xff]  ;;  %3928 = vmatprep.subr.bf16.mxu0 %v9548_v35 }
 0x289   : > { %v2199_v50 = vpop.f32.mrf.mxu0  ;;  %v1996_v29 = vadd.f32 %v9702_v36, %v9701_v38  ;;  %v9704_v38 = vld [vmem:[#allocation64_spill] sm:$0xff] }
 0x28a   : > { %9698 = vst [vmem:[#allocation61_spill] sm:$0xff] %v7530_v1  ;;  %v7539_v31 = vadd.f32 %v7348_v54, %v2399_v42  ;;  %v2400_v58 = vadd.f32 %v2199_v50, %v1994_v30  ;;  %v5702_v6 = vpack.i.bf16 %v9364_v44, %v9363_v20  ;;  %v9367_v47 = vmax.f32 %v7530_v1, 0.0 }
 0x28b   : > { %v2201_v18 = vpop.f32.mrf.mxu0  ;;  %v1997_v36 = vadd.f32 %v7087_v26, %v9704_v38  ;;  %3929 = vmatpush1.bf16.msra.mxu0 %v6020_v11  ;;  %v6021_v11 = vld [vmem:[%s9342_s3 + $0xd8] sm:$0xff]  }
 0x28c   : > { %9700 = vst [vmem:[#allocation62_spill] sm:$0xff] %v7539_v31  ;;  %v9368_v42 = vmax.f32 %v7539_v31, 0.0  ;;  %v7553_v30 = vadd.f32 %v7342_v32, %v2400_v58  ;;  %v2401_v50 = vadd.f32 %v2201_v18, %v1995_v23  ;;  %5703 = vrot.lane.b32.xlu1 %v5702_v6, %s6122_s30  ;;  %v9706_v18 = vld [vmem:[#allocation65_spill] sm:$0xff]  ;;  %v9707_v23 = vld [vmem:[#allocation78_spill] sm:$0xff]  ;;  %3930 = vmatprep.subr.bf16.mxu0 %v9548_v35 }
 0x28d   : > { %v2205_v10 = vpop.f32.mrf.mxu0  ;;  %v1998_v6 = vadd.f32 %v9707_v23, %v9706_v18  ;;  %v9709_v18 = vld [vmem:[#allocation66_spill] sm:$0xff] }
 0x28e   : > { %9703 = vst [vmem:[#allocation63_spill] sm:$0xff] %v7553_v30  ;;  %v7562_v20 = vadd.f32 %v7348_v54, %v2401_v50  ;;  %v2402_v44 = vadd.f32 %v2205_v10, %v1996_v29  ;;  %v5707_v58 = vpack.i.bf16 %v9368_v42, %v9367_v47  ;;  %v9369_v26 = vmax.f32 %v7553_v30, 0.0 }
 0x28f   : > { %v2207_v25 = vpop.f32.mrf.mxu0  ;;  %v1999_v23 = vadd.f32 %v7106_v22, %v9709_v18  ;;  %3931 = vmatpush1.bf16.msra.mxu0 %v6021_v11  ;;  %v6022_v22 = vld [vmem:[%s9342_s3 + $0x118] sm:$0x1f]   ;;  %v7597_v18 = vpop.f32.mrf.mxu1 }
 0x290   : > { %9705 = vst [vmem:[#allocation76_spill] sm:$0xff] %v7562_v20  ;;  %v9370_v50 = vmax.f32 %v7562_v20, 0.0  ;;  %v7576_v29 = vadd.f32 %v7342_v32, %v2402_v44  ;;  %v2403_v10 = vadd.f32 %v2207_v25, %v1997_v36  ;;  %5708 = vrot.lane.b32.xlu0 %v5707_v58, %s6122_s30  ;;  %v9711_v25 = vld [vmem:[#allocation67_spill] sm:$0xff]  ;;  %3946 = vmatprep.subr.bf16.mxu0 %v9548_v35 }
 0x291   : > { %v2209_v38 = vpop.f32.mrf.mxu0  ;;  %v2000_v36 = vadd.f32 %v7114_v60, %v9711_v25  ;;  %v3914_v25 = vsel %vm3390_vm2, %v6022_v22, 0  ;;  %v7617_v30 = vpop.f32.mrf.mxu1 }
 0x292   : > { %9708 = vst [vmem:[#allocation64_spill] sm:$0xff] %v7576_v29  ;;  %v7585_v47 = vadd.f32 %v7348_v54, %v2403_v10  ;;  %v2404_v42 = vadd.f32 %v2209_v38, %v1998_v6  ;;  %v5712_v44 = vpack.i.bf16 %v9370_v50, %v9369_v26  ;;  %v9376_v6 = vmax.f32 %v7576_v29, 0.0  ;;  %v9713_v26 = vld [vmem:[#allocation68_spill] sm:$0xff]  ;;  %v9714_v50 = vld [vmem:[#allocation81_spill] sm:$0xff] }
 0x293   : > { %v2211_v58 = vpop.f32.mrf.mxu0  ;;  %v2001_v45 = vadd.f32 %v9714_v50, %v9713_v26  ;;  %3947 = vmatpush2.bf16.msra.mxu0 %v3914_v25 }
 0x294   : > { %9710 = vst [vmem:[#allocation65_spill] sm:$0xff] %v7585_v47  ;;  %v9377_v10 = vmax.f32 %v7585_v47, 0.0  ;;  %v7602_v38 = vadd.f32 %v7342_v32, %v2404_v42  ;;  %v2405_v11 = vadd.f32 %v2211_v58, %v1999_v23  ;;  %5713 = vrot.lane.b32.xlu1 %v5712_v44, %s6122_s30  ;;  %v9716_v42 = vld [vmem:[#allocation69_spill] sm:$0xff]  ;;  %v9717_v23 = vld [vmem:[#allocation82_spill] sm:$0xff] }
 0x295   : > { %v2215_v60 = vpop.f32.mrf.mxu0  ;;  %v2002_v58 = vadd.f32 %v9717_v23, %v9716_v42 }
 0x296   : > { %9712 = vst [vmem:[#allocation78_spill] sm:$0xff] %v7602_v38  ;;  %v7609_v27 = vadd.f32 %v7348_v54, %v2405_v11  ;;  %v2406_v4 = vadd.f32 %v2215_v60, %v2000_v36  ;;  %v5717_v16 = vpack.i.bf16 %v9377_v10, %v9376_v6  ;;  %v9379_v22 = vmax.f32 %v7602_v38, 0.0  ;;  %v9719_v60 = vld [vmem:[#allocation70_spill] sm:$0xff]  ;;  %v9721_v10 = vld [vmem:[#allocation71_spill] sm:$0xff] }
 0x297   : > { %v2217_v44 = vpop.f32.mrf.mxu0  ;;  %v2003_v25 = vadd.f32 %v7148_v7, %v9719_v60  ;;  %v9724_v60 = vld [vmem:[#allocation85_spill] sm:$0xff]  ;;  %v9726_v38 = vld [vmem:[#allocation2_spill] sm:$0xff] }
 0x298   : > { %9715 = vst [vmem:[#allocation66_spill] sm:$0xff] %v7609_v27  ;;  %v9380_v26 = vmax.f32 %v7609_v27, 0.0  ;;  %v7622_v50 = vadd.f32 %v7342_v32, %v2406_v4  ;;  %v2407_v36 = vadd.f32 %v2217_v44, %v2001_v45  ;;  %5718 = vrot.lane.b32.xlu0 %v5717_v16, %s6122_s30  ;;  %v2004_v4 = vadd.f32 %v7156_v48, %v9721_v10  ;;  %v7636_v45 = vpop.f32.mrf.mxu1  ;;  %v9727_v27 = vld [vmem:[#allocation86_spill] sm:$0xff] }
 0x299   : > { %v2219_v11 = vpop.f32.mrf.mxu0 }
 0x29a   : > { %9718 = vst [vmem:[#allocation67_spill] sm:$0xff] %v7622_v50  ;;  %v7628_v6 = vadd.f32 %v7348_v54, %v2407_v36  ;;  %v2408_v42 = vadd.f32 %v2219_v11, %v2002_v58  ;;  %v5722_v23 = vpack.i.bf16 %v9380_v26, %v9379_v22  ;;  %v9384_v16 = vmax.f32 %v7622_v50, 0.0  ;;  %v9723_v11 = vld [vmem:[#allocation72_spill] sm:$0xff]  ;;  %v9732_v50 = vld [vmem:[#allocation73_spill] sm:$0xff] }
 0x29b   : > { %v2221_v20 = vpop.f32.mrf.mxu0  ;;  %v2005_v22 = vadd.f32 %v9724_v60, %v9723_v11  ;;  %v9730_v60 = vld [vmem:[#allocation88_spill] sm:$0xff] }
 0x29c   : > { %9720 = vst [vmem:[#allocation68_spill] sm:$0xff] %v7628_v6  ;;  %v9385_v44 = vmax.f32 %v7628_v6, 0.0  ;;  %v7641_v7 = vadd.f32 %v7342_v32, %v2408_v42  ;;  %v2409_v36 = vadd.f32 %v2221_v20, %v2003_v25  ;;  %5723 = vrot.lane.b32.xlu1 %v5722_v23, %s6122_s30  ;;  %v2006_v42 = vadd.f32 %v9727_v27, %v9726_v38  ;;  %v7655_v20 = vpop.f32.mrf.mxu1  ;;  %v9733_v6 = vld [vmem:[#allocation89_spill] sm:$0xff] }
 0x29d   : > { %v2225_v58 = vpop.f32.mrf.mxu0 }
 0x29e   : > { %9722 = vst [vmem:[#allocation81_spill] sm:$0xff] %v7641_v7  ;;  %v7647_v26 = vadd.f32 %v7348_v54, %v2409_v36  ;;  %v2410_v48 = vadd.f32 %v2225_v58, %v2004_v4  ;;  %v5727_v10 = vpack.i.bf16 %v9385_v44, %v9384_v16  ;;  %v9389_v25 = vmax.f32 %v7641_v7, 0.0  ;;  %v9729_v58 = vld [vmem:[#allocation3_spill] sm:$0xff] }
 0x29f   : > { %v2227_v1 = vpop.f32.mrf.mxu0  ;;  %v2007_v16 = vadd.f32 %v9730_v60, %v9729_v58  ;;  %v9738_v7 = vld [vmem:[#allocation91_spill] sm:$0xff] }
 0x2a0   : > { %9725 = vst [vmem:[#allocation69_spill] sm:$0xff] %v7647_v26  ;;  %v9390_v23 = vmax.f32 %v7647_v26, 0.0  ;;  %v7660_v11 = vadd.f32 %v7342_v32, %v2410_v48  ;;  %v2411_v36 = vadd.f32 %v2227_v1, %v2005_v22  ;;  %5728 = vrot.lane.b32.xlu0 %v5727_v10, %s6122_s30  ;;  %v2008_v48 = vadd.f32 %v9733_v6, %v9732_v50  ;;  %v7674_v1 = vpop.f32.mrf.mxu1 }
 0x2a1   : > { %v2229_v4 = vpop.f32.mrf.mxu0 }
 0x2a2   : > { %9728 = vst [vmem:[#allocation82_spill] sm:$0xff] %v7660_v11  ;;  %v7666_v44 = vadd.f32 %v7348_v54, %v2411_v36  ;;  %v2412_v27 = vadd.f32 %v2229_v4, %v2006_v42  ;;  %v5732_v38 = vpack.i.bf16 %v9390_v23, %v9389_v25  ;;  %v9393_v22 = vmax.f32 %v7660_v11, 0.0  ;;  %v9735_v4 = vld [vmem:[#allocation4_spill] sm:$0xff]  ;;  %v9737_v23 = vld [vmem:[#allocation5_spill] sm:$0xff]  ;;  %v9743_v11 = vld [vmem:[#allocation74_spill] sm:$0xff] }
 0x2a3   : > { %v2231_v29 = vpop.f32.mrf.mxu0  ;;  %v2009_v60 = vadd.f32 %v7209_v51, %v9735_v4  ;;  %v9741_v4 = vld [vmem:[#allocation92_spill] sm:$0xff] }
 0x2a4   : > { %9731 = vst [vmem:[#allocation70_spill] sm:$0xff] %v7666_v44  ;;  %v9394_v10 = vmax.f32 %v7666_v44, 0.0  ;;  %v7679_v58 = vadd.f32 %v7342_v32, %v2412_v27  ;;  %v2413_v36 = vadd.f32 %v2231_v29, %v2007_v16  ;;  %5733 = vrot.lane.b32.xlu1 %v5732_v38, %s6122_s30  ;;  %v2010_v27 = vadd.f32 %v9738_v7, %v9737_v23  ;;  %v7693_v29 = vpop.f32.mrf.mxu1  ;;  %v9744_v44 = vld [vmem:[#allocation94_spill] sm:$0xff] }
 0x2a5   : > { %v2235_v42 = vpop.f32.mrf.mxu0 }
 0x2a6   : > { %9734 = vst [vmem:[#allocation71_spill] sm:$0xff] %v7679_v58  ;;  %v7685_v25 = vadd.f32 %v7348_v54, %v2413_v36  ;;  %v2414_v6 = vadd.f32 %v2235_v42, %v2008_v48  ;;  %v5737_v50 = vpack.i.bf16 %v9394_v10, %v9393_v22  ;;  %v9398_v16 = vmax.f32 %v7679_v58, 0.0  ;;  %v9740_v42 = vld [vmem:[#allocation6_spill] sm:$0xff]  ;;  %v9749_v58 = vld [vmem:[#allocation8_spill] sm:$0xff] }
 0x2a7   : > { %v2237_v26 = vpop.f32.mrf.mxu0  ;;  %v2011_v22 = vadd.f32 %v9741_v4, %v9740_v42  ;;  %v9747_v4 = vld [vmem:[#allocation39_spill] sm:$0xff] }
 0x2a8   : > { %9736 = vst [vmem:[#allocation72_spill] sm:$0xff] %v7685_v25  ;;  %v9399_v38 = vmax.f32 %v7685_v25, 0.0  ;;  %v7698_v51 = vadd.f32 %v7342_v32, %v2414_v6  ;;  %v2415_v36 = vadd.f32 %v2237_v26, %v2009_v60  ;;  %5738 = vrot.lane.b32.xlu0 %v5737_v50, %s6122_s30  ;;  %v2012_v6 = vadd.f32 %v9744_v44, %v9743_v11  ;;  %v7712_v26 = vpop.f32.mrf.mxu1  ;;  %v9750_v25 = vld [vmem:[#allocation96_spill] sm:$0xff] }
 0x2a9   : > { %v2239_v48 = vpop.f32.mrf.mxu0 }
 0x2aa   : > { %9739 = vst [vmem:[#allocation85_spill] sm:$0xff] %v7698_v51  ;;  %v7704_v10 = vadd.f32 %v7348_v54, %v2415_v36  ;;  %v2416_v7 = vadd.f32 %v2239_v48, %v2010_v27  ;;  %v5742_v23 = vpack.i.bf16 %v9399_v38, %v9398_v16  ;;  %v9403_v60 = vmax.f32 %v7698_v51, 0.0  ;;  %v9746_v48 = vld [vmem:[#allocation7_spill] sm:$0xff] }
 0x2ab   : > { %v2241_v47 = vpop.f32.mrf.mxu0  ;;  %v2013_v16 = vadd.f32 %v9747_v4, %v9746_v48  ;;  %v9753_v4 = vld [vmem:[#allocation45_spill] sm:$0xff]  ;;  %v9755_v51 = vld [vmem:[#allocation75_spill] sm:$0xff] }
 0x2ac   : > { %9742 = vst [vmem:[#allocation2_spill] sm:$0xff] %v7704_v10  ;;  %v9404_v50 = vmax.f32 %v7704_v10, 0.0  ;;  %v7717_v42 = vadd.f32 %v7342_v32, %v2416_v7  ;;  %v2417_v36 = vadd.f32 %v2241_v47, %v2011_v22  ;;  %5743 = vrot.lane.b32.xlu1 %v5742_v23, %s6122_s30  ;;  %v2014_v7 = vadd.f32 %v9750_v25, %v9749_v58  ;;  %v7731_v47 = vpop.f32.mrf.mxu1  ;;  %v9756_v10 = vld [vmem:[#allocation98_spill] sm:$0xff] }
 0x2ad   : > { %v2245_v27 = vpop.f32.mrf.mxu0 }
 0x2ae   : > { %9745 = vst [vmem:[#allocation86_spill] sm:$0xff] %v7717_v42  ;;  %v7723_v38 = vadd.f32 %v7348_v54, %v2417_v36  ;;  %v2418_v44 = vadd.f32 %v2245_v27, %v2012_v6  ;;  %v5747_v11 = vpack.i.bf16 %v9404_v50, %v9403_v60  ;;  %v9408_v22 = vmax.f32 %v7717_v42, 0.0  ;;  %v9752_v27 = vld [vmem:[#allocation9_spill] sm:$0xff] }
 0x2af   : > { %v2247_v31 = vpop.f32.mrf.mxu0  ;;  %v2015_v60 = vadd.f32 %v9753_v4, %v9752_v27 }
 0x2b0   : > { %9748 = vst [vmem:[#allocation3_spill] sm:$0xff] %v7723_v38  ;;  %v9409_v23 = vmax.f32 %v7723_v38, 0.0  ;;  %v7736_v48 = vadd.f32 %v7342_v32, %v2418_v44  ;;  %v2419_v36 = vadd.f32 %v2247_v31, %v2013_v16  ;;  %5748 = vrot.lane.b32.xlu0 %v5747_v11, %s6122_s30  ;;  %v2016_v44 = vadd.f32 %v9756_v10, %v9755_v51  ;;  %v7750_v31 = vpop.f32.mrf.mxu1 }
 0x2b1   : > { %v2249_v6 = vpop.f32.mrf.mxu0 }
 0x2b2   : > { %9751 = vst [vmem:[#allocation88_spill] sm:$0xff] %v7736_v48  ;;  %v7742_v50 = vadd.f32 %v7348_v54, %v2419_v36  ;;  %v2420_v25 = vadd.f32 %v2249_v6, %v2014_v7  ;;  %v5752_v58 = vpack.i.bf16 %v9409_v23, %v9408_v22  ;;  %v9411_v16 = vmax.f32 %v7736_v48, 0.0  ;;  %v9758_v6 = vld [vmem:[#allocation10_spill] sm:$0xff]  ;;  %v9760_v23 = vld [vmem:[#allocation11_spill] sm:$0xff] }
 0x2b3   : > { %v2251_v28 = vpop.f32.mrf.mxu0  ;;  %v2017_v4 = vadd.f32 %v7289_v19, %v9758_v6 }
 0x2b4   : > { %9754 = vst [vmem:[#allocation73_spill] sm:$0xff] %v7742_v50  ;;  %v9412_v11 = vmax.f32 %v7742_v50, 0.0  ;;  %v7755_v27 = vadd.f32 %v7342_v32, %v2420_v25  ;;  %v2421_v36 = vadd.f32 %v2251_v28, %v2015_v60  ;;  %5753 = vrot.lane.b32.xlu1 %v5752_v58, %s6122_s30  ;;  %v2018_v25 = vadd.f32 %v7299_v17, %v9760_v23  ;;  %v7769_v28 = vpop.f32.mrf.mxu1 }
 0x2b5   : > { %v2255_v7 = vpop.f32.mrf.mxu0 }
 0x2b6   : > { %9757 = vst [vmem:[#allocation89_spill] sm:$0xff] %v7755_v27  ;;  %v7761_v22 = vadd.f32 %v7348_v54, %v2421_v36  ;;  %v2422_v10 = vadd.f32 %v2255_v7, %v2016_v44  ;;  %v5757_v51 = vpack.i.bf16 %v9412_v11, %v9411_v16  ;;  %v9414_v60 = vmax.f32 %v7755_v27, 0.0  ;;  %v9762_v7 = vld [vmem:[#allocation12_spill] sm:$0xff]  ;;  %v9764_v11 = vld [vmem:[#allocation77_spill] sm:$0xff] }
 0x2b7   : > { %v2257_v42 = vpop.f32.mrf.mxu0  ;;  %v2019_v6 = vadd.f32 %v7304_v24, %v9762_v7 }
 0x2b8   : > { %9759 = vst [vmem:[#allocation4_spill] sm:$0xff] %v7761_v22  ;;  %v9415_v58 = vmax.f32 %v7761_v22, 0.0  ;;  %v7774_v19 = vadd.f32 %v7342_v32, %v2422_v10  ;;  %v2423_v36 = vadd.f32 %v2257_v42, %v2017_v4  ;;  %5758 = vrot.lane.b32.xlu0 %v5757_v51, %s6122_s30  ;;  %v2020_v10 = vadd.f32 %v7314_v61, %v9764_v11  ;;  %v7788_v42 = vpop.f32.mrf.mxu1 }
 0x2b9   : > { %v2259_v44 = vpop.f32.mrf.mxu0 }
 0x2ba   : > { %9761 = vst [vmem:[#allocation5_spill] sm:$0xff] %v7774_v19  ;;  %v7780_v16 = vadd.f32 %v7348_v54, %v2423_v36  ;;  %v2424_v17 = vadd.f32 %v2259_v44, %v2018_v25  ;;  %v5762_v23 = vpack.i.bf16 %v9415_v58, %v9414_v60  ;;  %v9417_v4 = vmax.f32 %v7774_v19, 0.0  ;;  %v9766_v44 = vld [vmem:[#allocation13_spill] sm:$0xff]  ;;  %v9768_v58 = vld [vmem:[#allocation14_spill] sm:$0xff] }
 0x2bb   : > { %v2261_v38 = vpop.f32.mrf.mxu0  ;;  %v2021_v7 = vadd.f32 %v7319_v57, %v9766_v44 }
 0x2bc   : > { %9763 = vst [vmem:[#allocation91_spill] sm:$0xff] %v7780_v16  ;;  %v9418_v51 = vmax.f32 %v7780_v16, 0.0  ;;  %v7793_v24 = vadd.f32 %v7342_v32, %v2424_v17  ;;  %v2425_v36 = vadd.f32 %v2261_v38, %v2019_v6  ;;  %5763 = vrot.lane.b32.xlu1 %v5762_v23, %s6122_s30  ;;  %v2022_v17 = vadd.f32 %v7338_v37, %v9768_v58  ;;  %v7807_v38 = vpop.f32.mrf.mxu1  ;;  %v9810_v16 = vld [vmem:[#allocation84_spill] sm:$0xff] }
 0x2bd   : > { %v2265_v25 = vpop.f32.mrf.mxu0 }
 0x2be   : > { %9765 = vst [vmem:[#allocation6_spill] sm:$0xff] %v7793_v24  ;;  %v7799_v60 = vadd.f32 %v7348_v54, %v2425_v36  ;;  %v2426_v61 = vadd.f32 %v2265_v25, %v2020_v10  ;;  %v5767_v11 = vpack.i.bf16 %v9418_v51, %v9417_v4  ;;  %v9420_v6 = vmax.f32 %v7793_v24, 0.0  ;;  %v9770_v25 = vld [vmem:[#allocation15_spill] sm:$0xff] }
 0x2bf   : > { %v2267_v27 = vpop.f32.mrf.mxu0  ;;  %v2023_v44 = vadd.f32 %v7346_v34, %v9770_v25  ;;  %v9772_v51 = vld [vmem:[#allocation79_spill] sm:$0xff] }
 0x2c0   : > { %9767 = vst [vmem:[#allocation92_spill] sm:$0xff] %v7799_v60  ;;  %v9421_v23 = vmax.f32 %v7799_v60, 0.0  ;;  %v7812_v57 = vadd.f32 %v7342_v32, %v2426_v61  ;;  %v2427_v36 = vadd.f32 %v2267_v27, %v2021_v7  ;;  %5768 = vrot.lane.b32.xlu0 %v5767_v11, %s6122_s30  ;;  %v2024_v61 = vadd.f32 %v7360_v8, %v9772_v51  ;;  %v7826_v27 = vpop.f32.mrf.mxu1 }
 0x2c1   : > { %v2269_v10 = vpop.f32.mrf.mxu0 }
 0x2c2   : > { %9769 = vst [vmem:[#allocation74_spill] sm:$0xff] %v7812_v57  ;;  %v7818_v4 = vadd.f32 %v7348_v54, %v2427_v36  ;;  %v2428_v37 = vadd.f32 %v2269_v10, %v2022_v17  ;;  %v5772_v58 = vpack.i.bf16 %v9421_v23, %v9420_v6  ;;  %v9423_v7 = vmax.f32 %v7812_v57, 0.0  ;;  %v9774_v10 = vld [vmem:[#allocation16_spill] sm:$0xff]  ;;  %v9776_v23 = vld [vmem:[#allocation17_spill] sm:$0xff] }
 0x2c3   : > { %v2271_v19 = vpop.f32.mrf.mxu0  ;;  %v2025_v25 = vadd.f32 %v7382_v53, %v9774_v10 }
 0x2c4   : > { %9771 = vst [vmem:[#allocation94_spill] sm:$0xff] %v7818_v4  ;;  %v9424_v11 = vmax.f32 %v7818_v4, 0.0  ;;  %v7831_v34 = vadd.f32 %v7342_v32, %v2428_v37  ;;  %v2429_v36 = vadd.f32 %v2271_v19, %v2023_v44  ;;  %5773 = vrot.lane.b32.xlu1 %v5772_v58, %s6122_s30  ;;  %v2026_v37 = vadd.f32 %v7409_v0, %v9776_v23  ;;  %v7845_v19 = vpop.f32.mrf.mxu1  ;;  %v9844_v4 = vld [vmem:[#allocation104_spill] sm:$0xff] }
 0x2c5   : > { %v2275_v17 = vpop.f32.mrf.mxu0 }
 0x2c6   : > { %9773 = vst [vmem:[#allocation7_spill] sm:$0xff] %v7831_v34  ;;  %v7837_v6 = vadd.f32 %v7348_v54, %v2429_v36  ;;  %v2430_v8 = vadd.f32 %v2275_v17, %v2024_v61  ;;  %v5777_v51 = vpack.i.bf16 %v9424_v11, %v9423_v7  ;;  %v9426_v44 = vmax.f32 %v7831_v34, 0.0  ;;  %v9778_v17 = vld [vmem:[#allocation18_spill] sm:$0xff]  ;;  %v9780_v11 = vld [vmem:[#allocation80_spill] sm:$0xff] }
 0x2c7   : > { %v2277_v24 = vpop.f32.mrf.mxu0  ;;  %v2027_v10 = vadd.f32 %v7433_v52, %v9778_v17 }
 0x2c8   : > { %9775 = vst [vmem:[#allocation39_spill] sm:$0xff] %v7837_v6  ;;  %v9427_v58 = vmax.f32 %v7837_v6, 0.0  ;;  %v7850_v53 = vadd.f32 %v7342_v32, %v2430_v8  ;;  %v2431_v36 = vadd.f32 %v2277_v24, %v2025_v25  ;;  %5778 = vrot.lane.b32.xlu0 %v5777_v51, %s6122_s30  ;;  %v2028_v8 = vadd.f32 %v7456_v46, %v9780_v11  ;;  %v7864_v24 = vpop.f32.mrf.mxu1  ;;  %v9801_v6 = vld [vmem:[#allocation55_spill] sm:$0xff] }
 0x2c9   : > { %v2279_v61 = vpop.f32.mrf.mxu0 }
 0x2ca   : > { %9777 = vst [vmem:[#allocation8_spill] sm:$0xff] %v7850_v53  ;;  %v7856_v7 = vadd.f32 %v7348_v54, %v2431_v36  ;;  %v2432_v0 = vadd.f32 %v2279_v61, %v2026_v37  ;;  %v5782_v23 = vpack.i.bf16 %v9427_v58, %v9426_v44  ;;  %v9429_v25 = vmax.f32 %v7850_v53, 0.0  ;;  %v9782_v61 = vld [vmem:[#allocation19_spill] sm:$0xff]  ;;  %v9784_v58 = vld [vmem:[#allocation20_spill] sm:$0xff] }
 0x2cb   : > { %v2281_v60 = vpop.f32.mrf.mxu0  ;;  %v2029_v17 = vadd.f32 %v7479_v55, %v9782_v61 }
 0x2cc   : > { %9779 = vst [vmem:[#allocation96_spill] sm:$0xff] %v7856_v7  ;;  %v9430_v51 = vmax.f32 %v7856_v7, 0.0  ;;  %v7869_v52 = vadd.f32 %v7342_v32, %v2432_v0  ;;  %v2433_v36 = vadd.f32 %v2281_v60, %v2027_v10  ;;  %5783 = vrot.lane.b32.xlu1 %v5782_v23, %s6122_s30  ;;  %v2030_v0 = vadd.f32 %v7502_v21, %v9784_v58  ;;  %v7883_v60 = vpop.f32.mrf.mxu1  ;;  %v9800_v7 = vld [vmem:[#allocation54_spill] sm:$0xff] }
 0x2cd   : > { %v2285_v37 = vpop.f32.mrf.mxu0 }
 0x2ce   : > { %9781 = vst [vmem:[#allocation9_spill] sm:$0xff] %v7869_v52  ;;  %v7875_v44 = vadd.f32 %v7348_v54, %v2433_v36  ;;  %v2434_v46 = vadd.f32 %v2285_v37, %v2028_v8  ;;  %v5787_v11 = vpack.i.bf16 %v9430_v51, %v9429_v25  ;;  %v9432_v10 = vmax.f32 %v7869_v52, 0.0  ;;  %v9786_v37 = vld [vmem:[#allocation21_spill] sm:$0xff]  ;;  %v9788_v51 = vld [vmem:[#allocation83_spill] sm:$0xff] }
 0x2cf   : > { %v2287_v34 = vpop.f32.mrf.mxu0  ;;  %v2031_v61 = vadd.f32 %v7525_v15, %v9786_v37 }
 0x2d0   : > { %9783 = vst [vmem:[#allocation45_spill] sm:$0xff] %v7875_v44  ;;  %v9433_v23 = vmax.f32 %v7875_v44, 0.0  ;;  %v7888_v55 = vadd.f32 %v7342_v32, %v2434_v46  ;;  %v2435_v36 = vadd.f32 %v2287_v34, %v2029_v17  ;;  %5788 = vrot.lane.b32.xlu0 %v5787_v11, %s6122_s30  ;;  %v2032_v46 = vadd.f32 %v7548_v40, %v9788_v51  ;;  %v7902_v34 = vpop.f32.mrf.mxu1  ;;  %v9798_v44 = vld [vmem:[#allocation49_spill] sm:$0xff] }
 0x2d1   : > { %v2289_v8 = vpop.f32.mrf.mxu0 }
 0x2d2   : > { %9785 = vst [vmem:[#allocation75_spill] sm:$0xff] %v7888_v55  ;;  %v7894_v25 = vadd.f32 %v7348_v54, %v2435_v36  ;;  %v2436_v21 = vadd.f32 %v2289_v8, %v2030_v0  ;;  %v5792_v58 = vpack.i.bf16 %v9433_v23, %v9432_v10  ;;  %v9790_v0 = vld [vmem:[#allocation37_spill] sm:$0xff]  ;;  %v9791_v8 = vld [vmem:[#allocation38_spill] sm:$0xff]  ;;  %v9794_v11 = vmax.f32 %v7888_v55, 0.0  ;;  %v9808_v55 = vld [vmem:[#allocation59_spill] sm:$0xff] }
 0x2d3   : > { %v2291_v53 = vpop.f32.mrf.mxu0  ;;  %v7912_v37 = vadd.f32 %v9791_v8, %v9790_v0  ;;  %v9792_v23 = vld [vmem:[#allocation22_spill] sm:$0xff] }
 0x2d4   : > { %9787 = vst [vmem:[#allocation98_spill] sm:$0xff] %v7894_v25  ;;  %v7907_v15 = vadd.f32 %v7342_v32, %v2436_v21  ;;  %v2437_v36 = vadd.f32 %v2291_v53, %v2031_v61  ;;  %5793 = vrot.lane.b32.xlu1 %v5792_v58, %s6122_s30  ;;  %v2033_v40 = vadd.f32 %v7571_v49, %v9792_v23  ;;  %v9795_v21 = vmax.f32 %v7894_v25, 0.0  ;;  %v9796_v53 = vld [vmem:[#allocation43_spill] sm:$0xff]  ;;  %v9797_v61 = vld [vmem:[#allocation44_spill] sm:$0xff]  ;;  %v9799_v0 = vld [vmem:[#allocation50_spill] sm:$0xff] }
 0x2d5   : > { %v2295_v10 = vpop.f32.mrf.mxu0  ;;  %v7925_v58 = vadd.f32 %v9797_v61, %v9796_v53  ;;  %v7929_v8 = vadd.f32 %v9799_v0, %v9798_v44  ;;  %v7933_v49 = vadd.f32 %v9801_v6, %v9800_v7  ;;  %v9803_v23 = vld [vmem:[#allocation23_spill] sm:$0xff]  ;;  %v9805_v44 = vld [vmem:[#allocation56_spill] sm:$0xff]  ;;  %v9806_v0 = vld [vmem:[#allocation57_spill] sm:$0xff] }
 0x2d6   : > { %9789 = vst [vmem:[#allocation10_spill] sm:$0xff] %v7907_v15  ;;  %v7917_v51 = vadd.f32 %v7348_v54, %v2437_v36  ;;  %v2438_v17 = vadd.f32 %v2295_v10, %v2032_v46  ;;  %v5797_v52 = vpack.i.bf16 %v9795_v21, %v9794_v11  ;;  %v2034_v10 = vadd.f32 %v7597_v18, %v9803_v23  ;;  %v7937_v36 = vpop.f32.mrf.mxu1  ;;  %v9807_v7 = vld [vmem:[#allocation58_spill] sm:$0xff]  ;;  %v9809_v18 = vld [vmem:[#allocation24_spill] sm:$0xff]  ;;  %v9811_v21 = vld [vmem:[#allocation25_spill] sm:$0xff] }
 0x2d7   : > { %9802 = vst [vmem:[#allocation12_spill] sm:$0xff] %v7933_v49  ;;  %v2297_v46 = vpop.f32.mrf.mxu0  ;;  %v1971_v6 = vadd.f32 %v9806_v0, %v9805_v44  ;;  %v1975_v25 = vadd.f32 %v9808_v55, %v9807_v7  ;;  %v2035_v23 = vadd.f32 %v7617_v30, %v9809_v18  ;;  %v2036_v11 = vadd.f32 %v7636_v45, %v9810_v16  ;;  %v9815_v55 = vld [vmem:[#allocation26_spill] sm:$0xff]  ;;  %v9816_v30 = vld [vmem:[#allocation27_spill] sm:$0xff] }
 0x2d8   : > { %9793 = vst [vmem:[#allocation11_spill] sm:$0xff] %v7917_v51  ;;  %v7942_v53 = vadd.f32 %v7342_v32, %v2438_v17  ;;  %v2439_v61 = vadd.f32 %v2297_v46, %v2033_v40  ;;  %5798 = vrot.lane.b32.xlu0 %v5797_v52, %s6122_s30  ;;  %v2037_v17 = vadd.f32 %v7655_v20, %v9811_v21  ;;  %v9813_v46 = vmax.f32 %v7907_v15, 0.0  ;;  %v9817_v45 = vld [vmem:[#allocation87_spill] sm:$0xff]  ;;  %v9818_v20 = vld [vmem:[#allocation28_spill] sm:$0xff] }
 0x2d9   : > { %v2299_v57 = vpop.f32.mrf.mxu0  ;;  %v9814_v44 = vmax.f32 %v7917_v51, 0.0  ;;  %v2038_v7 = vadd.f32 %v7674_v1, %v9815_v55  ;;  %v2039_v18 = vadd.f32 %v7693_v29, %v9816_v30  ;;  %v7968_v16 = vadd.f32 %v7712_v26, %v9817_v45  ;;  %v9820_v29 = vld [vmem:[#allocation29_spill] sm:$0xff]  ;;  %v9821_v55 = vld [vmem:[#allocation30_spill] sm:$0xff]  ;;  %v9830_v15 = vld [vmem:[#allocation32_spill] sm:$0xff] }
 0x2da   : > { %9804 = vst [vmem:[#allocation77_spill] sm:$0xff] %v7942_v53  ;;  %v7956_v40 = vadd.f32 %v7348_v54, %v2439_v61  ;;  %v2440_v52 = vadd.f32 %v2299_v57, %v2034_v10  ;;  %v7972_v21 = vadd.f32 %v7731_v47, %v9818_v20  ;;  %v7974_v10 = vpop.f32.mrf.mxu1  ;;  %v7984_v26 = vadd.f32 %v7750_v31, %v9820_v29  ;;  %v9822_v30 = vld [vmem:[#allocation101_spill] sm:$0xff]  ;;  %v9824_v20 = vld [vmem:[#allocation103_spill] sm:$0xff] }
 0x2db   : > { %v5802_v0 = vpack.i.bf16 %v9814_v44, %v9813_v46  ;;  %v2301_v57 = vpop.f32.mrf.mxu0  ;;  %v7988_v47 = vadd.f32 %v7769_v28, %v9821_v55  ;;  %v7992_v45 = vadd.f32 %v7348_v54, %v9822_v30  ;;  %v2377_v46 = vadd.f32 %v9824_v20, %v1971_v6  ;;  %v9829_v55 = vld [vmem:[#allocation31_spill] sm:$0xff]  ;;  %v9831_v20 = vld [vmem:[#allocation33_spill] sm:$0xff] }
 0x2dc   : > { %9812 = vst [vmem:[#allocation13_spill] sm:$0xff] %v7956_v40  ;;  %v7979_v1 = vadd.f32 %v7342_v32, %v2440_v52  ;;  %v2441_v44 = vadd.f32 %v2301_v57, %v2035_v23  ;;  %v9825_v52 = vld [vmem:[#allocation90_spill] sm:$0xff]  ;;  %v9827_v57 = vmax.f32 %v7942_v53, 0.0  ;;  %v9828_v28 = vmax.f32 %v7956_v40, 0.0 }
 0x2dd   : > { %5803 = vrot.lane.b32.xlu1 %v5802_v0, %s6122_s30  ;;  %9823 = vst [vmem:[#allocation15_spill] sm:$0xff] %v7992_v45  ;;  %v2305_v61 = vpop.f32.mrf.mxu0  ;;  %v7997_v23 = vadd.f32 %v7788_v42, %v9825_v52  ;;  %v8008_v30 = vadd.f32 %v7807_v38, %v9829_v55  ;;  %v8012_v6 = vadd.f32 %v7826_v27, %v9830_v15  ;;  %v8022_v52 = vpop.f32.mrf.mxu1 }
 0x2de   : > { %9819 = vst [vmem:[#allocation14_spill] sm:$0xff] %v7979_v1  ;;  %v8000_v0 = vadd.f32 %v7348_v54, %v2441_v44  ;;  %v2442_v31 = vadd.f32 %v2305_v61, %v2036_v11  ;;  %v5807_v29 = vpack.i.bf16 %v9828_v28, %v9827_v57  ;;  %v8016_v42 = vadd.f32 %v7845_v19, %v9831_v20  ;;  %v9832_v44 = vld [vmem:[#allocation100_spill] sm:$0xff]  ;;  %v9834_v57 = vld [vmem:[#allocation107_spill] sm:$0xff]  ;;  %v9835_v19 = vld [vmem:[#allocation102_spill] sm:$0xff] }
 0x2df   : > { %v8020_v11 = vadd.f32 %v7342_v32, %v9832_v44  ;;  %v2307_v61 = vpop.f32.mrf.mxu0  ;;  %v2381_v28 = vadd.f32 %v9834_v57, %v1975_v25  ;;  %v8031_v15 = vadd.f32 %v7342_v32, %v9835_v19  ;;  %v8034_v20 = vadd.f32 %v7348_v54, %v2377_v46  ;;  %v9839_v57 = vld [vmem:[#allocation105_spill] sm:$0xff]  ;;  %v9842_v46 = vld [vmem:[#allocation34_spill] sm:$0xff] }
 0x2e0   : > { %9826 = vst [vmem:[#allocation79_spill] sm:$0xff] %v8000_v0  ;;  %v9448_v55 = vmax.f32 %v8000_v0, 0.0  ;;  %v2443_v53 = vadd.f32 %v2307_v61, %v2037_v17  ;;  %5808 = vrot.lane.b32.xlu0 %v5807_v29, %s6122_s30  ;;  %v8037_v44 = vadd.f32 %v7342_v32, %v2442_v31  ;;  %v8041_v38 = vadd.f32 %v7348_v54, %v9839_v57  ;;  %v9843_v31 = vld [vmem:[#allocation35_spill] sm:$0xff] }
 0x2e1   : > { %9833 = vst [vmem:[#allocation16_spill] sm:$0xff] %v8020_v11  ;;  %9836 = vst [vmem:[#allocation17_spill] sm:$0xff] %v8031_v15  ;;  %v2309_v25 = vpop.f32.mrf.mxu0  ;;  %v9841_v27 = vmax.f32 %v7979_v1, 0.0  ;;  %v8052_v40 = vadd.f32 %v7864_v24, %v9842_v46  ;;  %v8056_v51 = vadd.f32 %v7883_v60, %v9843_v31  ;;  %v8070_v24 = vadd.f32 %v7348_v54, %v2381_v28 }
 0x2e2   : > { %9837 = vst [vmem:[#allocation18_spill] sm:$0xff] %v8034_v20  ;;  %9838 = vst [vmem:[#allocation80_spill] sm:$0xff] %v8037_v44  ;;  %v8044_v17 = vadd.f32 %v7348_v54, %v2443_v53  ;;  %v2444_v29 = vadd.f32 %v2309_v25, %v2038_v7  ;;  %v5669_v61 = vpop.permute.xlu0 %5668  ;;  %v8061_v53 = vadd.f32 %v7342_v32, %v9844_v4  ;;  %v9846_v25 = vld [vmem:[#allocation93_spill] sm:$0xff] }
 0x2e3   : > { %v5812_v19 = vpack.i.bf16 %v9448_v55, %v9841_v27  ;;  %v2311_v7 = vpop.f32.mrf.mxu0  ;;  %v8065_v1 = vadd.f32 %v9846_v25, %v7912_v37  ;;  %v8067_v27 = vpop.f32.mrf.mxu1  ;;  %v9847_v37 = vmax.f32 %v8020_v11, 0.0  ;;  %v9848_v25 = vmax.f32 %v7992_v45, 0.0 }
 0x2e4   : > { %9840 = vst [vmem:[#allocation19_spill] sm:$0xff] %v8044_v17  ;;  %9845 = vst [vmem:[#allocation20_spill] sm:$0xff] %v8061_v53  ;;  %v2445_v60 = vadd.f32 %v2311_v7, %v2039_v18  ;;  %v8077_v55 = vadd.f32 %v7342_v32, %v2444_v29  ;;  %v9849_v18 = vld [vmem:[#allocation106_spill] sm:$0xff]  ;;  %v5671_v4 = vunpack.i.h.bf16 %v5669_v61  ;;  %v5670_v22 = vunpack.i.l.bf16 %v5669_v61 }
 0x2e5   : > { %5813 = vrot.lane.b32.xlu1 %v5812_v19, %s6122_s30  ;;  %v2315_v57 = vpop.f32.mrf.mxu0  ;;  %v5822_v0 = vpack.i.bf16 %v9848_v25, %v9847_v37  ;;  %v8087_v19 = vadd.f32 %v7342_v32, %v9849_v18  ;;  %v9850_v45 = vmax.f32 %v8037_v44, 0.0  ;;  %v9851_v37 = vmax.f32 %v8044_v17, 0.0  ;;  %v8097_v28 = vpop.f32.mrf.mxu1 }
 0x2e6   : > { %v8090_v7 = vadd.f32 %v7348_v54, %v2445_v60  ;;  %v5674_v31 = vpop.permute.xlu0 %5673  ;;  %v2446_v29 = vadd.f32 %v2315_v57, %v7968_v16  ;;  %v9852_v17 = vmax.f32 %v8031_v15, 0.0  ;;  %v9853_v18 = vmax.f32 %v8034_v20, 0.0 }
 0x2e7   : > { %v2317_v11 = vpop.f32.mrf.mxu0  ;;  %v5817_v25 = vpack.i.bf16 %v9851_v37, %v9850_v45  ;;  %v5676_v61 = vunpack.i.h.bf16 %v5674_v31  ;;  %v5675_v50 = vunpack.i.l.bf16 %v5674_v31  ;;  %v9855_v16 = vmax.f32 %v8041_v38, 0.0  ;;  %v8122_v59 = vpop.f32.mrf.mxu1 }
 0x2e8   : > { %v2447_v60 = vadd.f32 %v2317_v11, %v7972_v21  ;;  %v5832_v21 = vpack.i.bf16 %v9853_v18, %v9852_v17  ;;  %v9854_v11 = vmax.f32 %v8061_v53, 0.0  ;;  %v2967_v31 = vsel %vm2962_vm3, %v5670_v22, %v5671_v4 }
 0x2e9   : > { %5818 = vrot.lane.b32.xlu0 %v5817_v25, %s6122_s30  ;;  %v2319_v44 = vpop.f32.mrf.mxu0  ;;  %v9856_v45 = vmax.f32 %v8077_v55, 0.0  ;;  %v9858_v15 = vmax.f32 %v7356_v56, 0.0  ;;  %v9860_v22 = vmax.f32 %v8070_v24, 0.0  ;;  %v2968_v53 = vsel %vm2962_vm3, %v5675_v50, %v5676_v61 }
 0x2ea   : > { %v8107_v37 = vadd.f32 %v7348_v54, %v2447_v60  ;;  %v5679_v46 = vpop.permute.xlu1 %5678  ;;  %v5837_v57 = vpack.i.bf16 %v9855_v16, %v9854_v11  ;;  %v9857_v60 = vmax.f32 %v8090_v7, 0.0  ;;  %v2448_v18 = vadd.f32 %v2319_v44, %v7984_v26 }
 0x2eb   : > { %v5681_v25 = vunpack.i.h.bf16 %v5679_v46  ;;  %v5680_v48 = vunpack.i.l.bf16 %v5679_v46  ;;  %v2321_v49 = vpop.f32.mrf.mxu0  ;;  %v3116_v17 = vmax.f32 %v9858_v15, %v5671_v4  ;;  %v9859_v11 = vmax.f32 %v8087_v19, 0.0 }
 0x2ec   : > { %v5827_v13 = vpack.i.bf16 %v9857_v60, %v9856_v45  ;;  %v2449_v20 = vadd.f32 %v2321_v49, %v7988_v47  ;;  %v8133_v16 = vadd.f32 %v7342_v32, %v2446_v29  ;;  %v9861_v49 = vmax.f32 %v7351_v5, 0.0 }
 0x2ed   : > { %v5842_v46 = vpack.i.bf16 %v9860_v22, %v9859_v11  ;;  %v2969_v45 = vsel %vm2962_vm3, %v5680_v48, %v5681_v25  ;;  %5823 = vrot.lane.b32.xlu0 %v5822_v0, %s6122_s30  ;;  %v2325_v56 = vpop.f32.mrf.mxu0  ;;  %v9484_v47 = vmax.f32 %v8107_v37, 0.0  ;;  %v9862_v15 = vmax.f32 %v7396_v41, 0.0  ;;  %v8150_v22 = vpop.f32.mrf.mxu1 }
 0x2ee   : > { %5828 = vrot.lane.b32.xlu1 %v5827_v13, %s6122_s30  ;;  %v3115_v26 = vmax.f32 %v9861_v49, %v2967_v31  ;;  %v2450_v4 = vadd.f32 %v2325_v56, %v7997_v23  ;;  %v5684_v29 = vpop.permute.xlu1 %5683  ;;  %v9863_v50 = vmax.f32 %v7387_v62, 0.0  ;;  %v8148_v13 = vadd.f32 %v7348_v54, %v2449_v20 }
 0x2ef   : > { %v3120_v44 = vmax.f32 %v9862_v15, %v5681_v25  ;;  %v5686_v0 = vunpack.i.h.bf16 %v5684_v29  ;;  %v5685_v60 = vunpack.i.l.bf16 %v5684_v29  ;;  %v2327_v11 = vpop.f32.mrf.mxu0  ;;  %v9864_v5 = vmax.f32 %v7373_v39, 0.0 }
 0x2f0   : > { %v3119_v48 = vmax.f32 %v9863_v50, %v2969_v45  ;;  %v9865_v41 = vmax.f32 %v7365_v63, 0.0  ;;  %v8157_v23 = vadd.f32 %v7342_v32, %v2448_v18  ;;  %v2451_v62 = vadd.f32 %v2327_v11, %v8008_v30 }
 0x2f1   : > { %v3118_v31 = vmax.f32 %v9864_v5, %v5676_v61  ;;  %v9466_v45 = vmax.f32 %v8133_v16, 0.0  ;;  %v8162_v20 = vadd.f32 %v7342_v32, %v2450_v4  ;;  %v9866_v56 = vmax.f32 %v7423_v33, 0.0  ;;  %5838 = vrot.lane.b32.xlu0 %v5837_v57, %s6122_s30  ;;  %v2329_v63 = vpop.f32.mrf.mxu0  ;;  %v8180_v57 = vpop.f32.mrf.mxu1 }
 0x2f2   : > { %v3117_v25 = vmax.f32 %v9865_v41, %v2968_v53  ;;  %v2970_v15 = vsel %vm2962_vm3, %v5685_v60, %v5686_v0  ;;  %5833 = vrot.lane.b32.xlu1 %v5832_v21, %s6122_s30  ;;  %v3208_v39 = vmax.f32 %v3116_v17, %v3120_v44  ;;  %v9867_v53 = vmax.f32 %v7413_v12, 0.0  ;;  %v9869_v41 = vld [vmem:[#allocation41_spill] sm:$0xff] }
 0x2f3   : > { %v3122_v49 = vmax.f32 %v9866_v56, %v5686_v0  ;;  %v8172_v30 = vadd.f32 %v7348_v54, %v2451_v62  ;;  %v2452_v18 = vadd.f32 %v2329_v63, %v8012_v6  ;;  %v3207_v4 = vmax.f32 %v3115_v26, %v3119_v48  ;;  %v2331_v50 = vpop.f32.mrf.mxu0  ;;  %v9868_v26 = vld [vmem:[#allocation36_spill] sm:$0xff] }
 0x2f4   : > { %v3121_v61 = vmax.f32 %v9867_v53, %v2970_v15  ;;  %v9468_v33 = vmax.f32 %v8148_v13, 0.0  ;;  %v5847_v21 = vpack.i.bf16 %v9484_v47, %v9466_v45  ;;  %v2453_v6 = vadd.f32 %v2331_v50, %v8016_v42 }
 0x2f5   : > { %v3210_v29 = vmax.f32 %v3118_v31, %v3122_v49  ;;  %v9485_v12 = vmax.f32 %v8172_v30, 0.0  ;;  %v8184_v44 = vadd.f32 %v7342_v32, %v2452_v18  ;;  %v2050_v48 = vadd.f32 %v7902_v34, %v9868_v26  ;;  %v2335_v11 = vpop.f32.mrf.mxu0  ;;  %v5689_v34 = vpop.permute.xlu0 %5688  ;;  %v9870_v49 = vld [vmem:[#allocation95_spill] sm:$0xff] }
 0x2f6   : > { %v3209_v17 = vmax.f32 %v3117_v25, %v3121_v61  ;;  %v9463_v0 = vmax.f32 %v8157_v23, 0.0  ;;  %v9475_v60 = vmax.f32 %v8162_v20, 0.0  ;;  %5843 = vrot.lane.b32.xlu1 %v5842_v46, %s6122_s30  ;;  %5848 = vrot.lane.b32.xlu0 %v5847_v21, %s6122_s30  ;;  %v2051_v31 = vadd.f32 %v7937_v36, %v8065_v1  ;;  %v5694_v56 = vpop.permute.xlu1 %5693  ;;  %v6023_v46 = vld [vmem:[%s9342_s3 + $0x38] sm:$0xff]  }
 0x2f7   : > { %v8193_v5 = vpack.c.bf16 %v3210_v29, %v3208_v39  ;;  %v2052_v42 = vadd.f32 %v7974_v10, %v9869_v41  ;;  %v8202_v62 = vadd.f32 %v7348_v54, %v2453_v6  ;;  %v1649_v15 = vadd.f32 %v9870_v49, %v7925_v58  ;;  %v2337_v36 = vpop.f32.mrf.mxu0  ;;  %v9871_v39 = vld [vmem:[#allocation40_spill] sm:$0xff]  ;;  %v8222_v58 = vpop.f32.mrf.mxu1 }
 0x2f8   : > { %v8199_v25 = vpack.c.bf16 %v3209_v17, %v3207_v4  ;;  %v2454_v63 = vadd.f32 %v2335_v11, %v8052_v40  ;;  %v5852_v10 = vpack.i.bf16 %v9468_v33, %v9463_v0  ;;  %v5857_v1 = vpack.i.bf16 %v9485_v12, %v9475_v60  ;;  %v6024_v41 = vld [vmem:[%s9342_s3 + $0x30] sm:$0xff]   ;;  %v9931_v12 = vld [vmem:[#allocation71_spill] sm:$0xff] }
 0x2f9   : > { %5272 = vmatprep.mubr.msk.bf16.mxu1 %vm3365_vm4, %v8193_v5  ;;  %v2053_v53 = vadd.f32 %v8022_v52, %v9871_v39  ;;  %v9462_v40 = vmax.f32 %v8184_v44, 0.0  ;;  %v9467_v61 = vmax.f32 %v8202_v62, 0.0  ;;  %v2455_v18 = vadd.f32 %v2337_v36, %v8056_v51  ;;  %v2339_v52 = vpop.f32.mrf.mxu0  ;;  %v8249_v39 = vpop.f32.mrf.mxu1 }
 0x2fa   : > { %3427 = vmatmul.mubr.bf16.vlgmr.msra.gmra.mxu1 %v8199_v25  ;;  %v5691_v4 = vunpack.i.h.bf16 %v5689_v34  ;;  %v5690_v29 = vunpack.i.l.bf16 %v5689_v34  ;;  %v8229_v50 = vadd.f32 %v7342_v32, %v2454_v63  ;;  %v5696_v21 = vunpack.i.h.bf16 %v5694_v56  ;;  %5853 = vrot.lane.b32.xlu1 %v5852_v10, %s6122_s30  ;;  %v5699_v11 = vpop.permute.xlu0 %5698  ;;  %v9872_v34 = vld [vmem:[#allocation42_spill] sm:$0xff] }
 0x2fb   : > { %5858 = vrot.lane.b32.xlu0 %v5857_v1, %s6122_s30  ;;  %v5695_v17 = vunpack.i.l.bf16 %v5694_v56  ;;  %v8234_v6 = vadd.f32 %v7348_v54, %v2455_v18  ;;  %v2456_v26 = vadd.f32 %v2339_v52, %v2050_v48  ;;  %v5862_v51 = vpack.i.bf16 %v9467_v61, %v9462_v40  ;;  %3551 = vmatpush1.bf16.msra.mxu1 %v6023_v46  ;;  %v2341_v10 = vpop.f32.mrf.mxu0  ;;  %v9873_v48 = vld [vmem:[#allocation47_spill] sm:$0xff]  ;;  %v9882_v61 = vld [vmem:[#allocation60_spill] sm:$0xff] }
 0x2fc   : > { %v2054_v49 = vadd.f32 %v8067_v27, %v9872_v34  ;;  %v2055_v56 = vadd.f32 %v8097_v28, %v1649_v15  ;;  %v5701_v63 = vunpack.i.h.bf16 %v5699_v11  ;;  %v5700_v36 = vunpack.i.l.bf16 %v5699_v11  ;;  %3552 = vmatprep.subr.bf16.mxu1 %v9548_v35  ;;  %v9874_v27 = vld [vmem:[#allocation97_spill] sm:$0xff] }
 0x2fd   : > { %v2056_v1 = vadd.f32 %v8122_v59, %v9873_v48  ;;  %v9465_v46 = vmax.f32 %v8234_v6, 0.0  ;;  %v8253_v18 = vadd.f32 %v7342_v32, %v2456_v26  ;;  %v2457_v52 = vadd.f32 %v2341_v10, %v2051_v31  ;;  %v2345_v59 = vpop.f32.mrf.mxu0 }
 0x2fe   : > { %v1653_v34 = vadd.f32 %v9874_v27, %v7929_v8  ;;  %v9875_v28 = vmax.f32 %v7447_v14, 0.0  ;;  %v2971_v11 = vsel %vm2962_vm3, %v5690_v29, %v5691_v4  ;;  %v9464_v40 = vmax.f32 %v8229_v50, 0.0  ;;  %5863 = vrot.lane.b32.xlu1 %v5862_v51, %s6122_s30  ;;  %v5704_v10 = vpop.permute.xlu1 %5703  ;;  %v6025_v14 = vld [vmem:[%s9342_s3 + $0x28] sm:$0xff]  }
 0x2ff   : > { %v2972_v48 = vsel %vm2962_vm3, %v5695_v17, %v5696_v21  ;;  %v2973_v0 = vsel %vm2962_vm3, %v5700_v36, %v5701_v63  ;;  %v8265_v26 = vadd.f32 %v7348_v54, %v2457_v52  ;;  %v2458_v31 = vadd.f32 %v2345_v59, %v2052_v42  ;;  %3553 = vmatpush1.bf16.msra.mxu1 %v6024_v41  ;;  %v2347_v27 = vpop.f32.mrf.mxu0  ;;  %v1961_v42 = vpop.f32.mrf.mxu1 }
 0x300   : > { %v3124_v15 = vmax.f32 %v9875_v28, %v5691_v4  ;;  %v9876_v8 = vmax.f32 %v7493_v3, 0.0  ;;  %v5706_v29 = vunpack.i.h.bf16 %v5704_v10  ;;  %v5705_v51 = vunpack.i.l.bf16 %v5704_v10  ;;  %3554 = vmatprep.subr.bf16.mxu1 %v9548_v35 }
 0x301   : > { %v5867_v17 = vpack.i.bf16 %v9465_v46, %v9464_v40  ;;  %v9877_v41 = vmax.f32 %v7470_v43, 0.0  ;;  %v9469_v52 = vmax.f32 %v8253_v18, 0.0  ;;  %v9472_v28 = vmax.f32 %v8265_v26, 0.0  ;;  %v2349_v43 = vpop.f32.mrf.mxu0 }
 0x302   : > { %v3128_v4 = vmax.f32 %v9876_v8, %v5701_v63  ;;  %v2459_v3 = vadd.f32 %v2347_v27, %v2053_v53  ;;  %v9878_v63 = vmax.f32 %v7484_v9, 0.0  ;;  %v8284_v10 = vadd.f32 %v7342_v32, %v2458_v31  ;;  %v9884_v31 = vld [vmem:[#allocation108_spill] sm:$0xff] }
 0x303   : > { %v3126_v36 = vmax.f32 %v9877_v41, %v5696_v21  ;;  %v9879_v8 = vmax.f32 %v7516_v2, 0.0  ;;  %v2974_v46 = vsel %vm2962_vm3, %v5705_v51, %v5706_v29  ;;  %5868 = vrot.lane.b32.xlu0 %v5867_v17, %s6122_s30  ;;  %v9880_v21 = vld [vmem:[#allocation109_spill] sm:$0xff]  ;;  %v9883_v33 = vmax.f32 %v9882_v61, 0.0  ;;  %3555 = vmatpush1.bf16.msra.mxu1 %v6025_v14  ;;  %v6026_v2 = vld [vmem:[%s9342_s3 + $0x20] sm:$0xff]  }
 0x304   : > { %v3127_v59 = vmax.f32 %v9878_v63, %v2973_v0  ;;  %v9881_v41 = vmax.f32 %v9880_v21, 0.0  ;;  %v8295_v9 = vadd.f32 %v7348_v54, %v2459_v3  ;;  %v2460_v0 = vadd.f32 %v2349_v43, %v2054_v49  ;;  %v2351_v63 = vpop.f32.mrf.mxu0  ;;  %3556 = vmatprep.subr.bf16.mxu1 %v9548_v35  ;;  %v9886_v61 = vld [vmem:[#allocation46_spill] sm:$0xff]  ;;  %v9887_v43 = vld [vmem:[#allocation48_spill] sm:$0xff] }
 0x305   : > { %v3130_v40 = vmax.f32 %v9879_v8, %v5706_v29  ;;  %v3129_v53 = vmax.f32 %v9883_v33, %v2974_v46  ;;  %v9885_v29 = vmax.f32 %v9884_v31, 0.0  ;;  %v3212_v27 = vmax.f32 %v3124_v15, %v3128_v4  ;;  %v1963_v46 = vpop.f32.mrf.mxu1 }
 0x306   : > { %v3125_v45 = vmax.f32 %v9881_v41, %v2972_v48  ;;  %v5872_v33 = vpack.i.bf16 %v9472_v28, %v9469_v52  ;;  %v2057_v49 = vadd.f32 %v8150_v22, %v9886_v61  ;;  %v9474_v14 = vmax.f32 %v8295_v9, 0.0  ;;  %v2355_v4 = vpop.f32.mrf.mxu0  ;;  %v9888_v41 = vld [vmem:[#allocation51_spill] sm:$0xff] }
 0x307   : > { %v3123_v51 = vmax.f32 %v9885_v29, %v2971_v11  ;;  %v3214_v17 = vmax.f32 %v3126_v36, %v3130_v40  ;;  %v2461_v3 = vadd.f32 %v2351_v63, %v2055_v56  ;;  %v9473_v15 = vmax.f32 %v8284_v10, 0.0  ;;  %v5709_v11 = vpop.permute.xlu0 %5708  ;;  %3557 = vmatpush1.bf16.msra.mxu1 %v6026_v2  ;;  %v1965_v63 = vpop.f32.mrf.mxu1 }
 0x308   : > { %v3213_v48 = vmax.f32 %v3125_v45, %v3129_v53  ;;  %v8312_v40 = vadd.f32 %v7342_v32, %v2460_v0  ;;  %5873 = vrot.lane.b32.xlu1 %v5872_v33, %s6122_s30  ;;  %v2058_v22 = vadd.f32 %v8180_v57, %v9887_v43  ;;  %v2059_v45 = vadd.f32 %v8222_v58, %v1653_v34  ;;  %v5714_v0 = vpop.permute.xlu1 %5713  ;;  %v2357_v31 = vpop.f32.mrf.mxu0  ;;  %v9890_v34 = vld [vmem:[#allocation99_spill] sm:$0xff] }
 0x309   : > { %v3211_v8 = vmax.f32 %v3123_v51, %v3127_v59  ;;  %v8315_v36 = vpack.c.bf16 %v3214_v17, %v3212_v27  ;;  %v8321_v21 = vadd.f32 %v7348_v54, %v2461_v3  ;;  %v2462_v56 = vadd.f32 %v2355_v4, %v2056_v1  ;;  %v6027_v59 = vld [vmem:[%s9342_s3 + $0x18] sm:$0xff]   ;;  %3558 = vmatprep.subr.bf16.mxu1 %v9548_v35  ;;  %v9889_v1 = vld [vmem:[#allocation12_spill] sm:$0xff] }
 0x30a   : > { %v2060_v53 = vadd.f32 %v8249_v39, %v9888_v41  ;;  %v5877_v58 = vpack.i.bf16 %v9474_v14, %v9473_v15  ;;  %v1657_v2 = vadd.f32 %v9890_v34, %v9889_v1  ;;  %v5711_v29 = vunpack.i.h.bf16 %v5709_v11  ;;  %v9891_v27 = vld [vmem:[#allocation52_spill] sm:$0xff]  ;;  %v2359_v3 = vpop.f32.mrf.mxu0 }
 0x30b   : > { %5273 = vmatprep.mubr.msk.bf16.mxu1 %vm3365_vm4, %v8315_v36  ;;  %v8330_v57 = vpack.c.bf16 %v3213_v48, %v3211_v8  ;;  %v9471_v39 = vmax.f32 %v8321_v21, 0.0  ;;  %v2463_v51 = vadd.f32 %v2357_v31, %v2057_v49  ;;  %v2061_v17 = vadd.f32 %v1961_v42, %v9891_v27  ;;  %v5719_v41 = vpop.permute.xlu0 %5718  ;;  %3559 = vmatpush1.bf16.msra.mxu1 %v6027_v59  ;;  %v6028_v42 = vld [vmem:[%s9342_s3 + $0x10] sm:$0xff]  }
 0x30c   : > { %v9470_v33 = vmax.f32 %v8312_v40, 0.0  ;;  %v5710_v61 = vunpack.i.l.bf16 %v5709_v11  ;;  %v8343_v48 = vadd.f32 %v7342_v32, %v2462_v56  ;;  %5878 = vrot.lane.b32.xlu0 %v5877_v58, %s6122_s30  ;;  %v5716_v8 = vunpack.i.h.bf16 %v5714_v0  ;;  %v9894_v11 = vld [vmem:[#allocation53_spill] sm:$0xff]  ;;  %v2361_v34 = vpop.f32.mrf.mxu0  ;;  %3560 = vmatprep.subr.bf16.mxu1 %v9548_v35 }
 0x30d   : > { %3435 = vmatmul.mubr.bf16.gmra.mxu1 %v8330_v57  ;;  %v5715_v4 = vunpack.i.l.bf16 %v5714_v0  ;;  %v8348_v43 = vadd.f32 %v7348_v54, %v2463_v51  ;;  %v2464_v49 = vadd.f32 %v2359_v3, %v2058_v22  ;;  %v2062_v56 = vadd.f32 %v1963_v46, %v9894_v11  ;;  %v9895_v22 = vld [vmem:[#allocation62_spill] sm:$0xff] }
 0x30e   : > { %9892 = vst [vmem:[#allocation21_spill] sm:$0xff] %v8343_v48  ;;  %v5721_v31 = vunpack.i.h.bf16 %v5719_v41  ;;  %v5720_v1 = vunpack.i.l.bf16 %v5719_v41  ;;  %v5882_v0 = vpack.i.bf16 %v9471_v39, %v9470_v33  ;;  %v2063_v58 = vadd.f32 %v1965_v63, %v1657_v2  ;;  %v2365_v33 = vpop.f32.mrf.mxu0  ;;  %v9898_v63 = vld [vmem:[#allocation65_spill] sm:$0xff] }
 0x30f   : > { %9893 = vst [vmem:[#allocation83_spill] sm:$0xff] %v8348_v43  ;;  %v9896_v51 = vmax.f32 %v9895_v22, 0.0  ;;  %v9477_v27 = vmax.f32 %v8348_v43, 0.0  ;;  %v2465_v3 = vadd.f32 %v2361_v34, %v2059_v45  ;;  %v2975_v52 = vsel %vm2962_vm3, %v5710_v61, %v5711_v29  ;;  %3561 = vmatpush1.bf16.msra.mxu1 %v6028_v42  ;;  %v6029_v61 = vld [vmem:[%s9342_s3 + $0x8] sm:$0xff]  }
 0x310   : > { %v9476_v46 = vmax.f32 %v8343_v48, 0.0  ;;  %v8365_v41 = vadd.f32 %v7342_v32, %v2464_v49  ;;  %v2977_v11 = vsel %vm2962_vm3, %v5720_v1, %v5721_v31  ;;  %5883 = vrot.lane.b32.xlu1 %v5882_v0, %s6122_s30  ;;  %v2976_v2 = vsel %vm2962_vm3, %v5715_v4, %v5716_v8  ;;  %v9901_v49 = vld [vmem:[#allocation64_spill] sm:$0xff]  ;;  %v2367_v15 = vpop.f32.mrf.mxu0  ;;  %3562 = vmatprep.subr.bf16.mxu1 %v9548_v35 }
 0x311   : > { %v3132_v59 = vmax.f32 %v9896_v51, %v5711_v29  ;;  %v9899_v22 = vmax.f32 %v9898_v63, 0.0  ;;  %v8373_v39 = vadd.f32 %v7348_v54, %v2465_v3  ;;  %v2466_v45 = vadd.f32 %v2365_v33, %v2060_v53  ;;  %v5724_v29 = vpop.permute.xlu1 %5723  ;;  %v9903_v53 = vld [vmem:[#allocation61_spill] sm:$0xff] }
 0x312   : > { %9897 = vst [vmem:[#allocation37_spill] sm:$0xff] %v8365_v41  ;;  %v9902_v1 = vmax.f32 %v9901_v49, 0.0  ;;  %v5726_v0 = vunpack.i.h.bf16 %v5724_v29  ;;  %v5725_v28 = vunpack.i.l.bf16 %v5724_v29  ;;  %v5887_v4 = vpack.i.bf16 %v9477_v27, %v9476_v46 }
 0x313   : > { %v3136_v51 = vmax.f32 %v9899_v22, %v5721_v31  ;;  %9900 = vst [vmem:[#allocation38_spill] sm:$0xff] %v8373_v39  ;;  %v9904_v33 = vmax.f32 %v9903_v53, 0.0  ;;  %v9905_v31 = vld [vmem:[#allocation76_spill] sm:$0xff]  ;;  %v9482_v22 = vmax.f32 %v8373_v39, 0.0  ;;  %v2467_v49 = vadd.f32 %v2367_v15, %v2061_v17  ;;  %v2369_v53 = vpop.f32.mrf.mxu0  ;;  %3563 = vmatpush1.bf16.msra.mxu1 %v6029_v61 }
 0x314   : > { %v3135_v34 = vmax.f32 %v9902_v1, %v2977_v11  ;;  %v9906_v3 = vmax.f32 %v9905_v31, 0.0  ;;  %v9479_v11 = vmax.f32 %v8365_v41, 0.0  ;;  %v8392_v29 = vadd.f32 %v7342_v32, %v2466_v45  ;;  %v9908_v1 = vld [vmem:[#allocation66_spill] sm:$0xff]  ;;  %5888 = vrot.lane.b32.xlu0 %v5887_v4, %s6122_s30  ;;  %3564 = vmatprep.subr.bf16.mxu1 %v9548_v35 }
 0x315   : > { %v3131_v42 = vmax.f32 %v9904_v33, %v2975_v52  ;;  %v9909_v14 = vmax.f32 %v9908_v1, 0.0  ;;  %v2978_v46 = vsel %vm2962_vm3, %v5725_v28, %v5726_v0  ;;  %v9910_v52 = vld [vmem:[#allocation63_spill] sm:$0xff]  ;;  %v8403_v15 = vadd.f32 %v7348_v54, %v2467_v49  ;;  %v2371_v4 = vpop.f32.mrf.mxu0 }
 0x316   : > { %v3134_v63 = vmax.f32 %v9906_v3, %v5716_v8  ;;  %9907 = vst [vmem:[#allocation22_spill] sm:$0xff] %v8392_v29  ;;  %v9911_v33 = vmax.f32 %v9910_v52, 0.0  ;;  %v9912_v8 = vld [vmem:[#allocation78_spill] sm:$0xff]  ;;  %v2468_v17 = vadd.f32 %v2369_v53, %v2062_v56  ;;  %v3216_v28 = vmax.f32 %v3132_v59, %v3136_v51  ;;  %v5734_v1 = vpop.permute.xlu1 %5733 }
 0x317   : > { %v3138_v60 = vmax.f32 %v9909_v14, %v5726_v0  ;;  %v9913_v3 = vmax.f32 %v9912_v8, 0.0  ;;  %9914 = vst [vmem:[#allocation43_spill] sm:$0xff] %v8403_v15  ;;  %v6030_v14 = vld [vmem:[%s9342_s3] sm:$0xff]   ;;  %v3215_v45 = vmax.f32 %v3131_v42, %v3135_v34  ;;  %v9481_v61 = vmax.f32 %v8403_v15, 0.0  ;;  %v5729_v34 = vpop.permute.xlu0 %5728 }
 0x318   : > { %v3133_v31 = vmax.f32 %v9911_v33, %v2976_v2  ;;  %v5892_v2 = vpack.i.bf16 %v9482_v22, %v9479_v11  ;;  %v6031_v56 = vld [vmem:[%s9342_s3 + $0x40] sm:$0x1f]   ;;  %v8418_v49 = vadd.f32 %v7342_v32, %v2468_v17  ;;  %v2469_v59 = vadd.f32 %v2371_v4, %v2063_v58  ;;  %3565 = vmatpush1.bf16.msra.mxu1 %v6030_v14 }
 0x319   : > { %v3137_v27 = vmax.f32 %v9913_v3, %v2978_v46  ;;  %v3218_v0 = vmax.f32 %v3134_v63, %v3138_v60  ;;  %v9478_v60 = vmax.f32 %v8392_v29, 0.0  ;;  %v3548_v58 = vsel %vm3390_vm2, %v6031_v56, 0  ;;  %3580 = vmatprep.subr.bf16.mxu1 %v9548_v35  ;;  %v9947_v29 = vld [vmem:[#allocation89_spill] sm:$0xff]  ;;  %v9979_v15 = vld [vmem:[#allocation10_spill] sm:$0xff] }
 0x31a   : > { %9915 = vst [vmem:[#allocation44_spill] sm:$0xff] %v8418_v49  ;;  %5893 = vrot.lane.b32.xlu1 %v5892_v2, %s6122_s30  ;;  %v8425_v42 = vadd.f32 %v7348_v54, %v2469_v59  ;;  %v5731_v53 = vunpack.i.h.bf16 %v5729_v34  ;;  %v5730_v52 = vunpack.i.l.bf16 %v5729_v34  ;;  %v5736_v8 = vunpack.i.h.bf16 %v5734_v1  ;;  %v9917_v2 = vld [vmem:[#allocation70_spill] sm:$0xff] }
 0x31b   : > { %v3217_v46 = vmax.f32 %v3133_v31, %v3137_v27  ;;  %v8422_v51 = vpack.c.bf16 %v3218_v0, %v3216_v28  ;;  %v5897_v32 = vpack.i.bf16 %v9481_v61, %v9478_v60  ;;  %v9480_v27 = vmax.f32 %v8418_v49, 0.0  ;;  %v5739_v33 = vpop.permute.xlu0 %5738  ;;  %v9963_v49 = vld [vmem:[#allocation7_spill] sm:$0xff] }
 0x31c   : > { %9916 = vst [vmem:[#allocation49_spill] sm:$0xff] %v8425_v42  ;;  %v9483_v54 = vmax.f32 %v8425_v42, 0.0  ;;  %3581 = vmatpush2.bf16.msra.mxu1 %v3548_v58  ;;  %v5735_v3 = vunpack.i.l.bf16 %v5734_v1  ;;  %v5741_v17 = vunpack.i.h.bf16 %v5739_v33  ;;  %v5740_v14 = vunpack.i.l.bf16 %v5739_v33  ;;  %v9921_v33 = vld [vmem:[#allocation68_spill] sm:$0xff] }
 0x31d   : > { %v8427_v63 = vpack.c.bf16 %v3217_v46, %v3215_v45  ;;  %5274 = vmatprep.mubr.msk.bf16.mxu1 %vm3365_vm4, %v8422_v51  ;;  %5359 = vmatprep.mubr.msk.bf16.mxu0 %vm3365_vm4, %v8422_v51  ;;  %v2979_v28 = vsel %vm2962_vm3, %v5730_v52, %v5731_v53  ;;  %v9918_v56 = vmax.f32 %v9917_v2, 0.0  ;;  %v9922_v60 = vmax.f32 %v9921_v33, 0.0 }
 0x31e   : > { %5898 = vrot.lane.b32.xlu0 %v5897_v32, %s6122_s30  ;;  %v5902_v31 = vpack.i.bf16 %v9483_v54, %v9480_v27  ;;  %3725 = vmatprep.subr.bf16.mxu1 %v9548_v35  ;;  %v2981_v45 = vsel %vm2962_vm3, %v5740_v14, %v5741_v17  ;;  %v5744_v0 = vpop.permute.xlu1 %5743  ;;  %v2980_v4 = vsel %vm2962_vm3, %v5735_v3, %v5736_v8  ;;  %v9919_v32 = vld [vmem:[#allocation82_spill] sm:$0xff]  ;;  %v9923_v27 = vld [vmem:[#allocation69_spill] sm:$0xff]  ;;  %v9925_v14 = vld [vmem:[#allocation72_spill] sm:$0xff]  ;;  %v9991_v39 = vmax.f32 %v8090_v7, 0.0 }
 0x31f   : > { %3443 = vmatmul.mubr.bf16.gmra.mxu1 %v8427_v63  ;;  %3949 = vmatmul.mubr.bf16.vlgmr.msra.gmra.mxu0 %v8427_v63  ;;  %v3144_v46 = vmax.f32 %v9918_v56, %v5741_v17  ;;  %v5746_v59 = vunpack.i.h.bf16 %v5744_v0  ;;  %v5745_v34 = vunpack.i.l.bf16 %v5744_v0  ;;  %v9920_v58 = vmax.f32 %v9919_v32, 0.0  ;;  %v9927_v3 = vld [vmem:[#allocation67_spill] sm:$0xff]  ;;  %v9929_v17 = vld [vmem:[#allocation81_spill] sm:$0xff] }
 0x320   : > { %5903 = vrot.lane.b32.xlu1 %v5902_v31, %s6122_s30  ;;  %v3140_v11 = vmax.f32 %v9922_v60, %v5731_v53  ;;  %v9924_v31 = vmax.f32 %v9923_v27, 0.0  ;;  %v9926_v22 = vmax.f32 %v9925_v14, 0.0  ;;  %v9928_v47 = vmax.f32 %v9927_v3, 0.0  ;;  %v9933_v14 = vld [vmem:[#allocation73_spill] sm:$0xff] }
 0x321   : > { %v3143_v1 = vmax.f32 %v9920_v58, %v2981_v45  ;;  %v2982_v54 = vsel %vm2962_vm3, %v5745_v34, %v5746_v59  ;;  %v9930_v56 = vmax.f32 %v9929_v17, 0.0  ;;  %v9932_v32 = vmax.f32 %v9931_v12, 0.0 }
 0x322   : > { %v3142_v61 = vmax.f32 %v9924_v31, %v5736_v8  ;;  %v3146_v52 = vmax.f32 %v9926_v22, %v5746_v59  ;;  %v3139_v2 = vmax.f32 %v9928_v47, %v2979_v28  ;;  %v3220_v58 = vmax.f32 %v3140_v11, %v3144_v46  ;;  %v5749_v22 = vpop.permute.xlu0 %5748 }
 0x323   : > { %v3141_v0 = vmax.f32 %v9930_v56, %v2980_v4  ;;  %v3145_v45 = vmax.f32 %v9932_v32, %v2982_v54  ;;  %v5751_v12 = vunpack.i.h.bf16 %v5749_v22  ;;  %v5750_v11 = vunpack.i.l.bf16 %v5749_v22  ;;  %v9935_v56 = vld [vmem:[#allocation88_spill] sm:$0xff] }
 0x324   : > { %v3222_v33 = vmax.f32 %v3142_v61, %v3146_v52  ;;  %v3219_v60 = vmax.f32 %v3139_v2, %v3143_v1  ;;  %v9934_v52 = vmax.f32 %v9933_v14, 0.0 }
 0x325   : > { %v3221_v53 = vmax.f32 %v3141_v0, %v3145_v45  ;;  %v2983_v34 = vsel %vm2962_vm3, %v5750_v11, %v5751_v12  ;;  %v9936_v0 = vmax.f32 %v9935_v56, 0.0  ;;  %v9937_v45 = vld [vmem:[#allocation2_spill] sm:$0xff]  ;;  %v9948_v56 = vmax.f32 %v9947_v29, 0.0 }
 0x326   : > { %v8470_v27 = vpack.c.bf16 %v3222_v33, %v3220_v58  ;;  %v5754_v47 = vpop.permute.xlu1 %5753  ;;  %v9938_v58 = vmax.f32 %v9937_v45, 0.0 }
 0x327   : > { %v8472_v8 = vpack.c.bf16 %v3221_v53, %v3219_v60  ;;  %v5756_v54 = vunpack.i.h.bf16 %v5754_v47  ;;  %v5755_v28 = vunpack.i.l.bf16 %v5754_v47  ;;  %v9939_v60 = vld [vmem:[#allocation3_spill] sm:$0xff]  ;;  %v9941_v47 = vld [vmem:[#allocation4_spill] sm:$0xff] }
 0x328   : > { %5275 = vmatprep.mubr.msk.bf16.mxu1 %vm3365_vm4, %v8470_v27  ;;  %5360 = vmatprep.mubr.msk.bf16.mxu0 %vm3365_vm4, %v8470_v27  ;;  %v3148_v33 = vmax.f32 %v9938_v58, %v5751_v12  ;;  %v9940_v53 = vmax.f32 %v9939_v60, 0.0 }
 0x329   : > { %3451 = vmatmul.mubr.bf16.gmra.mxu1 %v8472_v8  ;;  %3957 = vmatmul.mubr.bf16.gmra.mxu0 %v8472_v8  ;;  %v2984_v31 = vsel %vm2962_vm3, %v5755_v28, %v5756_v54  ;;  %v9943_v28 = vld [vmem:[#allocation85_spill] sm:$0xff] }
 0x32a   : > { %v5759_v61 = vpop.permute.xlu0 %5758  ;;  %v3150_v22 = vmax.f32 %v9940_v53, %v5756_v54  ;;  %v9944_v48 = vmax.f32 %v9943_v28, 0.0 }
 0x32b   : > { %v5761_v4 = vunpack.i.h.bf16 %v5759_v61  ;;  %v5760_v46 = vunpack.i.l.bf16 %v5759_v61  ;;  %v9942_v61 = vmax.f32 %v9941_v47, 0.0 }
 0x32c   : > { %v3147_v14 = vmax.f32 %v9944_v48, %v2983_v34 }
 0x32d   : > { %v2985_v59 = vsel %vm2962_vm3, %v5760_v46, %v5761_v4  ;;  %v3152_v3 = vmax.f32 %v9934_v52, %v5761_v4  ;;  %v9945_v4 = vld [vmem:[#allocation86_spill] sm:$0xff] }
 0x32e   : > { %v5764_v1 = vpop.permute.xlu1 %5763  ;;  %v3151_v32 = vmax.f32 %v9936_v0, %v2985_v59  ;;  %v9946_v52 = vmax.f32 %v9945_v4, 0.0 }
 0x32f   : > { %v5766_v2 = vunpack.i.h.bf16 %v5764_v1  ;;  %v5765_v17 = vunpack.i.l.bf16 %v5764_v1  ;;  %v3224_v0 = vmax.f32 %v3148_v33, %v3152_v3 }
 0x330   : > { %v3149_v1 = vmax.f32 %v9946_v52, %v2984_v31  ;;  %v3223_v12 = vmax.f32 %v3147_v14, %v3151_v32  ;;  %v9951_v52 = vld [vmem:[#allocation74_spill] sm:$0xff] }
 0x331   : > { %v3154_v11 = vmax.f32 %v9942_v61, %v5766_v2  ;;  %v2986_v46 = vsel %vm2962_vm3, %v5765_v17, %v5766_v2 }
 0x332   : > { %v3153_v59 = vmax.f32 %v9948_v56, %v2986_v46  ;;  %v5769_v53 = vpop.permute.xlu0 %5768 }
 0x333   : > { %v3226_v45 = vmax.f32 %v3150_v22, %v3154_v11  ;;  %v5771_v29 = vunpack.i.h.bf16 %v5769_v53  ;;  %v5770_v34 = vunpack.i.l.bf16 %v5769_v53  ;;  %v9949_v11 = vld [vmem:[#allocation94_spill] sm:$0xff] }
 0x334   : > { %v3225_v58 = vmax.f32 %v3149_v1, %v3153_v59  ;;  %v9950_v46 = vmax.f32 %v9949_v11, 0.0  ;;  %v9952_v1 = vmax.f32 %v9951_v52, 0.0  ;;  %v9953_v59 = vld [vmem:[#allocation91_spill] sm:$0xff]  ;;  %v9964_v52 = vmax.f32 %v9963_v49, 0.0 }
 0x335   : > { %v8500_v60 = vpack.c.bf16 %v3226_v45, %v3224_v0  ;;  %v2987_v22 = vsel %vm2962_vm3, %v5770_v34, %v5771_v29  ;;  %v9954_v0 = vmax.f32 %v9953_v59, 0.0 }
 0x336   : > { %v8502_v54 = vpack.c.bf16 %v3225_v58, %v3223_v12  ;;  %v5774_v48 = vpop.permute.xlu1 %5773  ;;  %v9955_v12 = vld [vmem:[#allocation92_spill] sm:$0xff] }
 0x337   : > { %5276 = vmatprep.mubr.msk.bf16.mxu1 %vm3365_vm4, %v8500_v60  ;;  %5361 = vmatprep.mubr.msk.bf16.mxu0 %vm3365_vm4, %v8500_v60  ;;  %v5776_v3 = vunpack.i.h.bf16 %v5774_v48  ;;  %v5775_v2 = vunpack.i.l.bf16 %v5774_v48  ;;  %v3156_v45 = vmax.f32 %v9954_v0, %v5771_v29  ;;  %v9956_v58 = vmax.f32 %v9955_v12, 0.0  ;;  %v9957_v48 = vld [vmem:[#allocation39_spill] sm:$0xff] }
 0x338   : > { %3459 = vmatmul.mubr.bf16.gmra.mxu1 %v8502_v54  ;;  %3965 = vmatmul.mubr.bf16.gmra.mxu0 %v8502_v54 }
 0x339   : > { %v2988_v61 = vsel %vm2962_vm3, %v5775_v2, %v5776_v3  ;;  %v3158_v53 = vmax.f32 %v9956_v58, %v5776_v3  ;;  %v9959_v2 = vld [vmem:[#allocation5_spill] sm:$0xff] }
 0x33a   : > { %v5779_v31 = vpop.permute.xlu0 %5778  ;;  %v9960_v41 = vmax.f32 %v9959_v2, 0.0 }
 0x33b   : > { %v5781_v17 = vunpack.i.h.bf16 %v5779_v31  ;;  %v5780_v32 = vunpack.i.l.bf16 %v5779_v31  ;;  %v9958_v31 = vmax.f32 %v9957_v48, 0.0 }
 0x33c   : > { %v3155_v11 = vmax.f32 %v9960_v41, %v2987_v22 }
 0x33d   : > { %v2989_v33 = vsel %vm2962_vm3, %v5780_v32, %v5781_v17  ;;  %v3160_v28 = vmax.f32 %v9950_v46, %v5781_v17  ;;  %v9961_v17 = vld [vmem:[#allocation6_spill] sm:$0xff] }
 0x33e   : > { %v5784_v47 = vpop.permute.xlu1 %5783  ;;  %v3159_v56 = vmax.f32 %v9952_v1, %v2989_v33  ;;  %v9962_v46 = vmax.f32 %v9961_v17, 0.0 }
 0x33f   : > { %v5786_v14 = vunpack.i.h.bf16 %v5784_v47  ;;  %v5785_v4 = vunpack.i.l.bf16 %v5784_v47  ;;  %v3228_v1 = vmax.f32 %v3156_v45, %v3160_v28 }
 0x340   : > { %v3157_v47 = vmax.f32 %v9962_v46, %v2988_v61  ;;  %v3227_v29 = vmax.f32 %v3155_v11, %v3159_v56  ;;  %v9967_v46 = vld [vmem:[#allocation75_spill] sm:$0xff] }
 0x341   : > { %v3162_v34 = vmax.f32 %v9958_v31, %v5786_v14  ;;  %v2990_v32 = vsel %vm2962_vm3, %v5785_v4, %v5786_v14 }
 0x342   : > { %v3161_v33 = vmax.f32 %v9964_v52, %v2990_v32  ;;  %v5789_v58 = vpop.permute.xlu0 %5788 }
 0x343   : > { %v3230_v59 = vmax.f32 %v3158_v53, %v3162_v34  ;;  %v5791_v49 = vunpack.i.h.bf16 %v5789_v58  ;;  %v5790_v22 = vunpack.i.l.bf16 %v5789_v58  ;;  %v9965_v34 = vld [vmem:[#allocation98_spill] sm:$0xff] }
 0x344   : > { %v3229_v0 = vmax.f32 %v3157_v47, %v3161_v33  ;;  %v9966_v32 = vmax.f32 %v9965_v34, 0.0  ;;  %v9968_v47 = vmax.f32 %v9967_v46, 0.0  ;;  %v9969_v33 = vld [vmem:[#allocation96_spill] sm:$0xff]  ;;  %v9980_v46 = vmax.f32 %v9979_v15, 0.0 }
 0x345   : > { %v8530_v12 = vpack.c.bf16 %v3230_v59, %v3228_v1  ;;  %v2991_v53 = vsel %vm2962_vm3, %v5790_v22, %v5791_v49  ;;  %v9970_v1 = vmax.f32 %v9969_v33, 0.0 }
 0x346   : > { %v8532_v3 = vpack.c.bf16 %v3229_v0, %v3227_v29  ;;  %v5794_v41 = vpop.permute.xlu1 %5793  ;;  %v9971_v29 = vld [vmem:[#allocation45_spill] sm:$0xff] }
 0x347   : > { %5277 = vmatprep.mubr.msk.bf16.mxu1 %vm3365_vm4, %v8530_v12  ;;  %5362 = vmatprep.mubr.msk.bf16.mxu0 %vm3365_vm4, %v8530_v12  ;;  %v5796_v28 = vunpack.i.h.bf16 %v5794_v41  ;;  %v5795_v14 = vunpack.i.l.bf16 %v5794_v41  ;;  %v3164_v59 = vmax.f32 %v9970_v1, %v5791_v49  ;;  %v9972_v0 = vmax.f32 %v9971_v29, 0.0  ;;  %v9973_v41 = vld [vmem:[#allocation11_spill] sm:$0xff] }
 0x348   : > { %3467 = vmatmul.mubr.bf16.gmra.mxu1 %v8532_v3  ;;  %3973 = vmatmul.mubr.bf16.gmra.mxu0 %v8532_v3 }
 0x349   : > { %v2992_v31 = vsel %vm2962_vm3, %v5795_v14, %v5796_v28  ;;  %v3166_v58 = vmax.f32 %v9972_v0, %v5796_v28  ;;  %v9975_v14 = vld [vmem:[#allocation8_spill] sm:$0xff] }
 0x34a   : > { %v5799_v61 = vpop.permute.xlu0 %5798  ;;  %v9976_v43 = vmax.f32 %v9975_v14, 0.0 }
 0x34b   : > { %v5801_v4 = vunpack.i.h.bf16 %v5799_v61  ;;  %v5800_v56 = vunpack.i.l.bf16 %v5799_v61  ;;  %v9974_v61 = vmax.f32 %v9973_v41, 0.0 }
 0x34c   : > { %v3163_v34 = vmax.f32 %v9976_v43, %v2991_v53 }
 0x34d   : > { %v2993_v45 = vsel %vm2962_vm3, %v5800_v56, %v5801_v4  ;;  %v3168_v2 = vmax.f32 %v9966_v32, %v5801_v4  ;;  %v9977_v4 = vld [vmem:[#allocation9_spill] sm:$0xff] }
 0x34e   : > { %v3167_v52 = vmax.f32 %v9968_v47, %v2993_v45  ;;  %v9978_v32 = vmax.f32 %v9977_v4, 0.0 }
 0x34f   : > { %v5804_v48 = vpop.permute.xlu1 %5803  ;;  %v3232_v47 = vmax.f32 %v3164_v59, %v3168_v2 }
 0x350   : > { %v5806_v11 = vunpack.i.h.bf16 %v5804_v48  ;;  %v5805_v17 = vunpack.i.l.bf16 %v5804_v48  ;;  %v3165_v48 = vmax.f32 %v9978_v32, %v2992_v31  ;;  %v3231_v49 = vmax.f32 %v3163_v34, %v3167_v52 }
 0x352   : > { %v3170_v22 = vmax.f32 %v9974_v61, %v5806_v11  ;;  %v2994_v56 = vsel %vm2962_vm3, %v5805_v17, %v5806_v11  ;;  %v5809_v0 = vpop.permute.xlu0 %5808 }
 0x353   : > { %v3169_v45 = vmax.f32 %v9980_v46, %v2994_v56  ;;  %v5811_v15 = vunpack.i.h.bf16 %v5809_v0  ;;  %v5810_v53 = vunpack.i.l.bf16 %v5809_v0  ;;  %v9981_v56 = vld [vmem:[#allocation19_spill] sm:$0xff] }
 0x354   : > { %v3234_v33 = vmax.f32 %v3166_v58, %v3170_v22  ;;  %v9982_v14 = vmax.f32 %v9981_v56, 0.0 }
 0x355   : > { %v3233_v1 = vmax.f32 %v3165_v48, %v3169_v45  ;;  %v2995_v58 = vsel %vm2962_vm3, %v5810_v53, %v5811_v15  ;;  %v9983_v48 = vld [vmem:[#allocation13_spill] sm:$0xff] }
 0x356   : > { %v8560_v29 = vpack.c.bf16 %v3234_v33, %v3232_v47  ;;  %v9984_v46 = vmax.f32 %v9983_v48, 0.0  ;;  %v9985_v47 = vld [vmem:[#allocation80_spill] sm:$0xff]  ;;  %v9994_v48 = vmax.f32 %v8077_v55, 0.0 }
 0x357   : > { %v8562_v28 = vpack.c.bf16 %v3233_v1, %v3231_v49  ;;  %v5814_v43 = vpop.permute.xlu1 %5813  ;;  %v9986_v33 = vmax.f32 %v9985_v47, 0.0  ;;  %v9987_v1 = vld [vmem:[#allocation77_spill] sm:$0xff] }
 0x358   : > { %5278 = vmatprep.mubr.msk.bf16.mxu1 %vm3365_vm4, %v8560_v29  ;;  %5363 = vmatprep.mubr.msk.bf16.mxu0 %vm3365_vm4, %v8560_v29  ;;  %v5816_v2 = vunpack.i.h.bf16 %v5814_v43  ;;  %v5815_v11 = vunpack.i.l.bf16 %v5814_v43  ;;  %v3172_v45 = vmax.f32 %v9984_v46, %v5811_v15  ;;  %v9988_v0 = vmax.f32 %v9987_v1, 0.0 }
 0x359   : > { %3475 = vmatmul.mubr.bf16.gmra.mxu1 %v8562_v28  ;;  %3981 = vmatmul.mubr.bf16.gmra.mxu0 %v8562_v28 }
 0x35a   : > { %v2996_v22 = vsel %vm2962_vm3, %v5815_v11, %v5816_v2  ;;  %v3171_v43 = vmax.f32 %v9988_v0, %v2995_v58 }
 0x35b   : > { %v5819_v31 = vpop.permute.xlu0 %5818 }
 0x35c   : > { %v5821_v17 = vunpack.i.h.bf16 %v5819_v31  ;;  %v5820_v52 = vunpack.i.l.bf16 %v5819_v31  ;;  %v9989_v31 = vld [vmem:[#allocation79_spill] sm:$0xff] }
 0x35d   : > { %v9990_v53 = vmax.f32 %v9989_v31, 0.0 }
 0x35e   : > { %v2997_v59 = vsel %vm2962_vm3, %v5820_v52, %v5821_v17  ;;  %v3176_v34 = vmax.f32 %v9982_v14, %v5821_v17  ;;  %v9992_v17 = vld [vmem:[#allocation14_spill] sm:$0xff] }
 0x35f   : > { %v5824_v61 = vpop.permute.xlu0 %5823  ;;  %v3175_v49 = vmax.f32 %v9986_v33, %v2997_v59  ;;  %v3174_v52 = vmax.f32 %v9990_v53, %v5816_v2  ;;  %v9993_v14 = vmax.f32 %v9992_v17, 0.0 }
 0x360   : > { %v5829_v41 = vpop.permute.xlu1 %5828  ;;  %v5826_v46 = vunpack.i.h.bf16 %v5824_v61  ;;  %v5825_v47 = vunpack.i.l.bf16 %v5824_v61  ;;  %v3236_v1 = vmax.f32 %v3172_v45, %v3176_v34  ;;  %v9995_v34 = vmax.f32 %v8041_v38, 0.0  ;;  %v10000_v38 = vld [vmem:[#allocation16_spill] sm:$0xff] }
 0x361   : > { %v5831_v4 = vunpack.i.h.bf16 %v5829_v41  ;;  %v5830_v32 = vunpack.i.l.bf16 %v5829_v41  ;;  %v3173_v41 = vmax.f32 %v9993_v14, %v2996_v22  ;;  %v3235_v2 = vmax.f32 %v3171_v43, %v3175_v49  ;;  %v9996_v43 = vld [vmem:[#allocation15_spill] sm:$0xff]  ;;  %v9998_v14 = vld [vmem:[#allocation20_spill] sm:$0xff] }
 0x363   : > { %v3178_v11 = vmax.f32 %v9991_v39, %v5831_v4  ;;  %v2998_v56 = vsel %vm2962_vm3, %v5830_v32, %v5831_v4  ;;  %v5839_v33 = vpop.permute.xlu0 %5838  ;;  %v2963_v4 = vsel %vm2962_vm3, %v5825_v47, %v5826_v46 }
 0x364   : > { %v3177_v15 = vmax.f32 %v9994_v48, %v2998_v56  ;;  %v5834_v59 = vpop.permute.xlu1 %5833  ;;  %v5841_v7 = vunpack.i.h.bf16 %v5839_v33  ;;  %v5840_v39 = vunpack.i.l.bf16 %v5839_v33 }
 0x365   : > { %v3238_v58 = vmax.f32 %v3174_v52, %v3178_v11  ;;  %v5836_v0 = vunpack.i.h.bf16 %v5834_v59  ;;  %v5835_v31 = vunpack.i.l.bf16 %v5834_v59  ;;  %v9997_v11 = vmax.f32 %v9996_v43, 0.0  ;;  %v10002_v59 = vld [vmem:[#allocation18_spill] sm:$0xff] }
 0x366   : > { %v3237_v53 = vmax.f32 %v3173_v41, %v3177_v15  ;;  %v2965_v22 = vsel %vm2962_vm3, %v5840_v39, %v5841_v7  ;;  %v3112_v45 = vmax.f32 %v9995_v34, %v5841_v7  ;;  %v9999_v41 = vmax.f32 %v9998_v14, 0.0 }
 0x367   : > { %v8590_v42 = vpack.c.bf16 %v3238_v58, %v3236_v1  ;;  %v2964_v61 = vsel %vm2962_vm3, %v5835_v31, %v5836_v0  ;;  %v3108_v17 = vmax.f32 %v9997_v11, %v5826_v46  ;;  %v10001_v15 = vmax.f32 %v10000_v38, 0.0 }
 0x368   : > { %v5844_v55 = vpop.permute.xlu1 %5843  ;;  %v5849_v32 = vpop.permute.xlu0 %5848  ;;  %v8594_v56 = vpack.c.bf16 %v3237_v53, %v3235_v2  ;;  %v3111_v48 = vmax.f32 %v9999_v41, %v2965_v22  ;;  %v10003_v33 = vmax.f32 %v10002_v59, 0.0  ;;  %v10004_v58 = vmax.f32 %v8070_v24, 0.0  ;;  %v10005_v53 = vld [vmem:[#allocation17_spill] sm:$0xff] }
 0x369   : > { %v5846_v52 = vunpack.i.h.bf16 %v5844_v55  ;;  %v5845_v49 = vunpack.i.l.bf16 %v5844_v55  ;;  %5279 = vmatprep.mubr.msk.bf16.mxu1 %vm3365_vm4, %v8590_v42  ;;  %5364 = vmatprep.mubr.msk.bf16.mxu0 %vm3365_vm4, %v8590_v42  ;;  %v3107_v47 = vmax.f32 %v10001_v15, %v2963_v4  ;;  %v10006_v46 = vmax.f32 %v10005_v53, 0.0 }
 0x36a   : > { %3483 = vmatmul.mubr.bf16.gmra.mxu1 %v8594_v56  ;;  %3989 = vmatmul.mubr.bf16.gmra.mxu0 %v8594_v56  ;;  %v3110_v1 = vmax.f32 %v10003_v33, %v5836_v0  ;;  %v10007_v39 = vmax.f32 %v8087_v19, 0.0  ;;  %v5851_v55 = vunpack.i.h.bf16 %v5849_v32  ;;  %v5850_v34 = vunpack.i.l.bf16 %v5849_v32 }
 0x36b   : > { %v3114_v31 = vmax.f32 %v10004_v58, %v5846_v52  ;;  %v2966_v2 = vsel %vm2962_vm3, %v5845_v49, %v5846_v52  ;;  %v3109_v7 = vmax.f32 %v10006_v46, %v2964_v61  ;;  %v3204_v14 = vmax.f32 %v3108_v17, %v3112_v45  ;;  %v6032_v61 = vld [vmem:[%s9342_s3 + $0xc8] sm:$0xff]  }
 0x36c   : > { %v3113_v22 = vmax.f32 %v10007_v39, %v2966_v2  ;;  %v5854_v43 = vpop.permute.xlu1 %5853  ;;  %v3203_v0 = vmax.f32 %v3107_v47, %v3111_v48  ;;  %v2999_v19 = vsel %vm2962_vm3, %v5850_v34, %v5851_v55  ;;  %v10008_v17 = vmax.f32 %v8172_v30, 0.0 }
 0x36d   : > { %v5859_v11 = vpop.permute.xlu0 %5858  ;;  %v3206_v4 = vmax.f32 %v3110_v1, %v3114_v31  ;;  %v5856_v41 = vunpack.i.h.bf16 %v5854_v43  ;;  %v5855_v38 = vunpack.i.l.bf16 %v5854_v43  ;;  %v10009_v58 = vmax.f32 %v8107_v37, 0.0  ;;  %v6033_v37 = vld [vmem:[%s9342_s3 + $0xc0] sm:$0xff]  }
 0x36e   : > { %v3205_v15 = vmax.f32 %v3109_v7, %v3113_v22  ;;  %v5861_v24 = vunpack.i.h.bf16 %v5859_v11  ;;  %v5860_v59 = vunpack.i.l.bf16 %v5859_v11  ;;  %v10010_v2 = vmax.f32 %v8162_v20, 0.0 }
 0x36f   : > { %v3252_v33 = vpack.c.bf16 %v3206_v4, %v3204_v14  ;;  %v3000_v45 = vsel %vm2962_vm3, %v5855_v38, %v5856_v41  ;;  %v3180_v31 = vmax.f32 %v10009_v58, %v5851_v55  ;;  %v10011_v46 = vmax.f32 %v8148_v13, 0.0 }
 0x370   : > { %v3251_v52 = vpack.c.bf16 %v3205_v15, %v3203_v0  ;;  %v3001_v32 = vsel %vm2962_vm3, %v5860_v59, %v5861_v24  ;;  %v5864_v49 = vpop.permute.xlu1 %5863  ;;  %v3184_v1 = vmax.f32 %v10008_v17, %v5861_v24  ;;  %v10012_v39 = vmax.f32 %v8202_v62, 0.0 }
 0x371   : > { %v5866_v48 = vunpack.i.h.bf16 %v5864_v49  ;;  %v5865_v47 = vunpack.i.l.bf16 %v5864_v49  ;;  %5289 = vmatprep.mubr.msk.bf16.mxu1 %vm3365_vm4, %v3252_v33  ;;  %v3183_v53 = vmax.f32 %v10010_v2, %v3001_v32  ;;  %v3182_v7 = vmax.f32 %v10011_v46, %v5856_v41  ;;  %v6036_v32 = vld [vmem:[%s9342_s3 + $0xa8] sm:$0xff]  }
 0x372   : > { %3583 = vmatmul.mubr.bf16.vlgmr.msra.gmra.mxu1 %v3251_v52  ;;  %v10013_v20 = vmax.f32 %v8133_v16, 0.0  ;;  %v10014_v34 = vmax.f32 %v8157_v23, 0.0  ;;  %v10015_v43 = vmax.f32 %v8184_v44, 0.0  ;;  %v3240_v11 = vmax.f32 %v3180_v31, %v3184_v1  ;;  %v6034_v16 = vld [vmem:[%s9342_s3 + $0xb8] sm:$0xff]   ;;  %v6035_v44 = vld [vmem:[%s9342_s3 + $0xb0] sm:$0xff]  }
 0x373   : > { %v3186_v22 = vmax.f32 %v10012_v39, %v5866_v48  ;;  %v3002_v30 = vsel %vm2962_vm3, %v5865_v47, %v5866_v48  ;;  %5290 = vmatprep.mubr.msk.bf16.mxu1 %vm3365_vm4, %v8193_v5  ;;  %3726 = vmatpush1.bf16.msra.mxu1 %v6032_v61  ;;  %v10016_v1 = vmax.f32 %v8295_v9, 0.0  ;;  %v10017_v31 = vmax.f32 %v8234_v6, 0.0  ;;  %v6037_v6 = vld [vmem:[%s9342_s3 + $0xa0] sm:$0xff]  }
 0x374   : > { %v3179_v55 = vmax.f32 %v10013_v20, %v2999_v19  ;;  %v3181_v13 = vmax.f32 %v10014_v34, %v3000_v45  ;;  %v3185_v62 = vmax.f32 %v10015_v43, %v3002_v30  ;;  %3727 = vmatprep.subr.bf16.mxu1 %v9548_v35  ;;  %v10022_v20 = vmax.f32 %v8253_v18, 0.0  ;;  %v6039_v18 = vld [vmem:[%s9342_s3 + $0x90] sm:$0xff]  }
 0x375   : > { %v3242_v14 = vmax.f32 %v3182_v7, %v3186_v22  ;;  %v5869_v38 = vpop.permute.xlu0 %5868  ;;  %v10019_v7 = vmax.f32 %v8265_v26, 0.0  ;;  %v10020_v22 = vmax.f32 %v8321_v21, 0.0 }
 0x376   : > { %v3239_v4 = vmax.f32 %v3179_v55, %v3183_v53  ;;  %v3241_v5 = vmax.f32 %v3181_v13, %v3185_v62  ;;  %v5871_v15 = vunpack.i.h.bf16 %v5869_v38  ;;  %v5870_v24 = vunpack.i.l.bf16 %v5869_v38 }
 0x377   : > { %v8650_v41 = vpack.c.bf16 %v3242_v14, %v3240_v11  ;;  %3728 = vmatpush1.bf16.msra.mxu1 %v6033_v37  ;;  %v10018_v53 = vmax.f32 %v8284_v10, 0.0  ;;  %v10021_v10 = vmax.f32 %v8229_v50, 0.0  ;;  %v10023_v55 = vmax.f32 %v8312_v40, 0.0  ;;  %v6038_v50 = vld [vmem:[%s9342_s3 + $0x98] sm:$0xff]   ;;  %v6040_v40 = vld [vmem:[%s9342_s3 + $0xd0] sm:$0x1f]  }
 0x378   : > { %v8655_v0 = vpack.c.bf16 %v3241_v5, %v3239_v4  ;;  %3729 = vmatprep.subr.bf16.mxu1 %v9548_v35  ;;  %v3003_v49 = vsel %vm2962_vm3, %v5870_v24, %v5871_v15  ;;  %v3188_v2 = vmax.f32 %v10017_v31, %v5871_v15  ;;  %v3723_v4 = vsel %vm3390_vm2, %v6040_v40, 0  ;;  %v6041_v5 = vld [vmem:[%s9342_s3 + $0x158] sm:$0xff]   ;;  %v6047_v24 = vld [vmem:[%s9342_s3 + $0x128] sm:$0xff]  }
 0x379   : > { %5365 = vmatprep.mubr.msk.bf16.mxu0 %vm3365_vm4, %v8650_v41  ;;  %v3187_v9 = vmax.f32 %v10021_v10, %v3003_v49  ;;  %v6045_v15 = vld [vmem:[%s9342_s3 + $0x138] sm:$0xff]  }
 0x37a   : > { %v5874_v23 = vpop.permute.xlu1 %5873  ;;  %3591 = vmatmul.mubr.bf16.gmra.mxu1 %v8199_v25  ;;  %3997 = vmatmul.mubr.bf16.gmra.mxu0 %v8655_v0 }
 0x37b   : > { %5291 = vmatprep.mubr.msk.bf16.mxu1 %vm3365_vm4, %v8315_v36  ;;  %3730 = vmatpush1.bf16.msra.mxu1 %v6034_v16  ;;  %v5876_v33 = vunpack.i.h.bf16 %v5874_v23  ;;  %v5875_v61 = vunpack.i.l.bf16 %v5874_v23  ;;  %v6042_v16 = vld [vmem:[%s9342_s3 + $0x150] sm:$0xff]  }
 0x37c   : > { %3731 = vmatprep.subr.bf16.mxu1 %v9548_v35 }
 0x37d   : > { %v3004_v17 = vsel %vm2962_vm3, %v5875_v61, %v5876_v33  ;;  %v3190_v39 = vmax.f32 %v10019_v7, %v5876_v33  ;;  %v6048_v33 = vld [vmem:[%s9342_s3 + $0x120] sm:$0xff]  }
 0x37e   : > { %v5879_v59 = vpop.permute.xlu0 %5878  ;;  %v3189_v26 = vmax.f32 %v10022_v20, %v3004_v17 }
 0x37f   : > { %v5881_v52 = vunpack.i.h.bf16 %v5879_v59  ;;  %v5880_v19 = vunpack.i.l.bf16 %v5879_v59  ;;  %3732 = vmatpush1.bf16.msra.mxu1 %v6035_v44 }
 0x380   : > { %3733 = vmatprep.subr.bf16.mxu1 %v9548_v35 }
 0x381   : > { %v3005_v25 = vsel %vm2962_vm3, %v5880_v19, %v5881_v52  ;;  %v3192_v48 = vmax.f32 %v10016_v1, %v5881_v52  ;;  %v6049_v52 = vld [vmem:[%s9342_s3 + $0x160] sm:$0x1f]  }
 0x382   : > { %v5884_v45 = vpop.permute.xlu1 %5883  ;;  %v3191_v46 = vmax.f32 %v10018_v53, %v3005_v25  ;;  %3599 = vmatmul.mubr.bf16.gmra.mxu1 %v8330_v57 }
 0x383   : > { %v5886_v47 = vunpack.i.h.bf16 %v5884_v45  ;;  %v5885_v58 = vunpack.i.l.bf16 %v5884_v45  ;;  %5292 = vmatprep.mubr.msk.bf16.mxu1 %vm3365_vm4, %v8422_v51  ;;  %3734 = vmatpush1.bf16.msra.mxu1 %v6036_v32  ;;  %v3244_v34 = vmax.f32 %v3188_v2, %v3192_v48  ;;  %v4105_v32 = vsel %vm3390_vm2, %v6049_v52, 0 }
 0x384   : > { %3735 = vmatprep.subr.bf16.mxu1 %v9548_v35  ;;  %v3243_v43 = vmax.f32 %v3187_v9, %v3191_v46 }
 0x385   : > { %v3194_v30 = vmax.f32 %v10020_v22, %v5886_v47  ;;  %v3006_v37 = vsel %vm2962_vm3, %v5885_v58, %v5886_v47 }
 0x386   : > { %v3193_v21 = vmax.f32 %v10023_v55, %v3006_v37 }
 0x387   : > { %v3246_v13 = vmax.f32 %v3190_v39, %v3194_v30  ;;  %3736 = vmatpush1.bf16.msra.mxu1 %v6037_v6 }
 0x388   : > { %v3245_v62 = vmax.f32 %v3189_v26, %v3193_v21  ;;  %3737 = vmatprep.subr.bf16.mxu1 %v9548_v35 }
 0x389   : > { %v8699_v11 = vpack.c.bf16 %v3246_v13, %v3244_v34 }
 0x38a   : > { %v8704_v14 = vpack.c.bf16 %v3245_v62, %v3243_v43  ;;  %3607 = vmatmul.mubr.bf16.gmra.mxu1 %v8427_v63  ;;  %v5889_v62 = vpop.permute.xlu0 %5888 }
 0x38b   : > { %5366 = vmatprep.mubr.msk.bf16.mxu0 %vm3365_vm4, %v8699_v11  ;;  %5293 = vmatprep.mubr.msk.bf16.mxu1 %vm3365_vm4, %v8470_v27  ;;  %v5891_v40 = vunpack.i.h.bf16 %v5889_v62 }
 0x38c   : > { %4005 = vmatmul.mubr.bf16.gmra.mxu0 %v8704_v14  ;;  %3738 = vmatpush1.bf16.msra.mxu1 %v6038_v50  ;;  %v5894_v13 = vpop.permute.xlu1 %5893 }
 0x38d   : > { %3739 = vmatprep.subr.bf16.mxu1 %v9548_v35 }
 0x390   : > { %3740 = vmatpush1.bf16.msra.mxu1 %v6039_v18  ;;  %v5896_v18 = vunpack.i.h.bf16 %v5894_v13 }
 0x391   : > { %3755 = vmatprep.subr.bf16.mxu1 %v9548_v35 }
 0x392   : > { %3615 = vmatmul.mubr.bf16.gmra.mxu1 %v8472_v8 }
 0x393   : > { %5294 = vmatprep.mubr.msk.bf16.mxu1 %vm3365_vm4, %v8500_v60 }
 0x394   : > { %3756 = vmatpush2.bf16.msra.mxu1 %v3723_v4  ;;  %v10024_v4 = vld [vmem:[#allocation49_spill] sm:$0xff] }
 0x395   : > { %4107 = vmatprep.subr.bf16.mxu1 %v9548_v35 }
 0x39a   : > { %3623 = vmatmul.mubr.bf16.gmra.mxu1 %v8502_v54 }
 0x39b   : > { %5295 = vmatprep.mubr.msk.bf16.mxu1 %vm3365_vm4, %v8530_v12 }
 0x3a2   : > { %3631 = vmatmul.mubr.bf16.gmra.mxu1 %v8532_v3 }
 0x3a3   : > { %5296 = vmatprep.mubr.msk.bf16.mxu1 %vm3365_vm4, %v8560_v29 }
 0x3aa   : > { %3639 = vmatmul.mubr.bf16.gmra.mxu1 %v8562_v28 }
 0x3ab   : > { %5324 = vmatprep.mubr.msk.bf16.mxu1 %vm3365_vm4, %v8315_v36  ;;  %v6043_v36 = vld [vmem:[%s9342_s3 + $0x148] sm:$0xff]  }
 0x3b2   : > { %3758 = vmatmul.mubr.bf16.vlgmr.msra.gmra.mxu1 %v8330_v57 }
 0x3b3   : > { %5325 = vmatprep.mubr.msk.bf16.mxu1 %vm3365_vm4, %v8422_v51  ;;  %4108 = vmatpush1.bf16.msra.mxu1 %v6041_v5  ;;  %v6044_v51 = vld [vmem:[%s9342_s3 + $0x140] sm:$0xff]   ;;  %v10025_v5 = vmax.f32 %v10024_v4, 0.0 }
 0x3b4   : > { %4109 = vmatprep.subr.bf16.mxu1 %v9548_v35 }
 0x3b7   : > { %4110 = vmatpush1.bf16.msra.mxu1 %v6042_v16 }
 0x3b8   : > { %4111 = vmatprep.subr.bf16.mxu1 %v9548_v35 }
 0x3ba   : > { %v8749_v38 = vpop.f32.mrf.mxu1  ;;  %3766 = vmatmul.mubr.bf16.gmra.mxu1 %v8427_v63  ;;  %v6046_v63 = vld [vmem:[%s9342_s3 + $0x130] sm:$0xff]  }
 0x3bb   : > { %5326 = vmatprep.mubr.msk.bf16.mxu1 %vm3365_vm4, %v8470_v27  ;;  %4112 = vmatpush1.bf16.msra.mxu1 %v6043_v36 }
 0x3bc   : > { %v3430_v57 = vpop.f32.mrf.mxu1  ;;  %4113 = vmatprep.subr.bf16.mxu1 %v9548_v35 }
 0x3be   : > { %v8758_v23 = vpop.f32.mrf.mxu1 }
 0x3bf   : > { %4114 = vmatpush1.bf16.msra.mxu1 %v6044_v51 }
 0x3c0   : > { %v3433_v44 = vpop.f32.mrf.mxu1  ;;  %4115 = vmatprep.subr.bf16.mxu1 %v9548_v35 }
 0x3c1   : > { %v10026_v44 = vld [vmem:[#allocation38_spill] sm:$0xff] }
 0x3c2   : > { %3774 = vmatmul.mubr.bf16.gmra.mxu1 %v8472_v8 }
 0x3c3   : > { %5327 = vmatprep.mubr.msk.bf16.mxu1 %vm3365_vm4, %v8500_v60  ;;  %4116 = vmatpush1.bf16.msra.mxu1 %v6045_v15 }
 0x3c4   : > { %4117 = vmatprep.subr.bf16.mxu1 %v9548_v35 }
 0x3c7   : > { %4118 = vmatpush1.bf16.msra.mxu1 %v6046_v63  ;;  %v5895_v63 = vunpack.i.l.bf16 %v5894_v13 }
 0x3c8   : > { %4119 = vmatprep.subr.bf16.mxu1 %v9548_v35 }
 0x3ca   : > { %3782 = vmatmul.mubr.bf16.gmra.mxu1 %v8502_v54 }
 0x3cb   : > { %5328 = vmatprep.mubr.msk.bf16.mxu1 %vm3365_vm4, %v8530_v12  ;;  %4120 = vmatpush1.bf16.msra.mxu1 %v6047_v24 }
 0x3cc   : > { %4121 = vmatprep.subr.bf16.mxu1 %v9548_v35 }
 0x3cd   : > { %v8775_v59 = vpop.f32.mrf.mxu1 }
 0x3cf   : > { %v3438_v61 = vpop.f32.mrf.mxu1  ;;  %4122 = vmatpush1.bf16.msra.mxu1 %v6048_v33 }
 0x3d0   : > { %4137 = vmatprep.subr.bf16.mxu1 %v9548_v35 }
 0x3d1   : > { %v8787_v19 = vpop.f32.mrf.mxu1 }
 0x3d2   : > { %3790 = vmatmul.mubr.bf16.gmra.mxu1 %v8532_v3 }
 0x3d3   : > { %v3441_v25 = vpop.f32.mrf.mxu1  ;;  %5329 = vmatprep.mubr.msk.bf16.mxu1 %vm3365_vm4, %v8560_v29  ;;  %4138 = vmatpush2.bf16.msra.mxu1 %v4105_v32  ;;  %v10030_v32 = vld [vmem:[#allocation83_spill] sm:$0xff] }
 0x3da   : > { %3798 = vmatmul.mubr.bf16.gmra.mxu1 %v8562_v28 }
 0x3db   : > { %5330 = vmatprep.mubr.msk.bf16.mxu1 %vm3365_vm4, %v8590_v42 }
 0x3df   : > { %v8794_v49 = vpop.f32.mrf.mxu1  ;;  %v8796_v45 = vpop.f32.mrf.mxu0 }
 0x3e1   : > { %v3446_v17 = vpop.f32.mrf.mxu1  ;;  %v3952_v1 = vpop.f32.mrf.mxu0 }
 0x3e2   : > { %3806 = vmatmul.mubr.bf16.gmra.mxu1 %v8594_v56  ;;  %v10031_v17 = vmax.f32 %v10030_v32, 0.0 }
 0x3e3   : > { %v8801_v35 = vpop.f32.mrf.mxu1  ;;  %v8803_v48 = vpop.f32.mrf.mxu0  ;;  %5331 = vmatprep.mubr.msk.bf16.mxu1 %vm3365_vm4, %v8650_v41 }
 0x3e4   : > { %v3196_v1 = vmax.f32 %v10031_v17, %v5891_v40 }
 0x3e5   : > { %v3449_v47 = vpop.f32.mrf.mxu1  ;;  %v3955_v58 = vpop.f32.mrf.mxu0 }
 0x3e6   : > { %v5890_v47 = vunpack.i.l.bf16 %v5889_v62 }
 0x3e9   : > { %v8808_v31 = vpop.f32.mrf.mxu1  ;;  %v8810_v2 = vpop.f32.mrf.mxu0 }
 0x3ea   : > { %3814 = vmatmul.mubr.bf16.gmra.mxu1 %v8655_v0 }
 0x3eb   : > { %5394 = vmatprep.mubr.msk.bf16.mxu1 %vm3365_vm4, %v8470_v27  ;;  %v3454_v53 = vpop.f32.mrf.mxu1  ;;  %v3960_v46 = vpop.f32.mrf.mxu0 }
 0x3ed   : > { %v8815_v7 = vpop.f32.mrf.mxu1  ;;  %v8817_v39 = vpop.f32.mrf.mxu0 }
 0x3ef   : > { %v3457_v22 = vpop.f32.mrf.mxu1  ;;  %v3963_v30 = vpop.f32.mrf.mxu0 }
 0x3f0   : > { %v3008_v22 = vsel %vm2962_vm3, %v5895_v63, %v5896_v18 }
 0x3f2   : > { %4140 = vmatmul.mubr.bf16.vlgmr.msra.gmra.mxu1 %v8472_v8 }
 0x3f3   : > { %5395 = vmatprep.mubr.msk.bf16.mxu1 %vm3365_vm4, %v8500_v60 }
 0x3f8   : > { %v8822_v37 = vpop.f32.mrf.mxu1  ;;  %v8824_v6 = vpop.f32.mrf.mxu0 }
 0x3fa   : > { %4148 = vmatmul.mubr.bf16.gmra.mxu1 %v8502_v54  ;;  %v3462_v27 = vpop.f32.mrf.mxu1  ;;  %v3968_v10 = vpop.f32.mrf.mxu0 }
 0x3fb   : > { %5396 = vmatprep.mubr.msk.bf16.mxu1 %vm3365_vm4, %v8530_v12 }
 0x3fc   : > { %v8829_v9 = vpop.f32.mrf.mxu1  ;;  %v8831_v20 = vpop.f32.mrf.mxu0 }
 0x3fe   : > { %v3465_v26 = vpop.f32.mrf.mxu1  ;;  %v3971_v8 = vpop.f32.mrf.mxu0 }
 0x3ff   : > { %v10032_v26 = vld [vmem:[#allocation44_spill] sm:$0xff] }
 0x400   : > { %v10033_v8 = vmax.f32 %v10032_v26, 0.0 }
 0x402   : > { %4156 = vmatmul.mubr.bf16.gmra.mxu1 %v8532_v3 }
 0x403   : > { %5397 = vmatprep.mubr.msk.bf16.mxu1 %vm3365_vm4, %v8560_v29  ;;  %v5904_v29 = vpop.permute.xlu1 %5903 }
 0x404   : > { %v5906_v50 = vunpack.i.h.bf16 %v5904_v29  ;;  %v5905_v36 = vunpack.i.l.bf16 %v5904_v29  ;;  %v10036_v29 = vld [vmem:[#allocation22_spill] sm:$0xff] }
 0x406   : > { %v3202_v16 = vmax.f32 %v10025_v5, %v5906_v50  ;;  %v3010_v58 = vsel %vm2962_vm3, %v5905_v36, %v5906_v50 }
 0x408   : > { %v8836_v60 = vpop.f32.mrf.mxu1  ;;  %v8838_v55 = vpop.f32.mrf.mxu0 }
 0x40a   : > { %4164 = vmatmul.mubr.bf16.gmra.mxu1 %v8562_v28  ;;  %v3470_v54 = vpop.f32.mrf.mxu1  ;;  %v3976_v12 = vpop.f32.mrf.mxu0 }
 0x40b   : > { %5398 = vmatprep.mubr.msk.bf16.mxu1 %vm3365_vm4, %v8590_v42  ;;  %v5899_v28 = vpop.permute.xlu0 %5898  ;;  %v3201_v54 = vmax.f32 %v10033_v8, %v3010_v58  ;;  %v3007_v12 = vsel %vm2962_vm3, %v5890_v47, %v5891_v40 }
 0x40c   : > { %v8843_v21 = vpop.f32.mrf.mxu1  ;;  %v8845_v34 = vpop.f32.mrf.mxu0  ;;  %v5901_v42 = vunpack.i.h.bf16 %v5899_v28  ;;  %v5900_v61 = vunpack.i.l.bf16 %v5899_v28  ;;  %v10037_v28 = vmax.f32 %v10036_v29, 0.0 }
 0x40e   : > { %v3473_v3 = vpop.f32.mrf.mxu1  ;;  %v3979_v43 = vpop.f32.mrf.mxu0  ;;  %v3009_v30 = vsel %vm2962_vm3, %v5900_v61, %v5901_v42 }
 0x40f   : > { %v10034_v3 = vld [vmem:[#allocation37_spill] sm:$0xff]  ;;  %v3199_v50 = vmax.f32 %v10037_v28, %v3009_v30 }
 0x410   : > { %v10035_v43 = vmax.f32 %v10034_v3, 0.0 }
 0x412   : > { %4172 = vmatmul.mubr.bf16.gmra.mxu1 %v8594_v56  ;;  %v10027_v56 = vmax.f32 %v10026_v44, 0.0  ;;  %v3197_v62 = vmax.f32 %v10035_v43, %v3008_v22 }
 0x413   : > { %5399 = vmatprep.mubr.msk.bf16.mxu1 %vm3365_vm4, %v8650_v41  ;;  %v10028_v41 = vld [vmem:[#allocation43_spill] sm:$0xff] }
 0x414   : > { %v3198_v15 = vmax.f32 %v10027_v56, %v5896_v18  ;;  %v10029_v24 = vmax.f32 %v10028_v41, 0.0  ;;  %v10038_v18 = vld [vmem:[#allocation21_spill] sm:$0xff]  ;;  %v3249_v5 = vmax.f32 %v3197_v62, %v3201_v54 }
 0x416   : > { %v3200_v33 = vmax.f32 %v10029_v24, %v5901_v42  ;;  %v10039_v42 = vmax.f32 %v10038_v18, 0.0 }
 0x418   : > { %v3248_v27 = vmax.f32 %v3196_v1, %v3200_v33  ;;  %v3195_v4 = vmax.f32 %v10039_v42, %v3007_v12 }
 0x419   : > { %v8852_v57 = vpop.f32.mrf.mxu1  ;;  %v8854_v51 = vpop.f32.mrf.mxu0 }
 0x41a   : > { %4180 = vmatmul.mubr.bf16.gmra.mxu1 %v8655_v0  ;;  %v3250_v0 = vmax.f32 %v3198_v15, %v3202_v16  ;;  %v3247_v16 = vmax.f32 %v3195_v4, %v3199_v50 }
 0x41b   : > { %5400 = vmatprep.mubr.msk.bf16.mxu1 %vm3365_vm4, %v8699_v11  ;;  %v3478_v52 = vpop.f32.mrf.mxu1  ;;  %v3984_v25 = vpop.f32.mrf.mxu0 }
 0x41c   : > { %v3274_v13 = vpack.c.bf16 %v3250_v0, %v3248_v27  ;;  %v3273_v36 = vpack.c.bf16 %v3249_v5, %v3247_v16 }
 0x41d   : > { %v8866_v53 = vpop.f32.mrf.mxu1  ;;  %v8868_v46 = vpop.f32.mrf.mxu0 }
 0x41f   : > { %v3481_v10 = vpop.f32.mrf.mxu1  ;;  %v3987_v11 = vpop.f32.mrf.mxu0 }
 0x422   : > { %4188 = vmatmul.mubr.bf16.gmra.mxu1 %v8704_v14 }
 0x423   : > { %5401 = vmatprep.mubr.msk.bf16.mxu1 %vm3365_vm4, %v3274_v13 }
 0x42a   : > { %v3484_v44 = vpop.f32.mrf.mxu1  ;;  %v8883_v56 = vpop.f32.mrf.mxu0  ;;  %4196 = vmatmul.mubr.bf16.gmra.mxu1 %v3273_v36 }
 0x42c   : > { %v3486_v40 = vpop.f32.mrf.mxu1  ;;  %v3992_v15 = vpop.f32.mrf.mxu0 }
 0x42e   : > { %v3487_v63 = vpop.f32.mrf.mxu1  ;;  %v8885_v41 = vpop.f32.mrf.mxu0 }
 0x430   : > { %v3489_v24 = vpop.f32.mrf.mxu1  ;;  %v3995_v33 = vpop.f32.mrf.mxu0 }
 0x432   : > { %v3584_v14 = vpop.f32.mrf.mxu1 }
 0x434   : > { %v3586_v61 = vpop.f32.mrf.mxu1 }
 0x436   : > { %v3587_v52 = vpop.f32.mrf.mxu1 }
 0x438   : > { %v3589_v25 = vpop.f32.mrf.mxu1 }
 0x43a   : > { %v3592_v32 = vpop.f32.mrf.mxu1  ;;  %v8887_v17 = vpop.f32.mrf.mxu0 }
 0x43c   : > { %v3594_v1 = vpop.f32.mrf.mxu1  ;;  %v4000_v47 = vpop.f32.mrf.mxu0 }
 0x43e   : > { %v3595_v58 = vpop.f32.mrf.mxu1  ;;  %v8889_v0 = vpop.f32.mrf.mxu0 }
 0x440   : > { %v3597_v22 = vpop.f32.mrf.mxu1  ;;  %v4003_v30 = vpop.f32.mrf.mxu0 }
 0x442   : > { %v8891_v27 = vpop.f32.mrf.mxu1 }
 0x444   : > { %v3602_v10 = vpop.f32.mrf.mxu1 }
 0x445   : > { %v3585_v10 = vadd.f32 %v3584_v14, %v8749_v38  ;;  %v3593_v38 = vadd.f32 %v3592_v32, %v8775_v59  ;;  %v6053_v14 = vld [vmem:[%s9344_s5 + $0x28] sm:$0xff]   ;;  %v3596_v59 = vadd.f32 %v3595_v58, %v8787_v19  ;;  %v6054_v32 = vld [vmem:[%s9344_s5 + $0x58] sm:$0xff]   ;;  %v3601_v19 = vadd.f32 %v8891_v27, %v8794_v49  ;;  %v6056_v58 = vld [vmem:[%s9344_s5 + $0x50] sm:$0xff]  }
 0x446   : > { %v8893_v11 = vpop.f32.mrf.mxu1  ;;  %v6058_v49 = vld [vmem:[%s9344_s5 + $0x48] sm:$0xff]   ;;  %v6059_v27 = vld [vmem:[%s9344_s5 + $0x10] sm:$0xff]  }
 0x448   : > { %v3605_v26 = vpop.f32.mrf.mxu1 }
 0x44a   : > { %v8895_v8 = vpop.f32.mrf.mxu1 }
 0x44c   : > { %v8897_v54 = vpop.f32.mrf.mxu0  ;;  %v3610_v12 = vpop.f32.mrf.mxu1 }
 0x44e   : > { %v4008_v13 = vpop.f32.mrf.mxu0  ;;  %v8899_v3 = vpop.f32.mrf.mxu1 }
 0x450   : > { %v8901_v43 = vpop.f32.mrf.mxu0  ;;  %v3613_v62 = vpop.f32.mrf.mxu1 }
 0x451   : > { %v3588_v62 = vadd.f32 %v3587_v52, %v8758_v23  ;;  %v6052_v23 = vld [vmem:[%s9344_s5 + $0x60] sm:$0xff]  }
 0x452   : > { %v4011_v29 = vpop.f32.mrf.mxu0  ;;  %v8903_v28 = vpop.f32.mrf.mxu1 }
 0x454   : > { %v3618_v50 = vpop.f32.mrf.mxu1 }
 0x456   : > { %v8905_v18 = vpop.f32.mrf.mxu1 }
 0x458   : > { %v3621_v42 = vpop.f32.mrf.mxu1 }
 0x45a   : > { %v8907_v4 = vpop.f32.mrf.mxu1 }
 0x45c   : > { %v3626_v5 = vpop.f32.mrf.mxu1 }
 0x45d   : > { %v6123_v5 = vmov 0.0  }
 0x45e   : > { %v8909_v16 = vpop.f32.mrf.mxu1  ;;  %5546 = vmatprep.subr.bf16.mxu0 %v6123_v5  ;;  %5564 = vmatprep.subr.bf16.mxu1 %v6123_v5 }
 0x45f   : > { %5560 = vmatprep.mubr.msk.bf16.mxu0 %vm6125_vm5, %v6123_v5  ;;  %5578 = vmatprep.mubr.msk.bf16.mxu1 %vm6125_vm5, %v6123_v5 }
 0x460   : > { %v3629_v36 = vpop.f32.mrf.mxu1 }
 0x462   : > { %v8911_v40 = vpop.f32.mrf.mxu1 }
 0x464   : > { %v3634_v15 = vpop.f32.mrf.mxu1 }
 0x466   : > { %v8913_v24 = vpop.f32.mrf.mxu1 }
 0x468   : > { %v3637_v33 = vpop.f32.mrf.mxu1 }
 0x469   : > { %v6055_v33 = vld [vmem:[%s9344_s5 + $0x20] sm:$0xff]  }
 0x46a   : > { %v3640_v61 = vpop.f32.mrf.mxu1 }
 0x46b   : > { %v8915_v25 = vadd.f32 %v3640_v61, %v3484_v44  ;;  %v6050_v44 = vld [vmem:[%s9344_s5 + $0x68] sm:$0xff]  }
 0x46c   : > { %v3642_v1 = vpop.f32.mrf.mxu1  ;;  %5547 = vmatpush3.bf16.msra.mxu0 %v6050_v44  ;;  %v3609_v44 = vadd.f32 %v8895_v8, %v8808_v31  ;;  %v3625_v8 = vadd.f32 %v8907_v4, %v8836_v60 }
 0x46d   : > { %5548 = vmatprep.subr.bf16.mxu0 %v6123_v5 }
 0x46e   : > { %v3643_v47 = vpop.f32.mrf.mxu1 }
 0x46f   : > { %v8917_v22 = vadd.f32 %v3643_v47, %v3487_v63  ;;  %v6051_v63 = vld [vmem:[%s9344_s5 + $0x30] sm:$0xff]  }
 0x470   : > { %v3645_v30 = vpop.f32.mrf.mxu1  ;;  %5565 = vmatpush3.bf16.msra.mxu1 %v6051_v63  ;;  %5549 = vmatpush3.bf16.msra.mxu0 %v6052_v23 }
 0x471   : > { %5566 = vmatprep.subr.bf16.mxu1 %v6123_v5  ;;  %5550 = vmatprep.subr.bf16.mxu0 %v6123_v5  ;;  %v6057_v30 = vld [vmem:[%s9344_s5 + $0x18] sm:$0xff]  }
 0x472   : > { %v3759_v26 = vpop.f32.mrf.mxu1 }
 0x473   : > { %v8920_v12 = vadd.f32 %v3759_v26, %v3585_v10 }
 0x474   : > { %v3761_v13 = vpop.f32.mrf.mxu1  ;;  %5567 = vmatpush3.bf16.msra.mxu1 %v6053_v14  ;;  %5551 = vmatpush3.bf16.msra.mxu0 %v6054_v32 }
 0x475   : > { %5568 = vmatprep.subr.bf16.mxu1 %v6123_v5  ;;  %5552 = vmatprep.subr.bf16.mxu0 %v6123_v5 }
 0x476   : > { %v3762_v29 = vpop.f32.mrf.mxu1 }
 0x477   : > { %v8923_v50 = vadd.f32 %v3762_v29, %v3588_v62 }
 0x478   : > { %v3764_v42 = vpop.f32.mrf.mxu1  ;;  %5569 = vmatpush3.bf16.msra.mxu1 %v6055_v33  ;;  %5553 = vmatpush3.bf16.msra.mxu0 %v6056_v58 }
 0x479   : > { %5570 = vmatprep.subr.bf16.mxu1 %v6123_v5  ;;  %5554 = vmatprep.subr.bf16.mxu0 %v6123_v5 }
 0x47a   : > { %v3767_v52 = vpop.f32.mrf.mxu1 }
 0x47b   : > { %v8942_v36 = vadd.f32 %v3767_v52, %v3593_v38  ;;  %v3617_v52 = vadd.f32 %v8903_v28, %v8822_v37  ;;  %v3633_v37 = vadd.f32 %v8911_v40, %v8852_v57 }
 0x47c   : > { %v3769_v15 = vpop.f32.mrf.mxu1  ;;  %5571 = vmatpush3.bf16.msra.mxu1 %v6057_v30  ;;  %5555 = vmatpush3.bf16.msra.mxu0 %v6058_v49 }
 0x47d   : > { %5572 = vmatprep.subr.bf16.mxu1 %v6123_v5  ;;  %5556 = vmatprep.subr.bf16.mxu0 %v6123_v5 }
 0x47e   : > { %v3770_v61 = vpop.f32.mrf.mxu1 }
 0x47f   : > { %v8953_v1 = vadd.f32 %v3770_v61, %v3596_v59 }
 0x480   : > { %v3772_v47 = vpop.f32.mrf.mxu1  ;;  %5573 = vmatpush3.bf16.msra.mxu1 %v6059_v27 }
 0x481   : > { %5574 = vmatprep.subr.bf16.mxu1 %v6123_v5 }
 0x482   : > { %v3775_v10 = vpop.f32.mrf.mxu1 }
 0x483   : > { %v3826_v26 = vadd.f32 %v3775_v10, %v3601_v19 }
 0x484   : > { %v3777_v13 = vpop.f32.mrf.mxu1 }
 0x486   : > { %v3778_v62 = vpop.f32.mrf.mxu1 }
 0x488   : > { %v3780_v29 = vpop.f32.mrf.mxu1 }
 0x48a   : > { %v3783_v63 = vpop.f32.mrf.mxu1 }
 0x48b   : > { %v3828_v42 = vadd.f32 %v3783_v63, %v3609_v44 }
 0x48c   : > { %v3785_v38 = vpop.f32.mrf.mxu1 }
 0x48e   : > { %v3786_v23 = vpop.f32.mrf.mxu1 }
 0x490   : > { %v3788_v14 = vpop.f32.mrf.mxu1 }
 0x492   : > { %v3791_v15 = vpop.f32.mrf.mxu1 }
 0x493   : > { %v8979_v59 = vadd.f32 %v3791_v15, %v3617_v52 }
 0x494   : > { %v3793_v32 = vpop.f32.mrf.mxu1 }
 0x496   : > { %v8981_v33 = vpop.f32.mrf.mxu1 }
 0x498   : > { %v3796_v31 = vpop.f32.mrf.mxu1 }
 0x499   : > { %v3604_v31 = vadd.f32 %v8893_v11, %v8801_v35 }
 0x49a   : > { %v3799_v61 = vpop.f32.mrf.mxu1 }
 0x49b   : > { %v8985_v47 = vadd.f32 %v3799_v61, %v3625_v8  ;;  %v3827_v61 = vadd.f32 %v3778_v62, %v3604_v31 }
 0x49c   : > { %v3801_v19 = vpop.f32.mrf.mxu1 }
 0x49d   : > { %v4017_v19 = vadd.f32 %v8824_v6, %v3826_v26  ;;  %v4018_v35 = vadd.f32 %v8831_v20, %v3827_v61  ;;  %v9014_v6 = vld [vmem:[%s9343_s4] ss:$0 sm:$0xff]  ;;  %v6061_v20 = vld [vmem:[%s9344_s5 + $0x8] sm:$0xff]   ;;  %v3620_v61 = vadd.f32 %v8905_v18, %v8829_v9 }
 0x49e   : > { %v8987_v58 = vpop.f32.mrf.mxu1  ;;  %5575 = vmatpush3.bf16.msra.mxu1 %v6061_v20 }
 0x49f   : > { %5576 = vmatprep.subr.bf16.mxu1 %v6123_v5 }
 0x4a0   : > { %v3804_v30 = vpop.f32.mrf.mxu1 }
 0x4a1   : > { %v4014_v30 = vadd.f32 %v8803_v48, %v8923_v50  ;;  %v3612_v48 = vadd.f32 %v8899_v3, %v8815_v7  ;;  %v4019_v7 = vadd.f32 %v8838_v55, %v3828_v42  ;;  %v4016_v3 = vadd.f32 %v8817_v39, %v8953_v1 }
 0x4a2   : > { %v3807_v28 = vpop.f32.mrf.mxu1 }
 0x4a3   : > { %v8991_v10 = vadd.f32 %v3807_v28, %v3633_v37 }
 0x4a4   : > { %v3809_v13 = vpop.f32.mrf.mxu1 }
 0x4a5   : > { %v6060_v13 = vld [vmem:[%s9344_s5 + $0x40] sm:$0xff]  }
 0x4a6   : > { %v8993_v49 = vpop.f32.mrf.mxu1  ;;  %5557 = vmatpush3.bf16.msra.mxu0 %v6060_v13 }
 0x4a7   : > { %5558 = vmatprep.subr.bf16.mxu0 %v6123_v5 }
 0x4a8   : > { %v3812_v27 = vpop.f32.mrf.mxu1 }
 0x4a9   : > { %v4013_v27 = vadd.f32 %v8796_v45, %v8920_v12  ;;  %v3829_v12 = vadd.f32 %v3786_v23, %v3612_v48 }
 0x4aa   : > { %v3815_v29 = vpop.f32.mrf.mxu1 }
 0x4ab   : > { %v8996_v60 = vadd.f32 %v3815_v29, %v8915_v25  ;;  %v4020_v39 = vadd.f32 %v8845_v34, %v3829_v12 }
 0x4ac   : > { %v3817_v4 = vpop.f32.mrf.mxu1 }
 0x4ae   : > { %v8998_v44 = vpop.f32.mrf.mxu1 }
 0x4b0   : > { %v3820_v63 = vpop.f32.mrf.mxu1 }
 0x4b2   : > { %v4141_v38 = vpop.f32.mrf.mxu1 }
 0x4b3   : > { %v4204_v50 = vadd.f32 %v4141_v38, %v4013_v27 }
 0x4b4   : > { %v4143_v14 = vpop.f32.mrf.mxu1 }
 0x4b5   : > { %v9035_v14 = vadd.f32 %v9014_v6, %v4204_v50 }
 0x4b6   : > { %v4144_v52 = vpop.f32.mrf.mxu1 }
 0x4b7   : > { %v4205_v29 = vadd.f32 %v4144_v52, %v4014_v30 }
 0x4b8   : > { %v4146_v15 = vpop.f32.mrf.mxu1 }
 0x4b9   : > { %v9026_v4 = vadd.f32 %v9014_v6, %v4205_v29 }
 0x4ba   : > { %v4149_v57 = vpop.f32.mrf.mxu1 }
 0x4bb   : > { %v4244_v55 = vmax.f32 %v9026_v4, 0.0  ;;  %v6065_v4 = vld [vmem:[%s9344_s5 + $0x98] sm:$0xff]  }
 0x4bc   : > { %v4151_v40 = vpop.f32.mrf.mxu1 }
 0x4bd   : > { %v4015_v40 = vadd.f32 %v8810_v2, %v8942_v36  ;;  %v4243_v2 = vmax.f32 %v9035_v14, 0.0  ;;  %v6066_v14 = vld [vmem:[%s9344_s5 + $0xd8] sm:$0xff]  }
 0x4be   : > { %v4152_v32 = vpop.f32.mrf.mxu1 }
 0x4bf   : > { %v4207_v42 = vadd.f32 %v4152_v32, %v4016_v3  ;;  %v4206_v36 = vadd.f32 %v4149_v57, %v4015_v40  ;;  %v5912_v57 = vpack.i.bf16 %v4244_v55, %v4243_v2 }
 0x4c0   : > { %v4154_v8 = vpop.f32.mrf.mxu1 }
 0x4c1   : > { %v6062_v8 = vld [vmem:[%s9344_s5 + $0x38] sm:$0xff]   ;;  %v9063_v9 = vadd.f32 %v9014_v6, %v4207_v42 }
 0x4c2   : > { %v4157_v25 = vpop.f32.mrf.mxu1  ;;  %5559 = vmatpush3.bf16.msra.mxu0 %v6062_v8 }
 0x4c3   : > { %v4208_v37 = vadd.f32 %v4157_v25, %v4017_v19  ;;  %v3831_v25 = vadd.f32 %v8981_v33, %v3620_v61  ;;  %5582 = vmatprep.subr.bf16.mxu0 %v6123_v5  ;;  %v6063_v33 = vld [vmem:[%s9344_s5] sm:$0xff]  }
 0x4c4   : > { %v4159_v28 = vpop.f32.mrf.mxu1  ;;  %5577 = vmatpush3.bf16.msra.mxu1 %v6063_v33 }
 0x4c5   : > { %v9019_v26 = vadd.f32 %v9014_v6, %v4208_v37  ;;  %v4021_v37 = vadd.f32 %v8854_v51, %v8979_v59  ;;  %v9080_v51 = vadd.f32 %v9014_v6, %v4206_v36  ;;  %5600 = vmatprep.subr.bf16.mxu1 %v6123_v5  ;;  %v4025_v36 = vadd.f32 %v8887_v17, %v8991_v10 }
 0x4c6   : > { %v4160_v11 = vpop.f32.mrf.mxu1  ;;  %v3837_v10 = vadd.f32 %v8998_v44, %v8917_v22 }
 0x4c7   : > { %v4209_v62 = vadd.f32 %v4160_v11, %v4018_v35  ;;  %v4247_v52 = vmax.f32 %v9019_v26, 0.0  ;;  %v4246_v35 = vmax.f32 %v9063_v9, 0.0  ;;  %v4022_v11 = vadd.f32 %v8868_v46, %v3831_v25  ;;  %v6064_v26 = vld [vmem:[%s9344_s5 + $0xa0] sm:$0xff]   ;;  %v6068_v9 = vld [vmem:[%s9344_s5 + $0xd0] sm:$0xff]  }
 0x4c8   : > { %v4162_v45 = vpop.f32.mrf.mxu1 }
 0x4c9   : > { %v9029_v63 = vadd.f32 %v9014_v6, %v4209_v62  ;;  %v3628_v62 = vadd.f32 %v8909_v16, %v8843_v21  ;;  %v4245_v45 = vmax.f32 %v9080_v51, 0.0  ;;  %v6069_v51 = vld [vmem:[%s9344_s5 + $0x88] sm:$0xff]  }
 0x4ca   : > { %v4165_v38 = vpop.f32.mrf.mxu1 }
 0x4cb   : > { %v4248_v23 = vmax.f32 %v9029_v63, 0.0  ;;  %v4210_v15 = vadd.f32 %v4165_v38, %v4019_v7  ;;  %v3833_v7 = vadd.f32 %v8987_v58, %v3628_v62  ;;  %v4023_v38 = vadd.f32 %v8883_v56, %v8985_v47 }
 0x4cc   : > { %v4167_v31 = vpop.f32.mrf.mxu1  ;;  %v5922_v21 = vpack.i.bf16 %v4246_v35, %v4245_v45 }
 0x4cd   : > { %v5907_v1 = vpack.i.bf16 %v4248_v23, %v4247_v52  ;;  %v9055_v32 = vadd.f32 %v9014_v6, %v4210_v15  ;;  %v4024_v42 = vadd.f32 %v8885_v41, %v3833_v7 }
 0x4ce   : > { %v4168_v19 = vpop.f32.mrf.mxu1 }
 0x4cf   : > { %v4211_v34 = vadd.f32 %v4168_v19, %v4020_v39  ;;  %5908 = vrot.lane.b32.xlu0 %v5907_v1, %s6124_s16  ;;  %v4249_v59 = vmax.f32 %v9055_v32, 0.0  ;;  %v3636_v39 = vadd.f32 %v8913_v24, %v8866_v53 }
 0x4d0   : > { %v4170_v30 = vpop.f32.mrf.mxu1 }
 0x4d1   : > { %v9066_v18 = vadd.f32 %v9014_v6, %v4211_v34  ;;  %v3835_v19 = vadd.f32 %v8993_v49, %v3636_v39 }
 0x4d2   : > { %v4173_v28 = vpop.f32.mrf.mxu1 }
 0x4d3   : > { %v4250_v13 = vmax.f32 %v9066_v18, 0.0  ;;  %v4212_v27 = vadd.f32 %v4173_v28, %v4021_v37  ;;  %5913 = vrot.lane.b32.xlu0 %v5912_v57, %s6124_s16  ;;  %v4026_v37 = vadd.f32 %v8889_v0, %v3835_v19  ;;  %v4027_v0 = vadd.f32 %v8897_v54, %v8996_v60 }
 0x4d4   : > { %v4175_v29 = vpop.f32.mrf.mxu1 }
 0x4d5   : > { %v5917_v48 = vpack.i.bf16 %v4250_v13, %v4249_v59  ;;  %v9096_v20 = vadd.f32 %v9014_v6, %v4212_v27 }
 0x4d6   : > { %v4176_v50 = vpop.f32.mrf.mxu1 }
 0x4d7   : > { %v4213_v12 = vadd.f32 %v4176_v50, %v4022_v11  ;;  %5918 = vrot.lane.b32.xlu1 %v5917_v48, %s6124_s16  ;;  %v4251_v15 = vmax.f32 %v9096_v20, 0.0 }
 0x4d8   : > { %v4178_v46 = vpop.f32.mrf.mxu1 }
 0x4d9   : > { %v9101_v3 = vadd.f32 %v9014_v6, %v4213_v12  ;;  %v4028_v12 = vadd.f32 %v8901_v43, %v3837_v10 }
 0x4da   : > { %v4181_v16 = vpop.f32.mrf.mxu1 }
 0x4db   : > { %v4252_v40 = vmax.f32 %v9101_v3, 0.0  ;;  %v4214_v31 = vadd.f32 %v4181_v16, %v4023_v38  ;;  %5923 = vrot.lane.b32.xlu1 %v5922_v21, %s6124_s16 }
 0x4dc   : > { %v4183_v58 = vpop.f32.mrf.mxu1 }
 0x4dd   : > { %v5927_v56 = vpack.i.bf16 %v4252_v40, %v4251_v15  ;;  %v9120_v1 = vadd.f32 %v9014_v6, %v4214_v31 }
 0x4de   : > { %v4184_v47 = vpop.f32.mrf.mxu1 }
 0x4df   : > { %v4215_v8 = vadd.f32 %v4184_v47, %v4024_v42  ;;  %5928 = vrot.lane.b32.xlu0 %v5927_v56, %s6124_s16  ;;  %v4253_v25 = vmax.f32 %v9120_v1, 0.0 }
 0x4e0   : > { %v4186_v61 = vpop.f32.mrf.mxu1 }
 0x4e1   : > { %v9125_v41 = vadd.f32 %v9014_v6, %v4215_v8 }
 0x4e2   : > { %v4189_v34 = vpop.f32.mrf.mxu1 }
 0x4e3   : > { %v4254_v53 = vmax.f32 %v9125_v41, 0.0  ;;  %v4216_v24 = vadd.f32 %v4189_v34, %v4025_v36 }
 0x4e4   : > { %v4191_v30 = vpop.f32.mrf.mxu1 }
 0x4e5   : > { %v5932_v49 = vpack.i.bf16 %v4254_v53, %v4253_v25  ;;  %v9137_v28 = vadd.f32 %v9014_v6, %v4216_v24 }
 0x4e6   : > { %v4192_v57 = vpop.f32.mrf.mxu1 }
 0x4e7   : > { %v4217_v33 = vadd.f32 %v4192_v57, %v4026_v37  ;;  %5933 = vrot.lane.b32.xlu1 %v5932_v49, %s6124_s16  ;;  %v4255_v11 = vmax.f32 %v9137_v28, 0.0 }
 0x4e8   : > { %v4194_v17 = vpop.f32.mrf.mxu1 }
 0x4e9   : > { %v9143_v27 = vadd.f32 %v9014_v6, %v4217_v33 }
 0x4ea   : > { %v4197_v29 = vpop.f32.mrf.mxu1 }
 0x4eb   : > { %v4256_v48 = vmax.f32 %v9143_v27, 0.0  ;;  %v4218_v50 = vadd.f32 %v4197_v29, %v4027_v0  ;;  %v6071_v0 = vld [vmem:[%s9344_s5 + $0x80] sm:$0xff]  }
 0x4ec   : > { %v4199_v62 = vpop.f32.mrf.mxu1  ;;  %v6072_v29 = vld [vmem:[%s9344_s5 + $0xc0] sm:$0xff]  }
 0x4ed   : > { %v5937_v22 = vpack.i.bf16 %v4256_v48, %v4255_v11  ;;  %v9155_v46 = vadd.f32 %v9014_v6, %v4218_v50 }
 0x4ee   : > { %v4200_v44 = vpop.f32.mrf.mxu1 }
 0x4ef   : > { %v4219_v7 = vadd.f32 %v4200_v44, %v4028_v12  ;;  %5938 = vrot.lane.b32.xlu0 %v5937_v22, %s6124_s16  ;;  %v4257_v38 = vmax.f32 %v9155_v46, 0.0  ;;  %v6073_v44 = vld [vmem:[%s9344_s5 + $0x78] sm:$0xff]  }
 0x4f0   : > { %v4202_v54 = vpop.f32.mrf.mxu1 }
 0x4f1   : > { %v9159_v60 = vadd.f32 %v9014_v6, %v4219_v7  ;;  %v6074_v7 = vld [vmem:[%s9344_s5 + $0xb8] sm:$0xff]  }
 0x4f3   : > { %v4258_v43 = vmax.f32 %v9159_v60, 0.0  ;;  %v6079_v60 = vld [vmem:[%s9346_s7 + $0x30] sm:$0xff]  }
 0x4f5   : > { %v5942_v21 = vpack.i.bf16 %v4258_v43, %v4257_v38 }
 0x4f7   : > { %5943 = vrot.lane.b32.xlu1 %v5942_v21, %s6124_s16 }
 0x541   : > { %v5909_v16 = vpop.permute.xlu0 %5908 }
 0x542   : > { %v5911_v31 = vunpack.i.h.bf16 %v5909_v16  ;;  %v5910_v58 = vunpack.i.l.bf16 %v5909_v16  ;;  %v6075_v16 = vld [vmem:[%s9344_s5 + $0x70] sm:$0xff]  }
 0x544   : > { %v4328_v6 = vmax.f32 %v4248_v23, %v5911_v31  ;;  %v4327_v61 = vmax.f32 %v4247_v52, %v5910_v58  ;;  %v6076_v31 = vld [vmem:[%s9344_s5 + $0xb0] sm:$0xff]  }
 0x545   : > { %v5914_v42 = vpop.permute.xlu0 %5913 }
 0x546   : > { %v5916_v8 = vunpack.i.h.bf16 %v5914_v42  ;;  %v5915_v19 = vunpack.i.l.bf16 %v5914_v42 }
 0x548   : > { %v4324_v63 = vmax.f32 %v4244_v55, %v5916_v8  ;;  %v4323_v52 = vmax.f32 %v4243_v2, %v5915_v19  ;;  %v6067_v2 = vld [vmem:[%s9344_s5 + $0x90] sm:$0xff]   ;;  %v6082_v8 = vld [vmem:[%s9346_s7 + $0x18] sm:$0xff]   ;;  %v6084_v19 = vld [vmem:[%s9346_s7 + $0x8] sm:$0xff]  }
 0x549   : > { %v5919_v56 = vpop.permute.xlu1 %5918 }
 0x54a   : > { %v5921_v47 = vunpack.i.h.bf16 %v5919_v56  ;;  %v5920_v39 = vunpack.i.l.bf16 %v5919_v56  ;;  %v6077_v56 = vld [vmem:[%s9344_s5 + $0xa8] sm:$0xff]  }
 0x54c   : > { %v4330_v36 = vmax.f32 %v4250_v13, %v5921_v47  ;;  %v4329_v34 = vmax.f32 %v4249_v59, %v5920_v39 }
 0x54d   : > { %v5924_v24 = vpop.permute.xlu1 %5923 }
 0x54e   : > { %v4356_v30 = vmax.f32 %v4327_v61, %v4329_v34  ;;  %v4357_v37 = vmax.f32 %v4328_v6, %v4330_v36  ;;  %v5926_v49 = vunpack.i.h.bf16 %v5924_v24  ;;  %v5925_v57 = vunpack.i.l.bf16 %v5924_v24  ;;  %v6083_v61 = vld [vmem:[%s9346_s7 + $0x10] sm:$0xff]   ;;  %v6085_v36 = vld [vmem:[%s9346_s7] sm:$0xff]   ;;  %v6086_v34 = vld [vmem:[%s9348_s9 + $0x28] ss:$0 sps:$4 sm:$0x33]  }
 0x54f   : > { %v4947_v24 = vsel %vm4945_vm8, %v6086_v34, 0 }
 0x550   : > { %v4358_v23 = vpack.c.bf16 %v4357_v37, %v4356_v30  ;;  %v4326_v32 = vmax.f32 %v4246_v35, %v5926_v49  ;;  %v4325_v18 = vmax.f32 %v4245_v45, %v5925_v57  ;;  %v6070_v35 = vld [vmem:[%s9344_s5 + $0xc8] sm:$0xff]   ;;  %v6087_v30 = vld [vmem:[%s9348_s9 + $0x20] sm:$0xff]   ;;  %v6088_v37 = vld [vmem:[%s9348_s9 + $0x18] sm:$0xff]  }
 0x551   : > { %v5929_v33 = vpop.permute.xlu0 %5928 }
 0x552   : > { %v4339_v59 = vmax.f32 %v4323_v52, %v4325_v18  ;;  %v4340_v13 = vmax.f32 %v4324_v63, %v4326_v32  ;;  %5561 = vmatmul.mubr.msk.bf16.vlgmr.msra.gmra.mxu0 %vm4416_vm6, %v4358_v23  ;;  %v5931_v50 = vunpack.i.h.bf16 %v5929_v33  ;;  %v5930_v62 = vunpack.i.l.bf16 %v5929_v33 }
 0x553   : > { %5583 = vmatpush3.bf16.msra.mxu0 %v6064_v26  ;;  %5596 = vmatprep.mubr.msk.bf16.mxu0 %vm6125_vm5, %v6123_v5 }
 0x554   : > { %v4341_v55 = vpack.c.bf16 %v4340_v13, %v4339_v59  ;;  %5584 = vmatprep.subr.bf16.mxu0 %v6123_v5  ;;  %v4332_v41 = vmax.f32 %v4252_v40, %v5931_v50  ;;  %v4331_v1 = vmax.f32 %v4251_v15, %v5930_v62 }
 0x556   : > { %5579 = vmatmul.mubr.msk.bf16.vlgmr.msra.gmra.mxu1 %vm4416_vm6, %v4341_v55 }
 0x557   : > { %5585 = vmatpush3.bf16.msra.mxu0 %v6065_v4  ;;  %5601 = vmatpush3.bf16.msra.mxu1 %v6066_v14 }
 0x558   : > { %5586 = vmatprep.subr.bf16.mxu0 %v6123_v5  ;;  %5602 = vmatprep.subr.bf16.mxu1 %v6123_v5 }
 0x559   : > { %5614 = vmatprep.mubr.msk.bf16.mxu1 %vm6125_vm5, %v6123_v5  ;;  %v5934_v45 = vpop.permute.xlu1 %5933 }
 0x55a   : > { %v5936_v17 = vunpack.i.h.bf16 %v5934_v45  ;;  %v5935_v10 = vunpack.i.l.bf16 %v5934_v45 }
 0x55b   : > { %5587 = vmatpush3.bf16.msra.mxu0 %v6067_v2  ;;  %5603 = vmatpush3.bf16.msra.mxu1 %v6068_v9 }
 0x55c   : > { %5588 = vmatprep.subr.bf16.mxu0 %v6123_v5  ;;  %5604 = vmatprep.subr.bf16.mxu1 %v6123_v5  ;;  %v4334_v12 = vmax.f32 %v4254_v53, %v5936_v17  ;;  %v4333_v22 = vmax.f32 %v4253_v25, %v5935_v10 }
 0x55e   : > { %v4547_v25 = vmax.f32 %v4331_v1, %v4333_v22  ;;  %v4548_v53 = vmax.f32 %v4332_v41, %v4334_v12  ;;  %v6091_v41 = vld [vmem:[%s9348_s9] sm:$0xff]  }
 0x55f   : > { %5589 = vmatpush3.bf16.msra.mxu0 %v6069_v51  ;;  %5605 = vmatpush3.bf16.msra.mxu1 %v6070_v35  ;;  %v5477_v35 = vld [vmem:[%s9345_s6] ss:$0 sm:$0xff] }
 0x560   : > { %5590 = vmatprep.subr.bf16.mxu0 %v6123_v5  ;;  %5606 = vmatprep.subr.bf16.mxu1 %v6123_v5  ;;  %v4549_v40 = vpack.c.bf16 %v4548_v53, %v4547_v25  ;;  %v5478_v1 = vld [vmem:[%s9347_s8] ss:$0 sm:$0xff] }
 0x561   : > { %v5939_v54 = vpop.permute.xlu0 %5938 }
 0x562   : > { %v5941_v21 = vunpack.i.h.bf16 %v5939_v54  ;;  %v5940_v58 = vunpack.i.l.bf16 %v5939_v54  ;;  %v6090_v54 = vld [vmem:[%s9348_s9 + $0x8] sm:$0xff]  }
 0x563   : > { %5591 = vmatpush3.bf16.msra.mxu0 %v6071_v0  ;;  %5607 = vmatpush3.bf16.msra.mxu1 %v6072_v29 }
 0x564   : > { %5592 = vmatprep.subr.bf16.mxu0 %v6123_v5  ;;  %5608 = vmatprep.subr.bf16.mxu1 %v6123_v5  ;;  %v4336_v42 = vmax.f32 %v4256_v48, %v5941_v21  ;;  %v4335_v47 = vmax.f32 %v4255_v11, %v5940_v58  ;;  %v6078_v11 = vld [vmem:[%s9346_s7 + $0x38] ss:$0 sps:$4 sm:$0xff]  }
 0x565   : > { %v4844_v46 = vsel %vm4842_vm7, %v6078_v11, 0 }
 0x567   : > { %5593 = vmatpush3.bf16.msra.mxu0 %v6073_v44  ;;  %5609 = vmatpush3.bf16.msra.mxu1 %v6074_v7  ;;  %v6089_v7 = vld [vmem:[%s9348_s9 + $0x10] sm:$0xff]  }
 0x568   : > { %5594 = vmatprep.subr.bf16.mxu0 %v6123_v5  ;;  %5610 = vmatprep.subr.bf16.mxu1 %v6123_v5 }
 0x569   : > { %v5944_v20 = vpop.permute.xlu1 %5943 }
 0x56a   : > { %v5946_v3 = vunpack.i.h.bf16 %v5944_v20  ;;  %v5945_v15 = vunpack.i.l.bf16 %v5944_v20 }
 0x56b   : > { %5595 = vmatpush3.bf16.msra.mxu0 %v6075_v16  ;;  %5611 = vmatpush3.bf16.msra.mxu1 %v6076_v31 }
 0x56c   : > { %v4338_v39 = vmax.f32 %v4258_v43, %v5946_v3  ;;  %v4337_v6 = vmax.f32 %v4257_v38, %v5945_v15  ;;  %5612 = vmatprep.subr.bf16.mxu1 %v6123_v5  ;;  %5618 = vmatprep.subr.bf16.mxu0 %v6123_v5  ;;  %v6080_v38 = vld [vmem:[%s9346_s7 + $0x28] sm:$0xff]   ;;  %v6081_v43 = vld [vmem:[%s9346_s7 + $0x20] sm:$0xff]  }
 0x56e   : > { %v4653_v27 = vmax.f32 %v4335_v47, %v4337_v6  ;;  %v4654_v48 = vmax.f32 %v4336_v42, %v4338_v39  ;;  %5597 = vmatmul.mubr.msk.bf16.vlgmr.msra.gmra.mxu0 %vm4416_vm6, %v4549_v40 }
 0x56f   : > { %5613 = vmatpush3.bf16.msra.mxu1 %v6077_v56  ;;  %5634 = vmatprep.mubr.msk.bf16.mxu0 %vm6125_vm5, %v6123_v5 }
 0x570   : > { %v4655_v28 = vpack.c.bf16 %v4654_v48, %v4653_v27  ;;  %5638 = vmatprep.subr.bf16.mxu1 %v6123_v5  ;;  %5619 = vmatpush3.bf16.msra.mxu0 %v4844_v46 }
 0x571   : > { %5620 = vmatprep.subr.bf16.mxu0 %v6123_v5 }
 0x572   : > { %5615 = vmatmul.mubr.msk.bf16.vlgmr.msra.gmra.mxu1 %vm4416_vm6, %v4655_v28 }
 0x573   : > { %5650 = vmatprep.mubr.msk.bf16.mxu1 %vm6125_vm5, %v6123_v5  ;;  %5639 = vmatpush3.bf16.msra.mxu1 %v4947_v24 }
 0x574   : > { %5621 = vmatpush3.bf16.msra.mxu0 %v6079_v60  ;;  %5640 = vmatprep.subr.bf16.mxu1 %v6123_v5 }
 0x575   : > { %5622 = vmatprep.subr.bf16.mxu0 %v6123_v5 }
 0x577   : > { %5641 = vmatpush3.bf16.msra.mxu1 %v6087_v30 }
 0x578   : > { %5623 = vmatpush3.bf16.msra.mxu0 %v6080_v38  ;;  %5642 = vmatprep.subr.bf16.mxu1 %v6123_v5 }
 0x579   : > { %5624 = vmatprep.subr.bf16.mxu0 %v6123_v5 }
 0x57b   : > { %5643 = vmatpush3.bf16.msra.mxu1 %v6088_v37 }
 0x57c   : > { %5625 = vmatpush3.bf16.msra.mxu0 %v6081_v43  ;;  %5644 = vmatprep.subr.bf16.mxu1 %v6123_v5 }
 0x57d   : > { %5626 = vmatprep.subr.bf16.mxu0 %v6123_v5 }
 0x57f   : > { %5645 = vmatpush3.bf16.msra.mxu1 %v6089_v7 }
 0x580   : > { %5627 = vmatpush3.bf16.msra.mxu0 %v6082_v8  ;;  %5646 = vmatprep.subr.bf16.mxu1 %v6123_v5 }
 0x581   : > { %5628 = vmatprep.subr.bf16.mxu0 %v6123_v5 }
 0x583   : > { %5647 = vmatpush3.bf16.msra.mxu1 %v6090_v54 }
 0x584   : > { %5629 = vmatpush3.bf16.msra.mxu0 %v6083_v61  ;;  %5648 = vmatprep.subr.bf16.mxu1 %v6123_v5 }
 0x585   : > { %5630 = vmatprep.subr.bf16.mxu0 %v6123_v5 }
 0x587   : > { %5649 = vmatpush3.bf16.msra.mxu1 %v6091_v41 }
 0x588   : > { %5631 = vmatpush3.bf16.msra.mxu0 %v6084_v19 }
 0x589   : > { %5632 = vmatprep.subr.bf16.mxu0 %v6123_v5  ;;  %v5488_v5 = vld [vmem:[%s9349_s10] ss:$0 sm:$0xff] }
 0x58c   : > { %5633 = vmatpush3.bf16.msra.mxu0 %v6085_v36 }
 0x612   : > { %v4454_v49 = vpop.f32.mrf.mxu0 }
 0x614   : > { %v5562_v57 = vpop.f32.mrf.mxu0 }
 0x616   : > { %v4457_v63 = vpop.f32.mrf.mxu0  ;;  %v4540_v26 = vpop.f32.mrf.mxu1 }
 0x617   : > { %v4541_v13 = vadd.f32 %v4540_v26, %v4454_v49 }
 0x618   : > { %v5563_v52 = vpop.f32.mrf.mxu0  ;;  %v5580_v23 = vpop.f32.mrf.mxu1 }
 0x61a   : > { %v4543_v32 = vpop.f32.mrf.mxu1 }
 0x61b   : > { %v4544_v9 = vadd.f32 %v4543_v32, %v4457_v63 }
 0x61c   : > { %v5581_v18 = vpop.f32.mrf.mxu1 }
 0x62e   : > { %v4644_v59 = vpop.f32.mrf.mxu0 }
 0x62f   : > { %v4651_v14 = vadd.f32 %v4644_v59, %v4541_v13 }
 0x630   : > { %v5598_v4 = vpop.f32.mrf.mxu0 }
 0x632   : > { %v4647_v55 = vpop.f32.mrf.mxu0  ;;  %v4750_v2 = vpop.f32.mrf.mxu1 }
 0x633   : > { %v4757_v51 = vadd.f32 %v4750_v2, %v4651_v14  ;;  %v4652_v17 = vadd.f32 %v4647_v55, %v4544_v9 }
 0x634   : > { %v5599_v45 = vpop.f32.mrf.mxu0  ;;  %v5616_v33 = vpop.f32.mrf.mxu1 }
 0x635   : > { %v4766_v0 = vadd.f32 %v5477_v35, %v4757_v51 }
 0x636   : > { %v4753_v10 = vpop.f32.mrf.mxu1 }
 0x637   : > { %v4758_v29 = vadd.f32 %v4753_v10, %v4652_v17  ;;  %v4768_v12 = vmax.f32 %v4766_v0, 0.0 }
 0x638   : > { %v5617_v50 = vpop.f32.mrf.mxu1 }
 0x639   : > { %v4767_v62 = vadd.f32 %v5477_v35, %v4758_v29 }
 0x63b   : > { %v4769_v22 = vmax.f32 %v4767_v62, 0.0 }
 0x63d   : > { %v4770_v44 = vpack.c.bf16 %v4769_v22, %v4768_v12 }
 0x63f   : > { %5635 = vmatmul.mubr.msk.bf16.vlgmr.msra.gmra.mxu0 %vm4838_vm9, %v4770_v44 }
 0x6ff   : > { %v4880_v25 = vpop.f32.mrf.mxu0 }
 0x700   : > { %v4881_v21 = vadd.f32 %v5478_v1, %v4880_v25 }
 0x701   : > { %v5636_v53 = vpop.f32.mrf.mxu0 }
 0x702   : > { %v4887_v20 = vmax.f32 %v4881_v21, 0.0 }
 0x703   : > { %v4883_v16 = vpop.f32.mrf.mxu0 }
 0x704   : > { %v4884_v31 = vadd.f32 %v5478_v1, %v4883_v16 }
 0x705   : > { %v5637_v58 = vpop.f32.mrf.mxu0 }
 0x706   : > { %v4888_v3 = vmax.f32 %v4884_v31, 0.0 }
 0x708   : > { %v4889_v15 = vpack.c.bf16 %v4888_v3, %v4887_v20 }
 0x70a   : > { %5651 = vmatmul.mubr.msk.bf16.vlgmr.msra.gmra.mxu1 %vm4941_vm10, %v4889_v15 }
 0x7ca   : > { %v4983_v40 = vpop.f32.mrf.mxu1 }
 0x7cb   : > { %v4984_v42 = vadd.f32 %v5488_v5, %v4983_v40 }
 0x7cc   : > { %v5652_v56 = vpop.f32.mrf.mxu1 }
 0x7cd   : > { %4990 = vst [vmem:[%s388_s19] sm:$0xff] %v4984_v42 }
 0x7ce   : > { %v4986_v47 = vpop.f32.mrf.mxu1 }
 0x7cf   : > { %v4987_v39 = vadd.f32 %v5488_v5, %v4986_v47 }
 0x7d0   : > { %v5653_v6 = vpop.f32.mrf.mxu1 }
 0x7d1   : > { %4991 = vst [vmem:[%s388_s19 + $0x8] sm:$0xff] %v4987_v39 }
 0x7d2 PF: > { %s21_s17 = sadd.s32 1, %s6119_s17  }
 0x7d3   : > { %p18_p5 = scmp.ge.s32.totalorder %s21_s17, 4  }
 0x7d5   :  { %20 = sbr.rel (!%p18_p5) target bundleno = 1 (0x1), region = 105 }

</bundles_post_ra>
